<compile_context>
chip_gen: v7x
topology: tpu7x:2x2x1
jax: 0.10.0
libtpu: 0.0.40
codegen_flags: <defaults>
</compile_context>

<pallas_src>
import functools

import jax
import jax.numpy as jnp
from jax.experimental import pallas as pl
from jax.experimental.pallas import tpu as pltpu


def _round_up(x, m):
    return ((x + m - 1) // m) * m


def _textcnn_kernel(seq_len, ids_ref, emb_ref, w_ref, bm_ref, wfc_ref, bfc_ref,
                    out_ref, x_ref):
    """One batch tile: fused gather -> im2col conv matmul -> ReLU/masked max-pool -> FC -> softmax.

    seq_len  : python int              original (un-padded) sentence length L
    ids_ref  : (B_pad*L,)   i32 SMEM   scalar-prefetched token ids, row-major (b, t)
    emb_ref  : (V, 1, E_pad) f32 VMEM  padded embedding table (resident, constant block)
    w_ref    : (max_fs*E_pad, NF_pad) bf16  stacked conv weights (zero-padded taps/channels/cols)
    bm_ref   : (lout_pad, NF_pad) f32  conv bias at valid (t, col), -1e30 at invalid -> ReLU kills it
    wfc_ref  : (NF_pad, C_pad) bf16    FC weight (rows permuted to kernel feature order)
    bfc_ref  : (1, C_pad) f32          FC bias (-1e30 in padded class columns)
    out_ref  : (TB, C_pad) f32         softmax probabilities (lane-dense)
    x_ref    : (TB, L_pad, E_pad) f32  VMEM scratch holding the gathered embeddings for this tile
    """
    TB, L_pad, E_pad = x_ref.shape
    lout_pad, NF_pad = bm_ref.shape
    max_fs = w_ref.shape[0] // E_pad
    n_zero = L_pad - seq_len

    # ---- fused embedding gather (token ids from SMEM, rows from the VMEM-resident table) ----
    tile_base = pl.program_id(0) * (TB * seq_len)

    @pl.loop(0, TB)
    def _(b):
        base = tile_base + b * seq_len
        rows = [emb_ref[ids_ref[base + t]] for t in range(seq_len)]   # each (1, E_pad)
        if n_zero:
            rows.append(jnp.zeros((n_zero, E_pad), x_ref.dtype))      # zero-padded time tail
        x_ref[b] = jnp.concatenate(rows, axis=0)                      # (L_pad, E_pad)

    # ---- aligned im2col: slab[b, t, k*E_pad + e] = x[b, t + k, e] ----
    x = x_ref[...].astype(jnp.bfloat16)                               # cast once, before the blow-up
    slab = jnp.concatenate([x[:, k:k + lout_pad, :] for k in range(max_fs)], axis=-1)
    slab2d = slab.reshape(TB * lout_pad, max_fs * E_pad)              # layout-preserving merge

    # All conv blocks in a single MXU matmul, f32 accumulation.
    conv = jnp.dot(slab2d, w_ref[...], preferred_element_type=jnp.float32)
    conv = conv.reshape(TB, lout_pad, NF_pad) + bm_ref[...][None]     # bias + (-1e30) validity mask

    # ReLU then max-pool over time (invalid positions became <= -1e30 -> ReLU -> 0 <= valid max).
    pooled = jnp.max(jnp.maximum(conv, 0.0), axis=1)                  # (TB, NF_pad) f32

    # FC (single stacked feature block -> no concatenate needed).
    logits = jnp.dot(pooled.astype(wfc_ref.dtype), wfc_ref[...],
                     preferred_element_type=jnp.float32) + bfc_ref[...]   # (TB, C_pad)

    # Softmax over classes; padded class columns carry -1e30 bias -> exp underflows to 0.
    m = jnp.max(logits, axis=1, keepdims=True)
    e = jnp.exp(logits - m)
    denom = jnp.sum(e, axis=1, keepdims=True)
    out_ref[...] = e * pl.reciprocal(denom, approx=True)


def prepare_textcnn_params(emb_table, conv_ws, conv_bs, fc_w, fc_b, filter_sizes,
                           max_sent_len, compute_dtype=jnp.bfloat16, mxu_multiple=256):
    """One-time weight repacking (hoisted out of the per-call path).

    conv_ws[j]: (F, E, fs_j)  PyTorch Conv1d layout (out, in, kernel)
    conv_bs[j]: (F,)
    fc_w      : (C, n*F)      PyTorch Linear layout; feature index = f*n + j
    fc_b      : (C,)
    mxu_multiple: 256 for v6e/v7x (2x256^2 MXU), 128 for v5e (4x128^2 MXU).
    """
    filter_sizes = tuple(int(f) for f in filter_sizes)
    n = len(filter_sizes)
    V, E = emb_table.shape
    F = conv_ws[0].shape[0]
    C = fc_w.shape[0]
    L = int(max_sent_len)
    max_fs, min_fs = max(filter_sizes), min(filter_sizes)

    E_pad = _round_up(E, 128)                  # lane-dense embedding dim
    lout = L - min_fs + 1                      # longest valid conv output length
    lout_pad = _round_up(lout, 8)              # sublane-aligned conv output length
    L_pad = lout_pad + max_fs - 1              # time padding so all im2col taps stay in bounds
    K = max_fs * E_pad                         # im2col contraction dim (128-aligned)
    NF = n * F
    NF_pad = _round_up(NF, mxu_multiple)       # MXU-aligned conv-feature dim
    C_pad = _round_up(C, 128)                  # lane-dense class dim

    # Embedding table, zero-padded channels, stored (V, 1, E_pad) f32 so the in-kernel gather is a
    # dynamic *leading*-axis row load (exact, no bf16 rounding of the table itself).
    emb_pad = jnp.zeros((V, 1, E_pad), jnp.float32).at[:, 0, :E].set(emb_table.astype(jnp.float32))

    # Stacked conv weight + bias/validity map.
    W_all = jnp.zeros((K, NF_pad), jnp.float32)
    bm = jnp.full((lout_pad, NF_pad), -1e30, jnp.float32)      # -1e30 == invalid (ReLU -> 0)
    for j, (w, b, fs) in enumerate(zip(conv_ws, conv_bs, filter_sizes)):
        w32 = w.astype(jnp.float32)
        for k in range(fs):
            W_all = W_all.at[k * E_pad:k * E_pad + E, j * F:(j + 1) * F].set(w32[:, :, k].T)
        valid = L - fs + 1
        bm = bm.at[:valid, j * F:(j + 1) * F].set(
            jnp.broadcast_to(b.astype(jnp.float32)[None, :], (valid, F)))

    # FC weight: PyTorch feature index = f*n + j  ->  kernel feature index = j*F + f.
    wfc = jnp.transpose(fc_w.astype(jnp.float32).reshape(C, F, n), (2, 1, 0)).reshape(NF, C)
    wfc_pad = jnp.zeros((NF_pad, C_pad), jnp.float32).at[:NF, :C].set(wfc)
    bfc_pad = jnp.full((1, C_pad), -1e30, jnp.float32).at[0, :C].set(fc_b.astype(jnp.float32))

    return dict(
        emb=emb_pad,                                 # f32, VMEM-resident in the kernel
        W_all=W_all.astype(compute_dtype),
        bm=bm,
        wfc=wfc_pad.astype(compute_dtype),
        bfc=bfc_pad,
        L=L, L_pad=L_pad, E_pad=E_pad, lout_pad=lout_pad, C=C, C_pad=C_pad,
    )


def textcnn_forward(token_ids, params, *, batch_tile=128, vmem_limit_bytes=64 * 1024 * 1024):
    """Eval-mode forward.  token_ids: (B, L) int32 -> (B, C) softmax probabilities (f32).

    VMEM budget (per grid step): x scratch TB*L_pad*E_pad*4, bf16 slab TB*lout_pad*K*2,
    f32 conv/act TB*lout_pad*NF_pad*4 each, plus resident weights + the f32 embedding table.
    v5e/v6e (128 MiB): raise vmem_limit_bytes toward ~100 MiB and batch_tile toward 256.
    v7x (64 MiB): keep vmem_limit_bytes <= ~48 MiB, halve batch_tile (see tap-accumulation TODO).
    """
    assert batch_tile >= 8 and batch_tile % 8 == 0
    B, L = token_ids.shape
    assert L == params["L"]
    L_pad, E_pad = params["L_pad"], params["E_pad"]
    C, C_pad = params["C"], params["C_pad"]

    # Batch tile: large (amortize grid-step overhead, feed the MXU) but capped so the
    # ("parallel",) batch axis has >=2 grid steps whenever B allows (v7x: 2 TensorCores/chip).
    TB = min(batch_tile, max(8, _round_up((B + 1) // 2, 8)))
    B_pad = _round_up(B, TB)
    n_steps = B_pad // TB

    # Only the (tiny) token ids travel host->SMEM; padded batch rows reuse token 0 (sliced off).
    ids = jnp.pad(token_ids.astype(jnp.int32), ((0, B_pad - B), (0, 0))).reshape(-1)

    def run(single_buffer_weights):
        def const_spec(arr):
            shape = arr.shape
            imap = lambda i, ids_ref: (0,) * len(shape)
            if single_buffer_weights:
                # Constant-index (resident) inputs do not need double buffering.
                return pl.BlockSpec(shape, imap, pipeline_mode=pl.Buffered(1))
            return pl.BlockSpec(shape, imap)

        grid_spec = pltpu.PrefetchScalarGridSpec(
            num_scalar_prefetch=1,                       # token ids -> SMEM, visible to index_maps
            grid=(n_steps,),
            in_specs=[
                const_spec(params["emb"]),               # resident embedding table
                const_spec(params["W_all"]),             # resident stacked conv weights
                const_spec(params["bm"]),                # resident bias/validity map
                const_spec(params["wfc"]),
                const_spec(params["bfc"]),
            ],
            out_specs=pl.BlockSpec((TB, C_pad), lambda i, ids_ref: (i, 0)),
            scratch_shapes=[pltpu.VMEM((TB, L_pad, E_pad), jnp.float32)],
        )
        out = pl.pallas_call(
            functools.partial(_textcnn_kernel, L),
            out_shape=jax.ShapeDtypeStruct((B_pad, C_pad), jnp.float32),
            grid_spec=grid_spec,
            compiler_params=pltpu.CompilerParams(
                dimension_semantics=("parallel",),
                vmem_limit_bytes=vmem_limit_bytes,
            ),
        )(ids, params["emb"], params["W_all"], params["bm"], params["wfc"], params["bfc"])
        return jax.block_until_ready(out)

    try:
        out = run(True)        # single-buffered resident weights (pl.Buffered(1))
    except Exception:          # pipeline_mode / Buffered(1) unsupported -> default double buffering
        out = run(False)
    return out[:B, :C]


def textcnn_reference(token_ids, emb_table, conv_ws, conv_bs, fc_w, fc_b, filter_sizes):
    """Pure-JAX f32 reference mirroring the PyTorch forward (eval mode)."""
    x = emb_table[token_ids].astype(jnp.float32)          # (B, L, E)
    x = jnp.transpose(x, (0, 2, 1))                       # (B, E, L)  (torch NCL)
    pooled = []
    for w, b, fs in zip(conv_ws, conv_bs, filter_sizes):
        lout = x.shape[2] - fs + 1
        out = jnp.zeros((x.shape[0], w.shape[0], lout), jnp.float32)
        for k in range(fs):
            out = out + jnp.einsum("bel,fe->bfl", x[:, :, k:k + lout], w[:, :, k])
        out = out + b[None, :, None]
        out = jnp.maximum(out, 0.0)
        pooled.append(jnp.max(out, axis=2, keepdims=True))  # (B, F, 1)
    cat = jnp.concatenate(pooled, axis=2)                   # (B, F, n)
    flat = cat.reshape(cat.shape[0], -1)                    # (B, F*n), idx = f*n + j
    logits = flat @ fc_w.T + fc_b
    return jax.nn.softmax(logits, axis=1)


if __name__ == "__main__":
    # Small, module-consistent shapes.
    B, L, E = 2, 16, 32            # batch, max_sent_len, embedding_dim
    NUM_FILTERS, C, V = 16, 4, 50  # num_filters, num_classes, vocab_size
    FILTER_SIZES = [3, 4, 5]

    key = jax.random.PRNGKey(0)
    keys = jax.random.split(key, 11)

    emb_table = jax.random.normal(keys[0], (V, E), jnp.float32) * 0.1
    conv_ws, conv_bs = [], []
    for i, fs in enumerate(FILTER_SIZES):
        conv_ws.append(jax.random.normal(keys[1 + i], (NUM_FILTERS, E, fs), jnp.float32) * 0.05)
        conv_bs.append(jax.random.normal(keys[4 + i], (NUM_FILTERS,), jnp.float32) * 0.05)
    fc_w = jax.random.normal(keys[7], (C, NUM_FILTERS * len(FILTER_SIZES)), jnp.float32) * 0.05
    fc_b = jax.random.normal(keys[8], (C,), jnp.float32) * 0.05
    token_ids = jax.random.randint(keys[9], (B, L), 0, V, dtype=jnp.int32)

    # One-time weight packing (not on the per-call path).  mxu_multiple=256 (v6e/v7x); use 128 on v5e.
    params = prepare_textcnn_params(emb_table, conv_ws, conv_bs, fc_w, fc_b,
                                    FILTER_SIZES, max_sent_len=L, mxu_multiple=256)

    # Tiny batch (module-sized example).
    probs = jax.block_until_ready(textcnn_forward(token_ids, params))
    ref = textcnn_reference(token_ids, emb_table, conv_ws, conv_bs, fc_w, fc_b, FILTER_SIZES)
    assert probs.shape == (B, C), probs.shape
    assert jnp.allclose(jnp.sum(probs, axis=1), 1.0, atol=5e-3), jnp.sum(probs, axis=1)
    assert jnp.allclose(probs, ref, atol=2e-2, rtol=2e-2), (probs, ref)

    # Larger batch: exercises TB=128 tiles and a >=2-step "parallel" grid (megacore path).
    B2 = 256
    token_ids2 = jax.random.randint(keys[10], (B2, L), 0, V, dtype=jnp.int32)
    probs2 = jax.block_until_ready(textcnn_forward(token_ids2, params, batch_tile=128))
    ref2 = textcnn_reference(token_ids2, emb_table, conv_ws, conv_bs, fc_w, fc_b, FILTER_SIZES)
    assert probs2.shape == (B2, C), probs2.shape
    assert jnp.allclose(jnp.sum(probs2, axis=1), 1.0, atol=5e-3)
    assert jnp.allclose(probs2, ref2, atol=2e-2, rtol=2e-2)

    print("KERNEL_OK")
</pallas_src>

<mosaic_0001>
module attributes {stable_mosaic.version = 11 : i64} {
  func.func @_textcnn_kernel(%arg0: i32, %arg1: memref<128xi32, #tpu.memory_space<smem>>, %arg2: memref<50x1x128xf32, #tpu.memory_space<vmem>>, %arg3: memref<640x256xbf16, #tpu.memory_space<vmem>>, %arg4: memref<16x256xf32, #tpu.memory_space<vmem>>, %arg5: memref<256x128xbf16, #tpu.memory_space<vmem>>, %arg6: memref<1x128xf32, #tpu.memory_space<vmem>>, %arg7: memref<8x128xf32, #tpu.memory_space<vmem>>, %arg8: memref<8x20x128xf32, #tpu.memory_space<vmem>>) attributes {dimension_semantics = [#tpu.dimension_semantics<parallel>], iteration_bounds = array<i64: 1>, scalar_prefetch = 1 : i64, scratch_operands = 1 : i64, tpu.core_type = #tpu.core_type<tc>, window_params = [{pipeline_mode = #tpu.pipeline_mode<synchronous>, transform_indices = @transform_0, window_bounds = array<i64: 50, 1, 128>}, {pipeline_mode = #tpu.pipeline_mode<synchronous>, transform_indices = @transform_1, window_bounds = array<i64: 640, 256>}, {pipeline_mode = #tpu.pipeline_mode<synchronous>, transform_indices = @transform_2, window_bounds = array<i64: 16, 256>}, {pipeline_mode = #tpu.pipeline_mode<synchronous>, transform_indices = @transform_3, window_bounds = array<i64: 256, 128>}, {pipeline_mode = #tpu.pipeline_mode<synchronous>, transform_indices = @transform_4, window_bounds = array<i64: 1, 128>}, {transform_indices = @transform_5, window_bounds = array<i64: 8, 128>}]} {
    %c128_i32 = arith.constant 128 : i32
    %0 = arith.muli %arg0, %c128_i32 : i32
    %c0_i32 = arith.constant 0 : i32
    %c8_i32 = arith.constant 8 : i32
    %1 = arith.addi %c0_i32, %c8_i32 : i32
    %c1_i32 = arith.constant 1 : i32
    scf.for %arg9 = %c0_i32 to %1 step %c1_i32  : i32 {
      %c1_i32_18 = arith.constant 1 : i32
      %38 = arith.muli %arg9, %c1_i32_18 : i32
      %c0_i32_19 = arith.constant 0 : i32
      %39 = arith.addi %c0_i32_19, %38 : i32
      %c16_i32 = arith.constant 16 : i32
      %40 = arith.muli %39, %c16_i32 : i32
      %41 = arith.addi %0, %40 : i32
      %c0_i32_20 = arith.constant 0 : i32
      %42 = arith.addi %41, %c0_i32_20 : i32
      %43 = arith.index_cast %42 : i32 to index
      %44 = memref.load %arg1[%43] : memref<128xi32, #tpu.memory_space<smem>>
      %45 = arith.index_cast %44 : i32 to index
      %c0_21 = arith.constant 0 : index
      %c0_22 = arith.constant 0 : index
      %46 = vector.load %arg2[%45, %c0_21, %c0_22] : memref<50x1x128xf32, #tpu.memory_space<vmem>>, vector<1x1x128xf32>
      %47 = vector.shape_cast %46 : vector<1x1x128xf32> to vector<1x128xf32>
      %c1_i32_23 = arith.constant 1 : i32
      %48 = arith.addi %41, %c1_i32_23 : i32
      %49 = arith.index_cast %48 : i32 to index
      %50 = memref.load %arg1[%49] : memref<128xi32, #tpu.memory_space<smem>>
      %51 = arith.index_cast %50 : i32 to index
      %c0_24 = arith.constant 0 : index
      %c0_25 = arith.constant 0 : index
      %52 = vector.load %arg2[%51, %c0_24, %c0_25] : memref<50x1x128xf32, #tpu.memory_space<vmem>>, vector<1x1x128xf32>
      %53 = vector.shape_cast %52 : vector<1x1x128xf32> to vector<1x128xf32>
      %c2_i32 = arith.constant 2 : i32
      %54 = arith.addi %41, %c2_i32 : i32
      %55 = arith.index_cast %54 : i32 to index
      %56 = memref.load %arg1[%55] : memref<128xi32, #tpu.memory_space<smem>>
      %57 = arith.index_cast %56 : i32 to index
      %c0_26 = arith.constant 0 : index
      %c0_27 = arith.constant 0 : index
      %58 = vector.load %arg2[%57, %c0_26, %c0_27] : memref<50x1x128xf32, #tpu.memory_space<vmem>>, vector<1x1x128xf32>
      %59 = vector.shape_cast %58 : vector<1x1x128xf32> to vector<1x128xf32>
      %c3_i32 = arith.constant 3 : i32
      %60 = arith.addi %41, %c3_i32 : i32
      %61 = arith.index_cast %60 : i32 to index
      %62 = memref.load %arg1[%61] : memref<128xi32, #tpu.memory_space<smem>>
      %63 = arith.index_cast %62 : i32 to index
      %c0_28 = arith.constant 0 : index
      %c0_29 = arith.constant 0 : index
      %64 = vector.load %arg2[%63, %c0_28, %c0_29] : memref<50x1x128xf32, #tpu.memory_space<vmem>>, vector<1x1x128xf32>
      %65 = vector.shape_cast %64 : vector<1x1x128xf32> to vector<1x128xf32>
      %c4_i32 = arith.constant 4 : i32
      %66 = arith.addi %41, %c4_i32 : i32
      %67 = arith.index_cast %66 : i32 to index
      %68 = memref.load %arg1[%67] : memref<128xi32, #tpu.memory_space<smem>>
      %69 = arith.index_cast %68 : i32 to index
      %c0_30 = arith.constant 0 : index
      %c0_31 = arith.constant 0 : index
      %70 = vector.load %arg2[%69, %c0_30, %c0_31] : memref<50x1x128xf32, #tpu.memory_space<vmem>>, vector<1x1x128xf32>
      %71 = vector.shape_cast %70 : vector<1x1x128xf32> to vector<1x128xf32>
      %c5_i32 = arith.constant 5 : i32
      %72 = arith.addi %41, %c5_i32 : i32
      %73 = arith.index_cast %72 : i32 to index
      %74 = memref.load %arg1[%73] : memref<128xi32, #tpu.memory_space<smem>>
      %75 = arith.index_cast %74 : i32 to index
      %c0_32 = arith.constant 0 : index
      %c0_33 = arith.constant 0 : index
      %76 = vector.load %arg2[%75, %c0_32, %c0_33] : memref<50x1x128xf32, #tpu.memory_space<vmem>>, vector<1x1x128xf32>
      %77 = vector.shape_cast %76 : vector<1x1x128xf32> to vector<1x128xf32>
      %c6_i32 = arith.constant 6 : i32
      %78 = arith.addi %41, %c6_i32 : i32
      %79 = arith.index_cast %78 : i32 to index
      %80 = memref.load %arg1[%79] : memref<128xi32, #tpu.memory_space<smem>>
      %81 = arith.index_cast %80 : i32 to index
      %c0_34 = arith.constant 0 : index
      %c0_35 = arith.constant 0 : index
      %82 = vector.load %arg2[%81, %c0_34, %c0_35] : memref<50x1x128xf32, #tpu.memory_space<vmem>>, vector<1x1x128xf32>
      %83 = vector.shape_cast %82 : vector<1x1x128xf32> to vector<1x128xf32>
      %c7_i32 = arith.constant 7 : i32
      %84 = arith.addi %41, %c7_i32 : i32
      %85 = arith.index_cast %84 : i32 to index
      %86 = memref.load %arg1[%85] : memref<128xi32, #tpu.memory_space<smem>>
      %87 = arith.index_cast %86 : i32 to index
      %c0_36 = arith.constant 0 : index
      %c0_37 = arith.constant 0 : index
      %88 = vector.load %arg2[%87, %c0_36, %c0_37] : memref<50x1x128xf32, #tpu.memory_space<vmem>>, vector<1x1x128xf32>
      %89 = vector.shape_cast %88 : vector<1x1x128xf32> to vector<1x128xf32>
      %c8_i32_38 = arith.constant 8 : i32
      %90 = arith.addi %41, %c8_i32_38 : i32
      %91 = arith.index_cast %90 : i32 to index
      %92 = memref.load %arg1[%91] : memref<128xi32, #tpu.memory_space<smem>>
      %93 = arith.index_cast %92 : i32 to index
      %c0_39 = arith.constant 0 : index
      %c0_40 = arith.constant 0 : index
      %94 = vector.load %arg2[%93, %c0_39, %c0_40] : memref<50x1x128xf32, #tpu.memory_space<vmem>>, vector<1x1x128xf32>
      %95 = vector.shape_cast %94 : vector<1x1x128xf32> to vector<1x128xf32>
      %c9_i32 = arith.constant 9 : i32
      %96 = arith.addi %41, %c9_i32 : i32
      %97 = arith.index_cast %96 : i32 to index
      %98 = memref.load %arg1[%97] : memref<128xi32, #tpu.memory_space<smem>>
      %99 = arith.index_cast %98 : i32 to index
      %c0_41 = arith.constant 0 : index
      %c0_42 = arith.constant 0 : index
      %100 = vector.load %arg2[%99, %c0_41, %c0_42] : memref<50x1x128xf32, #tpu.memory_space<vmem>>, vector<1x1x128xf32>
      %101 = vector.shape_cast %100 : vector<1x1x128xf32> to vector<1x128xf32>
      %c10_i32 = arith.constant 10 : i32
      %102 = arith.addi %41, %c10_i32 : i32
      %103 = arith.index_cast %102 : i32 to index
      %104 = memref.load %arg1[%103] : memref<128xi32, #tpu.memory_space<smem>>
      %105 = arith.index_cast %104 : i32 to index
      %c0_43 = arith.constant 0 : index
      %c0_44 = arith.constant 0 : index
      %106 = vector.load %arg2[%105, %c0_43, %c0_44] : memref<50x1x128xf32, #tpu.memory_space<vmem>>, vector<1x1x128xf32>
      %107 = vector.shape_cast %106 : vector<1x1x128xf32> to vector<1x128xf32>
      %c11_i32 = arith.constant 11 : i32
      %108 = arith.addi %41, %c11_i32 : i32
      %109 = arith.index_cast %108 : i32 to index
      %110 = memref.load %arg1[%109] : memref<128xi32, #tpu.memory_space<smem>>
      %111 = arith.index_cast %110 : i32 to index
      %c0_45 = arith.constant 0 : index
      %c0_46 = arith.constant 0 : index
      %112 = vector.load %arg2[%111, %c0_45, %c0_46] : memref<50x1x128xf32, #tpu.memory_space<vmem>>, vector<1x1x128xf32>
      %113 = vector.shape_cast %112 : vector<1x1x128xf32> to vector<1x128xf32>
      %c12_i32 = arith.constant 12 : i32
      %114 = arith.addi %41, %c12_i32 : i32
      %115 = arith.index_cast %114 : i32 to index
      %116 = memref.load %arg1[%115] : memref<128xi32, #tpu.memory_space<smem>>
      %117 = arith.index_cast %116 : i32 to index
      %c0_47 = arith.constant 0 : index
      %c0_48 = arith.constant 0 : index
      %118 = vector.load %arg2[%117, %c0_47, %c0_48] : memref<50x1x128xf32, #tpu.memory_space<vmem>>, vector<1x1x128xf32>
      %119 = vector.shape_cast %118 : vector<1x1x128xf32> to vector<1x128xf32>
      %c13_i32 = arith.constant 13 : i32
      %120 = arith.addi %41, %c13_i32 : i32
      %121 = arith.index_cast %120 : i32 to index
      %122 = memref.load %arg1[%121] : memref<128xi32, #tpu.memory_space<smem>>
      %123 = arith.index_cast %122 : i32 to index
      %c0_49 = arith.constant 0 : index
      %c0_50 = arith.constant 0 : index
      %124 = vector.load %arg2[%123, %c0_49, %c0_50] : memref<50x1x128xf32, #tpu.memory_space<vmem>>, vector<1x1x128xf32>
      %125 = vector.shape_cast %124 : vector<1x1x128xf32> to vector<1x128xf32>
      %c14_i32 = arith.constant 14 : i32
      %126 = arith.addi %41, %c14_i32 : i32
      %127 = arith.index_cast %126 : i32 to index
      %128 = memref.load %arg1[%127] : memref<128xi32, #tpu.memory_space<smem>>
      %129 = arith.index_cast %128 : i32 to index
      %c0_51 = arith.constant 0 : index
      %c0_52 = arith.constant 0 : index
      %130 = vector.load %arg2[%129, %c0_51, %c0_52] : memref<50x1x128xf32, #tpu.memory_space<vmem>>, vector<1x1x128xf32>
      %131 = vector.shape_cast %130 : vector<1x1x128xf32> to vector<1x128xf32>
      %c15_i32 = arith.constant 15 : i32
      %132 = arith.addi %41, %c15_i32 : i32
      %133 = arith.index_cast %132 : i32 to index
      %134 = memref.load %arg1[%133] : memref<128xi32, #tpu.memory_space<smem>>
      %135 = arith.index_cast %134 : i32 to index
      %c0_53 = arith.constant 0 : index
      %c0_54 = arith.constant 0 : index
      %136 = vector.load %arg2[%135, %c0_53, %c0_54] : memref<50x1x128xf32, #tpu.memory_space<vmem>>, vector<1x1x128xf32>
      %137 = vector.shape_cast %136 : vector<1x1x128xf32> to vector<1x128xf32>
      %cst_55 = arith.constant 0.000000e+00 : f32
      %138 = vector.broadcast %cst_55 : f32 to vector<4x128xf32>
      %139 = tpu.concatenate %47, %53, %59, %65, %71, %77, %83, %89, %95, %101, %107, %113, %119, %125, %131, %137 in 0 : vector<1x128xf32>, vector<1x128xf32>, vector<1x128xf32>, vector<1x128xf32>, vector<1x128xf32>, vector<1x128xf32>, vector<1x128xf32>, vector<1x128xf32>, vector<1x128xf32>, vector<1x128xf32>, vector<1x128xf32>, vector<1x128xf32>, vector<1x128xf32>, vector<1x128xf32>, vector<1x128xf32>, vector<1x128xf32> -> vector<16x128xf32>
      %140 = tpu.concatenate %139, %138 in 0 : vector<16x128xf32>, vector<4x128xf32> -> vector<20x128xf32>
      %141 = arith.index_cast %39 : i32 to index
      %c0_56 = arith.constant 0 : index
      %c0_57 = arith.constant 0 : index
      %142 = vector.load %arg8[%141, %c0_56, %c0_57] : memref<8x20x128xf32, #tpu.memory_space<vmem>>, vector<1x20x128xf32>
      %143 = vector.shape_cast %142 : vector<1x20x128xf32> to vector<20x128xf32>
      %144 = vector.shape_cast %140 : vector<20x128xf32> to vector<1x20x128xf32>
      tpu.vector_store %arg8[%141, %c0_56, %c0_57], %144 {strides = array<i32>} : memref<8x20x128xf32, #tpu.memory_space<vmem>>, vector<1x20x128xf32>,
    }
    %c8_i32_0 = arith.constant 8 : i32
    %c0 = arith.constant 0 : index
    %c0_1 = arith.constant 0 : index
    %c0_2 = arith.constant 0 : index
    %2 = vector.load %arg8[%c0, %c0_1, %c0_2] : memref<8x20x128xf32, #tpu.memory_space<vmem>>, vector<8x20x128xf32>
    %3 = arith.truncf %2 : vector<8x20x128xf32> to vector<8x20x128xbf16>
    %4 = vector.extract_strided_slice %3 {offsets = [0, 0, 0], sizes = [8, 16, 128], strides = [1, 1, 1]} : vector<8x20x128xbf16> to vector<8x16x128xbf16>
    %5 = vector.extract_strided_slice %3 {offsets = [0, 1, 0], sizes = [8, 16, 128], strides = [1, 1, 1]} : vector<8x20x128xbf16> to vector<8x16x128xbf16>
    %6 = vector.extract_strided_slice %3 {offsets = [0, 2, 0], sizes = [8, 16, 128], strides = [1, 1, 1]} : vector<8x20x128xbf16> to vector<8x16x128xbf16>
    %7 = vector.extract_strided_slice %3 {offsets = [0, 3, 0], sizes = [8, 16, 128], strides = [1, 1, 1]} : vector<8x20x128xbf16> to vector<8x16x128xbf16>
    %8 = vector.extract_strided_slice %3 {offsets = [0, 4, 0], sizes = [8, 16, 128], strides = [1, 1, 1]} : vector<8x20x128xbf16> to vector<8x16x128xbf16>
    %9 = tpu.concatenate %4, %5, %6, %7, %8 in 2 : vector<8x16x128xbf16>, vector<8x16x128xbf16>, vector<8x16x128xbf16>, vector<8x16x128xbf16>, vector<8x16x128xbf16> -> vector<8x16x640xbf16>
    %10 = vector.shape_cast %9 : vector<8x16x640xbf16> to vector<128x640xbf16>
    %c0_3 = arith.constant 0 : index
    %c0_4 = arith.constant 0 : index
    %11 = vector.load %arg3[%c0_3, %c0_4] : memref<640x256xbf16, #tpu.memory_space<vmem>>, vector<640x256xbf16>
    %cst = arith.constant dense<0.000000e+00> : vector<128x256xf32>
    %12 = tpu.matmul %10, %11, %cst {dimension_numbers = #tpu.dot_dimension_numbers<[1], [0], [0], [1], [0, 0, 1, 1], [], []>} : vector<128x640xbf16>, vector<640x256xbf16>, vector<128x256xf32> -> vector<128x256xf32>
    %13 = vector.shape_cast %12 : vector<128x256xf32> to vector<8x16x256xf32>
    %c0_5 = arith.constant 0 : index
    %c0_6 = arith.constant 0 : index
    %14 = vector.load %arg4[%c0_5, %c0_6] : memref<16x256xf32, #tpu.memory_space<vmem>>, vector<16x256xf32>
    %15 = vector.shape_cast %14 : vector<16x256xf32> to vector<1x16x256xf32>
    %16 = vector.broadcast %15 : vector<1x16x256xf32> to vector<8x16x256xf32>
    %17 = arith.addf %13, %16 : vector<8x16x256xf32>
    %cst_7 = arith.constant 0.000000e+00 : f32
    %18 = vector.broadcast %cst_7 : f32 to vector<8x16x256xf32>
    %19 = arith.maximumf %17, %18 : vector<8x16x256xf32>
    %cst_8 = arith.constant dense<0xFF800000> : vector<8x256xf32>
    %20 = vector.multi_reduction <maximumf>, %19, %cst_8 [1] : vector<8x16x256xf32> to vector<8x256xf32>
    %21 = arith.truncf %20 : vector<8x256xf32> to vector<8x256xbf16>
    %c0_9 = arith.constant 0 : index
    %c0_10 = arith.constant 0 : index
    %22 = vector.load %arg5[%c0_9, %c0_10] : memref<256x128xbf16, #tpu.memory_space<vmem>>, vector<256x128xbf16>
    %cst_11 = arith.constant dense<0.000000e+00> : vector<8x128xf32>
    %23 = tpu.matmul %21, %22, %cst_11 {dimension_numbers = #tpu.dot_dimension_numbers<[1], [0], [0], [1], [0, 0, 1, 1], [], []>} : vector<8x256xbf16>, vector<256x128xbf16>, vector<8x128xf32> -> vector<8x128xf32>
    %c0_12 = arith.constant 0 : index
    %c0_13 = arith.constant 0 : index
    %24 = vector.load %arg6[%c0_12, %c0_13] : memref<1x128xf32, #tpu.memory_space<vmem>>, vector<1x128xf32>
    %25 = vector.broadcast %24 : vector<1x128xf32> to vector<8x128xf32>
    %26 = arith.addf %23, %25 : vector<8x128xf32>
    %cst_14 = arith.constant dense<0xFF800000> : vector<8xf32>
    %27 = vector.multi_reduction <maximumf>, %26, %cst_14 [1] : vector<8x128xf32> to vector<8xf32>
    %28 = vector.shape_cast %27 : vector<8xf32> to vector<8x1xf32>
    %29 = vector.broadcast %28 : vector<8x1xf32> to vector<8x128xf32>
    %30 = arith.subf %26, %29 : vector<8x128xf32>
    %31 = math.exp %30 : vector<8x128xf32>
    %cst_15 = arith.constant dense<0.000000e+00> : vector<8xf32>
    %32 = vector.multi_reduction <add>, %31, %cst_15 [1] : vector<8x128xf32> to vector<8xf32>
    %33 = vector.shape_cast %32 : vector<8xf32> to vector<8x1xf32>
    %34 = tpu.reciprocal %33 {approx = true} : vector<8x1xf32> -> vector<8x1xf32>
    %35 = vector.broadcast %34 : vector<8x1xf32> to vector<8x128xf32>
    %36 = arith.mulf %31, %35 : vector<8x128xf32>
    %c0_16 = arith.constant 0 : index
    %c0_17 = arith.constant 0 : index
    %37 = vector.load %arg7[%c0_16, %c0_17] : memref<8x128xf32, #tpu.memory_space<vmem>>, vector<8x128xf32>
    tpu.vector_store %arg7[%c0_16, %c0_17], %36 {strides = array<i32>} : memref<8x128xf32, #tpu.memory_space<vmem>>, vector<8x128xf32>,
    return
  }
  func.func @transform_0(%arg0: i32, %arg1: memref<128xi32, #tpu.memory_space<smem>>) -> (i32, i32, i32) {
    %c0_i32 = arith.constant 0 : i32
    %c0_i32_0 = arith.constant 0 : i32
    %c0_i32_1 = arith.constant 0 : i32
    %c0_i32_2 = arith.constant 0 : i32
    return %c0_i32, %c0_i32_0, %c0_i32_1 : i32, i32, i32
  }
  func.func @transform_1(%arg0: i32, %arg1: memref<128xi32, #tpu.memory_space<smem>>) -> (i32, i32) {
    %c0_i32 = arith.constant 0 : i32
    %c0_i32_0 = arith.constant 0 : i32
    %c0_i32_1 = arith.constant 0 : i32
    return %c0_i32, %c0_i32_0 : i32, i32
  }
  func.func @transform_2(%arg0: i32, %arg1: memref<128xi32, #tpu.memory_space<smem>>) -> (i32, i32) {
    %c0_i32 = arith.constant 0 : i32
    %c0_i32_0 = arith.constant 0 : i32
    %c0_i32_1 = arith.constant 0 : i32
    return %c0_i32, %c0_i32_0 : i32, i32
  }
  func.func @transform_3(%arg0: i32, %arg1: memref<128xi32, #tpu.memory_space<smem>>) -> (i32, i32) {
    %c0_i32 = arith.constant 0 : i32
    %c0_i32_0 = arith.constant 0 : i32
    %c0_i32_1 = arith.constant 0 : i32
    return %c0_i32, %c0_i32_0 : i32, i32
  }
  func.func @transform_4(%arg0: i32, %arg1: memref<128xi32, #tpu.memory_space<smem>>) -> (i32, i32) {
    %c0_i32 = arith.constant 0 : i32
    %c0_i32_0 = arith.constant 0 : i32
    %c0_i32_1 = arith.constant 0 : i32
    return %c0_i32, %c0_i32_0 : i32, i32
  }
  func.func @transform_5(%arg0: i32, %arg1: memref<128xi32, #tpu.memory_space<smem>>) -> (i32, i32) {
    %c0_i32 = arith.constant 0 : i32
    %c0_i32_0 = arith.constant 0 : i32
    return %arg0, %c0_i32 : i32, i32
  }
}

module attributes {stable_mosaic.version = 11 : i64} {
  func.func @_textcnn_kernel(%arg0: i32, %arg1: memref<128xi32, #tpu.memory_space<smem>>, %arg2: memref<50x1x128xf32, #tpu.memory_space<vmem>>, %arg3: memref<640x256xbf16, #tpu.memory_space<vmem>>, %arg4: memref<16x256xf32, #tpu.memory_space<vmem>>, %arg5: memref<256x128xbf16, #tpu.memory_space<vmem>>, %arg6: memref<1x128xf32, #tpu.memory_space<vmem>>, %arg7: memref<8x128xf32, #tpu.memory_space<vmem>>, %arg8: memref<8x20x128xf32, #tpu.memory_space<vmem>>) attributes {dimension_semantics = [#tpu.dimension_semantics<parallel>], iteration_bounds = array<i64: 1>, scalar_prefetch = 1 : i64, scratch_operands = 1 : i64, tpu.core_type = #tpu.core_type<tc>, window_params = [{pipeline_mode = #tpu.pipeline_mode<synchronous>, transform_indices = @transform_0, window_bounds = array<i64: 50, 1, 128>}, {pipeline_mode = #tpu.pipeline_mode<synchronous>, transform_indices = @transform_1, window_bounds = array<i64: 640, 256>}, {pipeline_mode = #tpu.pipeline_mode<synchronous>, transform_indices = @transform_2, window_bounds = array<i64: 16, 256>}, {pipeline_mode = #tpu.pipeline_mode<synchronous>, transform_indices = @transform_3, window_bounds = array<i64: 256, 128>}, {pipeline_mode = #tpu.pipeline_mode<synchronous>, transform_indices = @transform_4, window_bounds = array<i64: 1, 128>}, {transform_indices = @transform_5, window_bounds = array<i64: 8, 128>}]} {
    %c128_i32 = arith.constant 128 : i32
    %0 = arith.muli %arg0, %c128_i32 : i32
    %c0_i32 = arith.constant 0 : i32
    %c8_i32 = arith.constant 8 : i32
    %1 = arith.addi %c0_i32, %c8_i32 : i32
    %c1_i32 = arith.constant 1 : i32
    scf.for %arg9 = %c0_i32 to %1 step %c1_i32  : i32 {
      %c1_i32_18 = arith.constant 1 : i32
      %38 = arith.muli %arg9, %c1_i32_18 : i32
      %c0_i32_19 = arith.constant 0 : i32
      %39 = arith.addi %c0_i32_19, %38 : i32
      %c16_i32 = arith.constant 16 : i32
      %40 = arith.muli %39, %c16_i32 : i32
      %41 = arith.addi %0, %40 : i32
      %c0_i32_20 = arith.constant 0 : i32
      %42 = arith.addi %41, %c0_i32_20 : i32
      %43 = arith.index_cast %42 : i32 to index
      %44 = memref.load %arg1[%43] : memref<128xi32, #tpu.memory_space<smem>>
      %45 = arith.index_cast %44 : i32 to index
      %c0_21 = arith.constant 0 : index
      %c0_22 = arith.constant 0 : index
      %46 = vector.load %arg2[%45, %c0_21, %c0_22] : memref<50x1x128xf32, #tpu.memory_space<vmem>>, vector<1x1x128xf32>
      %47 = vector.shape_cast %46 : vector<1x1x128xf32> to vector<1x128xf32>
      %c1_i32_23 = arith.constant 1 : i32
      %48 = arith.addi %41, %c1_i32_23 : i32
      %49 = arith.index_cast %48 : i32 to index
      %50 = memref.load %arg1[%49] : memref<128xi32, #tpu.memory_space<smem>>
      %51 = arith.index_cast %50 : i32 to index
      %c0_24 = arith.constant 0 : index
      %c0_25 = arith.constant 0 : index
      %52 = vector.load %arg2[%51, %c0_24, %c0_25] : memref<50x1x128xf32, #tpu.memory_space<vmem>>, vector<1x1x128xf32>
      %53 = vector.shape_cast %52 : vector<1x1x128xf32> to vector<1x128xf32>
      %c2_i32 = arith.constant 2 : i32
      %54 = arith.addi %41, %c2_i32 : i32
      %55 = arith.index_cast %54 : i32 to index
      %56 = memref.load %arg1[%55] : memref<128xi32, #tpu.memory_space<smem>>
      %57 = arith.index_cast %56 : i32 to index
      %c0_26 = arith.constant 0 : index
      %c0_27 = arith.constant 0 : index
      %58 = vector.load %arg2[%57, %c0_26, %c0_27] : memref<50x1x128xf32, #tpu.memory_space<vmem>>, vector<1x1x128xf32>
      %59 = vector.shape_cast %58 : vector<1x1x128xf32> to vector<1x128xf32>
      %c3_i32 = arith.constant 3 : i32
      %60 = arith.addi %41, %c3_i32 : i32
      %61 = arith.index_cast %60 : i32 to index
      %62 = memref.load %arg1[%61] : memref<128xi32, #tpu.memory_space<smem>>
      %63 = arith.index_cast %62 : i32 to index
      %c0_28 = arith.constant 0 : index
      %c0_29 = arith.constant 0 : index
      %64 = vector.load %arg2[%63, %c0_28, %c0_29] : memref<50x1x128xf32, #tpu.memory_space<vmem>>, vector<1x1x128xf32>
      %65 = vector.shape_cast %64 : vector<1x1x128xf32> to vector<1x128xf32>
      %c4_i32 = arith.constant 4 : i32
      %66 = arith.addi %41, %c4_i32 : i32
      %67 = arith.index_cast %66 : i32 to index
      %68 = memref.load %arg1[%67] : memref<128xi32, #tpu.memory_space<smem>>
      %69 = arith.index_cast %68 : i32 to index
      %c0_30 = arith.constant 0 : index
      %c0_31 = arith.constant 0 : index
      %70 = vector.load %arg2[%69, %c0_30, %c0_31] : memref<50x1x128xf32, #tpu.memory_space<vmem>>, vector<1x1x128xf32>
      %71 = vector.shape_cast %70 : vector<1x1x128xf32> to vector<1x128xf32>
      %c5_i32 = arith.constant 5 : i32
      %72 = arith.addi %41, %c5_i32 : i32
      %73 = arith.index_cast %72 : i32 to index
      %74 = memref.load %arg1[%73] : memref<128xi32, #tpu.memory_space<smem>>
      %75 = arith.index_cast %74 : i32 to index
      %c0_32 = arith.constant 0 : index
      %c0_33 = arith.constant 0 : index
      %76 = vector.load %arg2[%75, %c0_32, %c0_33] : memref<50x1x128xf32, #tpu.memory_space<vmem>>, vector<1x1x128xf32>
      %77 = vector.shape_cast %76 : vector<1x1x128xf32> to vector<1x128xf32>
      %c6_i32 = arith.constant 6 : i32
      %78 = arith.addi %41, %c6_i32 : i32
      %79 = arith.index_cast %78 : i32 to index
      %80 = memref.load %arg1[%79] : memref<128xi32, #tpu.memory_space<smem>>
      %81 = arith.index_cast %80 : i32 to index
      %c0_34 = arith.constant 0 : index
      %c0_35 = arith.constant 0 : index
      %82 = vector.load %arg2[%81, %c0_34, %c0_35] : memref<50x1x128xf32, #tpu.memory_space<vmem>>, vector<1x1x128xf32>
      %83 = vector.shape_cast %82 : vector<1x1x128xf32> to vector<1x128xf32>
      %c7_i32 = arith.constant 7 : i32
      %84 = arith.addi %41, %c7_i32 : i32
      %85 = arith.index_cast %84 : i32 to index
      %86 = memref.load %arg1[%85] : memref<128xi32, #tpu.memory_space<smem>>
      %87 = arith.index_cast %86 : i32 to index
      %c0_36 = arith.constant 0 : index
      %c0_37 = arith.constant 0 : index
      %88 = vector.load %arg2[%87, %c0_36, %c0_37] : memref<50x1x128xf32, #tpu.memory_space<vmem>>, vector<1x1x128xf32>
      %89 = vector.shape_cast %88 : vector<1x1x128xf32> to vector<1x128xf32>
      %c8_i32_38 = arith.constant 8 : i32
      %90 = arith.addi %41, %c8_i32_38 : i32
      %91 = arith.index_cast %90 : i32 to index
      %92 = memref.load %arg1[%91] : memref<128xi32, #tpu.memory_space<smem>>
      %93 = arith.index_cast %92 : i32 to index
      %c0_39 = arith.constant 0 : index
      %c0_40 = arith.constant 0 : index
      %94 = vector.load %arg2[%93, %c0_39, %c0_40] : memref<50x1x128xf32, #tpu.memory_space<vmem>>, vector<1x1x128xf32>
      %95 = vector.shape_cast %94 : vector<1x1x128xf32> to vector<1x128xf32>
      %c9_i32 = arith.constant 9 : i32
      %96 = arith.addi %41, %c9_i32 : i32
      %97 = arith.index_cast %96 : i32 to index
      %98 = memref.load %arg1[%97] : memref<128xi32, #tpu.memory_space<smem>>
      %99 = arith.index_cast %98 : i32 to index
      %c0_41 = arith.constant 0 : index
      %c0_42 = arith.constant 0 : index
      %100 = vector.load %arg2[%99, %c0_41, %c0_42] : memref<50x1x128xf32, #tpu.memory_space<vmem>>, vector<1x1x128xf32>
      %101 = vector.shape_cast %100 : vector<1x1x128xf32> to vector<1x128xf32>
      %c10_i32 = arith.constant 10 : i32
      %102 = arith.addi %41, %c10_i32 : i32
      %103 = arith.index_cast %102 : i32 to index
      %104 = memref.load %arg1[%103] : memref<128xi32, #tpu.memory_space<smem>>
      %105 = arith.index_cast %104 : i32 to index
      %c0_43 = arith.constant 0 : index
      %c0_44 = arith.constant 0 : index
      %106 = vector.load %arg2[%105, %c0_43, %c0_44] : memref<50x1x128xf32, #tpu.memory_space<vmem>>, vector<1x1x128xf32>
      %107 = vector.shape_cast %106 : vector<1x1x128xf32> to vector<1x128xf32>
      %c11_i32 = arith.constant 11 : i32
      %108 = arith.addi %41, %c11_i32 : i32
      %109 = arith.index_cast %108 : i32 to index
      %110 = memref.load %arg1[%109] : memref<128xi32, #tpu.memory_space<smem>>
      %111 = arith.index_cast %110 : i32 to index
      %c0_45 = arith.constant 0 : index
      %c0_46 = arith.constant 0 : index
      %112 = vector.load %arg2[%111, %c0_45, %c0_46] : memref<50x1x128xf32, #tpu.memory_space<vmem>>, vector<1x1x128xf32>
      %113 = vector.shape_cast %112 : vector<1x1x128xf32> to vector<1x128xf32>
      %c12_i32 = arith.constant 12 : i32
      %114 = arith.addi %41, %c12_i32 : i32
      %115 = arith.index_cast %114 : i32 to index
      %116 = memref.load %arg1[%115] : memref<128xi32, #tpu.memory_space<smem>>
      %117 = arith.index_cast %116 : i32 to index
      %c0_47 = arith.constant 0 : index
      %c0_48 = arith.constant 0 : index
      %118 = vector.load %arg2[%117, %c0_47, %c0_48] : memref<50x1x128xf32, #tpu.memory_space<vmem>>, vector<1x1x128xf32>
      %119 = vector.shape_cast %118 : vector<1x1x128xf32> to vector<1x128xf32>
      %c13_i32 = arith.constant 13 : i32
      %120 = arith.addi %41, %c13_i32 : i32
      %121 = arith.index_cast %120 : i32 to index
      %122 = memref.load %arg1[%121] : memref<128xi32, #tpu.memory_space<smem>>
      %123 = arith.index_cast %122 : i32 to index
      %c0_49 = arith.constant 0 : index
      %c0_50 = arith.constant 0 : index
      %124 = vector.load %arg2[%123, %c0_49, %c0_50] : memref<50x1x128xf32, #tpu.memory_space<vmem>>, vector<1x1x128xf32>
      %125 = vector.shape_cast %124 : vector<1x1x128xf32> to vector<1x128xf32>
      %c14_i32 = arith.constant 14 : i32
      %126 = arith.addi %41, %c14_i32 : i32
      %127 = arith.index_cast %126 : i32 to index
      %128 = memref.load %arg1[%127] : memref<128xi32, #tpu.memory_space<smem>>
      %129 = arith.index_cast %128 : i32 to index
      %c0_51 = arith.constant 0 : index
      %c0_52 = arith.constant 0 : index
      %130 = vector.load %arg2[%129, %c0_51, %c0_52] : memref<50x1x128xf32, #tpu.memory_space<vmem>>, vector<1x1x128xf32>
      %131 = vector.shape_cast %130 : vector<1x1x128xf32> to vector<1x128xf32>
      %c15_i32 = arith.constant 15 : i32
      %132 = arith.addi %41, %c15_i32 : i32
      %133 = arith.index_cast %132 : i32 to index
      %134 = memref.load %arg1[%133] : memref<128xi32, #tpu.memory_space<smem>>
      %135 = arith.index_cast %134 : i32 to index
      %c0_53 = arith.constant 0 : index
      %c0_54 = arith.constant 0 : index
      %136 = vector.load %arg2[%135, %c0_53, %c0_54] : memref<50x1x128xf32, #tpu.memory_space<vmem>>, vector<1x1x128xf32>
      %137 = vector.shape_cast %136 : vector<1x1x128xf32> to vector<1x128xf32>
      %cst_55 = arith.constant 0.000000e+00 : f32
      %138 = vector.broadcast %cst_55 : f32 to vector<4x128xf32>
      %139 = tpu.concatenate %47, %53, %59, %65, %71, %77, %83, %89, %95, %101, %107, %113, %119, %125, %131, %137 in 0 : vector<1x128xf32>, vector<1x128xf32>, vector<1x128xf32>, vector<1x128xf32>, vector<1x128xf32>, vector<1x128xf32>, vector<1x128xf32>, vector<1x128xf32>, vector<1x128xf32>, vector<1x128xf32>, vector<1x128xf32>, vector<1x128xf32>, vector<1x128xf32>, vector<1x128xf32>, vector<1x128xf32>, vector<1x128xf32> -> vector<16x128xf32>
      %140 = tpu.concatenate %139, %138 in 0 : vector<16x128xf32>, vector<4x128xf32> -> vector<20x128xf32>
      %141 = arith.index_cast %39 : i32 to index
      %c0_56 = arith.constant 0 : index
      %c0_57 = arith.constant 0 : index
      %142 = vector.load %arg8[%141, %c0_56, %c0_57] : memref<8x20x128xf32, #tpu.memory_space<vmem>>, vector<1x20x128xf32>
      %143 = vector.shape_cast %142 : vector<1x20x128xf32> to vector<20x128xf32>
      %144 = vector.shape_cast %140 : vector<20x128xf32> to vector<1x20x128xf32>
      tpu.vector_store %arg8[%141, %c0_56, %c0_57], %144 {strides = array<i32>} : memref<8x20x128xf32, #tpu.memory_space<vmem>>, vector<1x20x128xf32>,
    }
    %c8_i32_0 = arith.constant 8 : i32
    %c0 = arith.constant 0 : index
    %c0_1 = arith.constant 0 : index
    %c0_2 = arith.constant 0 : index
    %2 = vector.load %arg8[%c0, %c0_1, %c0_2] : memref<8x20x128xf32, #tpu.memory_space<vmem>>, vector<8x20x128xf32>
    %3 = arith.truncf %2 : vector<8x20x128xf32> to vector<8x20x128xbf16>
    %4 = vector.extract_strided_slice %3 {offsets = [0, 0, 0], sizes = [8, 16, 128], strides = [1, 1, 1]} : vector<8x20x128xbf16> to vector<8x16x128xbf16>
    %5 = vector.extract_strided_slice %3 {offsets = [0, 1, 0], sizes = [8, 16, 128], strides = [1, 1, 1]} : vector<8x20x128xbf16> to vector<8x16x128xbf16>
    %6 = vector.extract_strided_slice %3 {offsets = [0, 2, 0], sizes = [8, 16, 128], strides = [1, 1, 1]} : vector<8x20x128xbf16> to vector<8x16x128xbf16>
    %7 = vector.extract_strided_slice %3 {offsets = [0, 3, 0], sizes = [8, 16, 128], strides = [1, 1, 1]} : vector<8x20x128xbf16> to vector<8x16x128xbf16>
    %8 = vector.extract_strided_slice %3 {offsets = [0, 4, 0], sizes = [8, 16, 128], strides = [1, 1, 1]} : vector<8x20x128xbf16> to vector<8x16x128xbf16>
    %9 = tpu.concatenate %4, %5, %6, %7, %8 in 2 : vector<8x16x128xbf16>, vector<8x16x128xbf16>, vector<8x16x128xbf16>, vector<8x16x128xbf16>, vector<8x16x128xbf16> -> vector<8x16x640xbf16>
    %10 = vector.shape_cast %9 : vector<8x16x640xbf16> to vector<128x640xbf16>
    %c0_3 = arith.constant 0 : index
    %c0_4 = arith.constant 0 : index
    %11 = vector.load %arg3[%c0_3, %c0_4] : memref<640x256xbf16, #tpu.memory_space<vmem>>, vector<640x256xbf16>
    %cst = arith.constant dense<0.000000e+00> : vector<128x256xf32>
    %12 = tpu.matmul %10, %11, %cst {dimension_numbers = #tpu.dot_dimension_numbers<[1], [0], [0], [1], [0, 0, 1, 1], [], []>} : vector<128x640xbf16>, vector<640x256xbf16>, vector<128x256xf32> -> vector<128x256xf32>
    %13 = vector.shape_cast %12 : vector<128x256xf32> to vector<8x16x256xf32>
    %c0_5 = arith.constant 0 : index
    %c0_6 = arith.constant 0 : index
    %14 = vector.load %arg4[%c0_5, %c0_6] : memref<16x256xf32, #tpu.memory_space<vmem>>, vector<16x256xf32>
    %15 = vector.shape_cast %14 : vector<16x256xf32> to vector<1x16x256xf32>
    %16 = vector.broadcast %15 : vector<1x16x256xf32> to vector<8x16x256xf32>
    %17 = arith.addf %13, %16 : vector<8x16x256xf32>
    %cst_7 = arith.constant 0.000000e+00 : f32
    %18 = vector.broadcast %cst_7 : f32 to vector<8x16x256xf32>
    %19 = arith.maximumf %17, %18 : vector<8x16x256xf32>
    %cst_8 = arith.constant dense<0xFF800000> : vector<8x256xf32>
    %20 = vector.multi_reduction <maximumf>, %19, %cst_8 [1] : vector<8x16x256xf32> to vector<8x256xf32>
    %21 = arith.truncf %20 : vector<8x256xf32> to vector<8x256xbf16>
    %c0_9 = arith.constant 0 : index
    %c0_10 = arith.constant 0 : index
    %22 = vector.load %arg5[%c0_9, %c0_10] : memref<256x128xbf16, #tpu.memory_space<vmem>>, vector<256x128xbf16>
    %cst_11 = arith.constant dense<0.000000e+00> : vector<8x128xf32>
    %23 = tpu.matmul %21, %22, %cst_11 {dimension_numbers = #tpu.dot_dimension_numbers<[1], [0], [0], [1], [0, 0, 1, 1], [], []>} : vector<8x256xbf16>, vector<256x128xbf16>, vector<8x128xf32> -> vector<8x128xf32>
    %c0_12 = arith.constant 0 : index
    %c0_13 = arith.constant 0 : index
    %24 = vector.load %arg6[%c0_12, %c0_13] : memref<1x128xf32, #tpu.memory_space<vmem>>, vector<1x128xf32>
    %25 = vector.broadcast %24 : vector<1x128xf32> to vector<8x128xf32>
    %26 = arith.addf %23, %25 : vector<8x128xf32>
    %cst_14 = arith.constant dense<0xFF800000> : vector<8xf32>
    %27 = vector.multi_reduction <maximumf>, %26, %cst_14 [1] : vector<8x128xf32> to vector<8xf32>
    %28 = vector.shape_cast %27 : vector<8xf32> to vector<8x1xf32>
    %29 = vector.broadcast %28 : vector<8x1xf32> to vector<8x128xf32>
    %30 = arith.subf %26, %29 : vector<8x128xf32>
    %31 = math.exp %30 : vector<8x128xf32>
    %cst_15 = arith.constant dense<0.000000e+00> : vector<8xf32>
    %32 = vector.multi_reduction <add>, %31, %cst_15 [1] : vector<8x128xf32> to vector<8xf32>
    %33 = vector.shape_cast %32 : vector<8xf32> to vector<8x1xf32>
    %34 = tpu.reciprocal %33 {approx = true} : vector<8x1xf32> -> vector<8x1xf32>
    %35 = vector.broadcast %34 : vector<8x1xf32> to vector<8x128xf32>
    %36 = arith.mulf %31, %35 : vector<8x128xf32>
    %c0_16 = arith.constant 0 : index
    %c0_17 = arith.constant 0 : index
    %37 = vector.load %arg7[%c0_16, %c0_17] : memref<8x128xf32, #tpu.memory_space<vmem>>, vector<8x128xf32>
    tpu.vector_store %arg7[%c0_16, %c0_17], %36 {strides = array<i32>} : memref<8x128xf32, #tpu.memory_space<vmem>>, vector<8x128xf32>,
    return
  }
  func.func @transform_0(%arg0: i32, %arg1: memref<128xi32, #tpu.memory_space<smem>>) -> (i32, i32, i32) {
    %c0_i32 = arith.constant 0 : i32
    %c0_i32_0 = arith.constant 0 : i32
    %c0_i32_1 = arith.constant 0 : i32
    %c0_i32_2 = arith.constant 0 : i32
    return %c0_i32, %c0_i32_0, %c0_i32_1 : i32, i32, i32
  }
  func.func @transform_1(%arg0: i32, %arg1: memref<128xi32, #tpu.memory_space<smem>>) -> (i32, i32) {
    %c0_i32 = arith.constant 0 : i32
    %c0_i32_0 = arith.constant 0 : i32
    %c0_i32_1 = arith.constant 0 : i32
    return %c0_i32, %c0_i32_0 : i32, i32
  }
  func.func @transform_2(%arg0: i32, %arg1: memref<128xi32, #tpu.memory_space<smem>>) -> (i32, i32) {
    %c0_i32 = arith.constant 0 : i32
    %c0_i32_0 = arith.constant 0 : i32
    %c0_i32_1 = arith.constant 0 : i32
    return %c0_i32, %c0_i32_0 : i32, i32
  }
  func.func @transform_3(%arg0: i32, %arg1: memref<128xi32, #tpu.memory_space<smem>>) -> (i32, i32) {
    %c0_i32 = arith.constant 0 : i32
    %c0_i32_0 = arith.constant 0 : i32
    %c0_i32_1 = arith.constant 0 : i32
    return %c0_i32, %c0_i32_0 : i32, i32
  }
  func.func @transform_4(%arg0: i32, %arg1: memref<128xi32, #tpu.memory_space<smem>>) -> (i32, i32) {
    %c0_i32 = arith.constant 0 : i32
    %c0_i32_0 = arith.constant 0 : i32
    %c0_i32_1 = arith.constant 0 : i32
    return %c0_i32, %c0_i32_0 : i32, i32
  }
  func.func @transform_5(%arg0: i32, %arg1: memref<128xi32, #tpu.memory_space<smem>>) -> (i32, i32) {
    %c0_i32 = arith.constant 0 : i32
    %c0_i32_0 = arith.constant 0 : i32
    return %arg0, %c0_i32 : i32, i32
  }
}

</mosaic_0001>

<bundles_post_ra>
// kernel: tpu_custom_call.1
= control target key start
LH: loop header
LB: loop body
LE: loop exit
PB: predicated region body
PF: predicated region fallthrough
CT: control target
= control target key end

     0   :  { %s3012_s0 = inlined_call_operand.hbm [shape: s32[128], index: 0, kind: input, shape index: {}]   ;;  %s3013_s1 = inlined_call_operand.hbm [shape: f32[50,1,128], index: 1, kind: input, shape index: {}]   ;;  %s3014_s2 = inlined_call_operand.hbm [shape: bf16[640,256], index: 2, kind: input, shape index: {}]   ;;  %s3015_s3 = inlined_call_operand.hbm [shape: f32[16,256], index: 3, kind: input, shape index: {}]   ;;  %s3016_s4 = inlined_call_operand.hbm [shape: bf16[256,128], index: 4, kind: input, shape index: {}]   ;;  %s3017_s5 = inlined_call_operand.hbm [shape: f32[1,128], index: 5, kind: input, shape index: {}]   ;;  %s3018_s6 = inlined_call_operand.hbm [shape: f32[8,128], index: 6, kind: output, shape index: {}]  }
   0x1   :  { %s2274_s23 = scalar_lea.hbm %s3012_s0, 16 }
   0x2   :  { %p2275_p0 = scmp.ne.s32.totalorder %s3012_s0, %s2274_s23  ;;  %p2278_p1 = scmp.lt.u32.totalorder %s2274_s23, %s3012_s0 }
   0x4   :  { %p2280_p2 = pnand %p2278_p1, %p2275_p0 }
   0x6   :  { %2283 = shalt.err (!%p2280_p2)  }
   0x7   :  { %s2434_s28 = smov [#allocation4]  }
   0x8   :  { %12 = dma.hbm_to_smem %s3012_s0, 16, %s2434_s28, [#allocation3] }
   0x9   :  { %2420 = dma.done.wait [#allocation3], 16 }
   0xa   :  { %2421 = vsyncadd [#allocation3], 4294967280 }
   0xb   :  { %14 = sfence }
   0xc   :  { %15 = vsyncpa [#allocation6], 0 }
   0xd   :  { %16 = vsyncpa [#allocation9], 0 }
   0xe   :  { %17 = vsyncpa [#allocation12], 0 }
   0xf   :  { %18 = vsyncpa [#allocation7], 0  ;;  %s2435_s7 = smov [#allocation8]   ;;  %s2284_s11 = scalar_lea.hbm %s3014_s2, 10240 }
  0x10   :  { %s36_s8 = sshll.u32 %s2435_s7, 4  ;;  %p2285_p3 = scmp.ne.s32.totalorder %s3014_s2, %s2284_s11  ;;  %s37_s8 = int_to_ptr.vmem [resolvable:$true] %s36_s8 }
  0x11   :  { %p2288_p4 = scmp.lt.u32.totalorder %s2284_s11, %s3014_s2 }
  0x13   :  { %p2290_p5 = pnand %p2288_p4, %p2285_p3 }
  0x15   :  { %2293 = shalt.err (!%p2290_p5)
}
  0x16   :  { %s2294_s15 = scalar_lea.vmem %s37_s8, 10240  ;;  %p2299_p7 = scmp.lt.s32.totalorder %s37_s8, %s37_s8 }
  0x17   :  { %p2295_p6 = scmp.ne.s32.totalorder %s37_s8, %s2294_s15  ;;  %p2300_p8 = scmp.lt.s32.totalorder %s2294_s15, %s2294_s15 }
  0x19   :  { %p2301_p9 = por %p2300_p8, %p2299_p7 }
  0x1b   :  { %p2302_p10 = pnand %p2301_p9, %p2295_p6 }
  0x1d   :  { %2305 = shalt.err (!%p2302_p10)
}
  0x1e   :  { %s2436_s16 = smov 128   ;;  %s2437_s17 = smov 8  }
  0x1f   :  { %42 = dma.hbm_to_vmem [thread:$0]  %s3014_s2, 10240, %s37_s8, [#allocation9], %s2436_s16, %s2436_s16, %s2437_s17  }
  0x20   :  { %s2438_s20 = smov [#allocation11]   ;;  %s2306_s24 = scalar_lea.hbm %s3016_s4, 2048 }
  0x21   :  { %s60_s21 = sshll.u32 %s2438_s20, 4  ;;  %p2307_p11 = scmp.ne.s32.totalorder %s3016_s4, %s2306_s24  ;;  %s61_s21 = int_to_ptr.vmem [resolvable:$true] %s60_s21 }
  0x22   :  { %p2310_p12 = scmp.lt.u32.totalorder %s2306_s24, %s3016_s4 }
  0x24   :  { %p2312_p13 = pnand %p2310_p12, %p2307_p11 }
  0x26   :  { %2315 = shalt.err (!%p2312_p13)
}
  0x27   :  { %s2316_s29 = scalar_lea.vmem %s61_s21, 2048  ;;  %p2321_p1 = scmp.lt.s32.totalorder %s61_s21, %s61_s21 }
  0x28   :  { %p2317_p0 = scmp.ne.s32.totalorder %s61_s21, %s2316_s29  ;;  %p2322_p2 = scmp.lt.s32.totalorder %s2316_s29, %s2316_s29 }
  0x2a   :  { %p2323_p3 = por %p2322_p2, %p2321_p1 }
  0x2c   :  { %p2324_p4 = pnand %p2323_p3, %p2317_p0 }
  0x2e   :  { %2327 = shalt.err (!%p2324_p4)
}
  0x2f   :  { %s2439_s2 = smov 64   ;;  %s2440_s30 = smov 4  }
  0x30   :  { %66 = dma.hbm_to_vmem [thread:$0]  %s3016_s4, 2048, %s61_s21, [#allocation12], %s2439_s2, %s2439_s2, %s2440_s30  }
  0x31   :  { %s2441_s9 = smov [#allocation5]   ;;  %s2328_s13 = scalar_lea.hbm %s3013_s1, 800 }
  0x32   :  { %s24_s10 = sshll.u32 %s2441_s9, 4  ;;  %p2329_p5 = scmp.ne.s32.totalorder %s3013_s1, %s2328_s13  ;;  %s25_s10 = int_to_ptr.vmem [resolvable:$true] %s24_s10 }
  0x33   :  { %p2332_p6 = scmp.lt.u32.totalorder %s2328_s13, %s3013_s1 }
  0x35   :  { %p2334_p7 = pnand %p2332_p6, %p2329_p5 }
  0x37   :  { %2337 = shalt.err (!%p2334_p7)
}
  0x38   :  { %s2338_s17 = scalar_lea.vmem %s25_s10, 800  ;;  %p2343_p9 = scmp.lt.s32.totalorder %s25_s10, %s25_s10 }
  0x39   :  { %p2339_p8 = scmp.ne.s32.totalorder %s25_s10, %s2338_s17  ;;  %p2344_p10 = scmp.lt.s32.totalorder %s2338_s17, %s2338_s17 }
  0x3b   :  { %p2345_p11 = por %p2344_p10, %p2343_p9 }
  0x3d   :  { %p2346_p12 = pnand %p2345_p11, %p2339_p8 }
  0x3f   :  { %2349 = shalt.err (!%p2346_p12)
}
  0x40   :  { %s2442_s4 = smov 16   ;;  %s2443_s18 = smov 1  }
  0x41   :  { %30 = dma.hbm_to_vmem [thread:$0]  %s3013_s1, 800, %s25_s10, [#allocation6], %s2442_s4, %s2442_s4, %s2443_s18  }
  0x42   :  { %s2444_s21 = smov [#allocation10]   ;;  %s2350_s25 = scalar_lea.hbm %s3015_s3, 512 }
  0x43   :  { %s48_s22 = sshll.u32 %s2444_s21, 4  ;;  %p2351_p13 = scmp.ne.s32.totalorder %s3015_s3, %s2350_s25  ;;  %s49_s22 = int_to_ptr.vmem [resolvable:$true] %s48_s22 }
  0x44   :  { %p2354_p0 = scmp.lt.u32.totalorder %s2350_s25, %s3015_s3 }
  0x46   :  { %p2356_p1 = pnand %p2354_p0, %p2351_p13 }
  0x48   :  { %2359 = shalt.err (!%p2356_p1)
}
  0x49   :  { %s2360_s2 = scalar_lea.vmem %s49_s22, 512  ;;  %p2365_p3 = scmp.lt.s32.totalorder %s49_s22, %s49_s22 }
  0x4a   :  { %p2361_p2 = scmp.ne.s32.totalorder %s49_s22, %s2360_s2  ;;  %p2366_p4 = scmp.lt.s32.totalorder %s2360_s2, %s2360_s2 }
  0x4c   :  { %p2367_p5 = por %p2366_p4, %p2365_p3 }
  0x4e   :  { %p2368_p6 = pnand %p2367_p5, %p2361_p2 }
  0x50   :  { %2371 = shalt.err (!%p2368_p6)
}
  0x51   :  { %s2445_s1 = smov 256   ;;  %s2446_s8 = smov [#allocation13]  }
  0x52   :  { %54 = dma.hbm_to_vmem [thread:$0]  %s3015_s3, 512, %s49_s22, [#allocation9], %s2445_s1, %s2445_s1, %s2442_s4  }
  0x53   :  { %s73_s9 = sshll.u32 %s2446_s8, 4  ;;  %s2372_s12 = scalar_lea.hbm %s3017_s5, 16  ;;  %s74_s9 = int_to_ptr.vmem [resolvable:$true] %s73_s9 }
  0x54   :  { %p2373_p7 = scmp.ne.s32.totalorder %s3017_s5, %s2372_s12  ;;  %p2376_p8 = scmp.lt.u32.totalorder %s2372_s12, %s3017_s5 }
  0x56   :  { %p2378_p9 = pnand %p2376_p8, %p2373_p7 }
  0x58   :  { %2381 = shalt.err (!%p2378_p9)
}
  0x59   :  { %s2382_s16 = scalar_lea.vmem %s74_s9, 16  ;;  %s2386_s3 = scalar_lea.vmem %s74_s9, 32 }
  0x5a   :  { %p2383_p10 = scmp.ne.s32.totalorder %s74_s9, %s2382_s16  ;;  %p2387_p11 = scmp.lt.s32.totalorder %s74_s9, %s74_s9 }
  0x5b   :  { %p2388_p12 = scmp.lt.s32.totalorder %s2386_s3, %s2382_s16 }
  0x5d   :  { %p2389_p13 = por %p2388_p12, %p2387_p11 }
  0x5f   :  { %p2390_p0 = pnand %p2389_p13, %p2383_p10 }
  0x61   :  { %2393 = shalt.err (!%p2390_p0)
}
  0x62   :  { %76 = dma.hbm_to_vmem [thread:$0]  %s3017_s5, 16, %s74_s9, [#allocation12]  }
  0x63   :  { %2422 = dma.done.wait [#allocation6], 800  }
  0x64   :  { %2423 = vsyncadd [#allocation6], 4294966496 }
  0x65   :  { %2424 = dma.done.wait [#allocation9], 10752  }
  0x66   :  { %2425 = vsyncadd [#allocation9], 4294956544 }
  0x67   :  { %2426 = dma.done.wait [#allocation12], 2064  }
  0x68   :  { %2427 = vsyncadd [#allocation12], 4294965232  ;;  %s2557_s18 = smov 0  }
  0x69 LB: > { %s2563_s19 = sshll.u32 %s2432_s18, 4  ;;  %s270_s5 = smul.u32 24, %s2432_s18  ;;  %vm249_vm0 = vcmask 1040384   ;;  %vm251_vm1 = vcmask 1041408   ;;  %vm253_vm2 = vcmask 1042432   ;;  %vm255_vm3 = vcmask 1043456   ;;  %s2432_s18 = sphi %s2557_s18, %s99_s18  }
  0x6a   : > { %s102_s20 = sld [smem:[#allocation4 + %s2563_s19]]  ;;  %s105_s21 = sadd.s32 1, %s2563_s19  ;;  %vm257_vm4 = vcmask 1044480   ;;  %v2447_v6 = vmov 0.0   ;;  %vm259_vm5 = vcmask 1045504   ;;  %vm261_vm6 = vcmask 1046528  }
  0x6b   : > { %s106_s22 = sld [smem:[#allocation4 + %s105_s21]]  ;;  %s109_s23 = sadd.s32 2, %s2563_s19 }
  0x6c   : > { %s110_s24 = sld [smem:[#allocation4 + %s109_s23]]  ;;  %s113_s25 = sadd.s32 3, %s2563_s19 }
  0x6d   : > { %s114_s26 = sld [smem:[#allocation4 + %s113_s25]]  ;;  %s117_s27 = sadd.s32 4, %s2563_s19 }
  0x6e   : > { %s118_s28 = sld [smem:[#allocation4 + %s117_s27]]  ;;  %s121_s29 = sadd.s32 5, %s2563_s19 }
  0x6f   : > { %s2572_s2 = sld [smem:[#allocation4 + %s121_s29]]  ;;  %s125_s1 = sadd.s32 6, %s2563_s19 }
  0x70   : > { %s2575_s30 = sld [smem:[#allocation4 + %s125_s1]]  ;;  %s103_s7 = scalar_lea.vmem [#allocation5], %s102_s20 }
  0x71   : > { %v104_v0 = vld [vmem:[%s103_s7] sm:$0x1]  ;;  %s129_s8 = sadd.s32 7, %s2563_s19  ;;  %s107_s9 = scalar_lea.vmem [#allocation5], %s106_s22 }
  0x72   : > { %v1881_v1 = vld [vmem:[%s107_s9] ss:$0 sm:$0xff]  ;;  %s2578_s10 = sld [smem:[#allocation4 + %s129_s8]]  ;;  %s111_s11 = scalar_lea.vmem [#allocation5], %s110_s24 }
  0x73   : > { %v1882_v2 = vld [vmem:[%s111_s11] ss:$0 sm:$0xff]  ;;  %v250_v3 = vsel %vm249_vm0, %v104_v0, %v1881_v1  ;;  %s115_s12 = scalar_lea.vmem [#allocation5], %s114_s26  ;;  %s133_s13 = sadd.s32 8, %s2563_s19 }
  0x74   : > { %v1883_v4 = vld [vmem:[%s115_s12] ss:$0 sm:$0xff]  ;;  %v252_v5 = vsel %vm251_vm1, %v250_v3, %v1882_v2  ;;  %s2585_s14 = scalar_lea.vmem [#allocation2], %s270_s5  ;;  %s119_s0 = scalar_lea.vmem [#allocation5], %s118_s28 }
  0x75   : > { %274 = vst [vmem:[%s2585_s14 + $0x10] sm:$0xf] %v2447_v6  ;;  %v1884_v7 = vld [vmem:[%s119_s0] ss:$0 sm:$0xff]  ;;  %v254_v8 = vsel %vm253_vm2, %v252_v5, %v1883_v4  ;;  %s134_s15 = sld [smem:[#allocation4 + %s133_s13]]  ;;  %s123_s16 = scalar_lea.vmem [#allocation5], %s2572_s2 }
  0x76   : > { %v1885_v9 = vld [vmem:[%s123_s16] ss:$0 sm:$0xff]  ;;  %v256_v10 = vsel %vm255_vm3, %v254_v8, %v1884_v7  ;;  %s137_s3 = sadd.s32 9, %s2563_s19  ;;  %s127_s17 = scalar_lea.vmem [#allocation5], %s2575_s30 }
  0x77   : > { %v1886_v11 = vld [vmem:[%s127_s17] ss:$0 sm:$0xff]  ;;  %v258_v12 = vsel %vm257_vm4, %v256_v10, %v1885_v9  ;;  %s138_s4 = sld [smem:[#allocation4 + %s137_s3]]  ;;  %s141_s5 = sadd.s32 10, %s2563_s19 }
  0x78   : > { %v260_v13 = vsel %vm259_vm5, %v258_v12, %v1886_v11  ;;  %s142_s20 = sld [smem:[#allocation4 + %s141_s5]]  ;;  %s131_s21 = scalar_lea.vmem [#allocation5], %s2578_s10 }
  0x79   : > { %v1887_v14 = vld [vmem:[%s131_s21] ss:$0 sm:$0xff]  ;;  %s145_s22 = sadd.s32 11, %s2563_s19  ;;  %s149_s23 = sadd.s32 12, %s2563_s19 }
  0x7a   : > { %v262_v15 = vsel %vm261_vm6, %v260_v13, %v1887_v14  ;;  %s146_s24 = sld [smem:[#allocation4 + %s145_s22]]  ;;  %s153_s26 = sadd.s32 13, %s2563_s19 }
  0x7b   : > { %s150_s25 = sld [smem:[#allocation4 + %s149_s23]]  ;;  %272 = vst [vmem:[%s2585_s14] sm:$0xff] %v262_v15  ;;  %s135_s27 = scalar_lea.vmem [#allocation5], %s134_s15 }
  0x7c   : > { %v136_v16 = vld [vmem:[%s135_s27] sm:$0x1]  ;;  %s154_s28 = sld [smem:[#allocation4 + %s153_s26]]  ;;  %s157_s29 = sadd.s32 14, %s2563_s19 }
  0x7d   : > { %s158_s2 = sld [smem:[#allocation4 + %s157_s29]]  ;;  %s139_s1 = scalar_lea.vmem [#allocation5], %s138_s4 }
  0x7e   : > { %v1888_v17 = vld [vmem:[%s139_s1] ss:$0 sm:$0xff]  ;;  %s161_s30 = sadd.s32 15, %s2563_s19  ;;  %s143_s7 = scalar_lea.vmem [#allocation5], %s142_s20 }
  0x7f   : > { %v1889_v18 = vld [vmem:[%s143_s7] ss:$0 sm:$0xff]  ;;  %s162_s8 = sld [smem:[#allocation4 + %s161_s30]]  ;;  %v263_v19 = vsel %vm249_vm0, %v136_v16, %v1888_v17  ;;  %s99_s18 = sadd.s32 1, %s2432_s18  }
  0x80   : > { %v264_v20 = vsel %vm251_vm1, %v263_v19, %v1889_v18  ;;  %s147_s9 = scalar_lea.vmem [#allocation5], %s146_s24  ;;  %p96_p1 = scmp.ge.s32.totalorder %s99_s18, 8  }
  0x81   : > { %v1890_v21 = vld [vmem:[%s147_s9] ss:$0 sm:$0xff]  ;;  %s151_s10 = scalar_lea.vmem [#allocation5], %s150_s25  ;;  %v2138_v33 = vld [vmem:[#allocation8] ss:$8 sps:$4 sm:$0xff] (%p96_p1)   ;;  %vm1669_vm9 = vcmask (%p96_p1), 1041409  }
  0x82   : > { %v1891_v22 = vld [vmem:[%s151_s10] ss:$0 sm:$0xff]  ;;  %v265_v23 = vsel %vm253_vm2, %v264_v20, %v1890_v21  ;;  %s155_s11 = scalar_lea.vmem [#allocation5], %s154_s28  ;;  %98 = sbr.rel (!%p96_p1) target bundleno = 105 (0x69), region = 84  ;;  %v2617_v34 = vld [vmem:[#allocation8 + $0x100] ss:$8 sps:$4 sm:$0xff] (%p96_p1)  }
  0x83   : > { %v1892_v24 = vld [vmem:[%s155_s11] ss:$0 sm:$0xff]  ;;  %v266_v25 = vsel %vm255_vm3, %v265_v23, %v1891_v22  ;;  %s159_s12 = scalar_lea.vmem [#allocation5], %s158_s2  ;;  %v2140_v35 = vld [vmem:[#allocation8 + $0x14] ss:$8 sps:$4 sm:$0xff] (%p96_p1)   ;;  %vm1671_vm10 = vcmask (%p96_p1), 1042434  }
  0x84   : > { %v1893_v26 = vld [vmem:[%s159_s12] ss:$0 sm:$0xff]  ;;  %v267_v27 = vsel %vm257_vm4, %v266_v25, %v1892_v24  ;;  %v2621_v36 = vld [vmem:[#allocation8 + $0x114] ss:$8 sps:$4 sm:$0xff] (%p96_p1)   ;;  %v2144_v37 = vld [vmem:[#allocation8 + $0x10] ss:$8 sps:$4 sm:$0xff] (%p96_p1)  }
  0x85   : > { %v268_v28 = vsel %vm259_vm5, %v267_v27, %v1893_v26  ;;  %s163_s19 = scalar_lea.vmem [#allocation5], %s162_s8  ;;  %v2134_v31 = vld [vmem:[#allocation8 + $0x4] ss:$8 sps:$4 sm:$0xff] (%p96_p1)   ;;  %v2623_v38 = vld [vmem:[#allocation8 + $0x110] ss:$8 sps:$4 sm:$0xff] (%p96_p1)   ;;  %vm1673_vm11 = vcmask (%p96_p1), 1043459  }
  0x86   : > { %v1894_v29 = vld [vmem:[%s163_s19] ss:$0 sm:$0xff]  ;;  %1063 = vmatprep.subr.bf16.mxu1 (%p96_p1), %v2134_v31  ;;  %v2150_v41 = vld [vmem:[#allocation8 + $0x20] ss:$8 sps:$4 sm:$0xff] (%p96_p1)   ;;  %v2152_v43 = vld [vmem:[#allocation8 + $0x34] ss:$8 sps:$4 sm:$0xff] (%p96_p1)  }
  0x87   : > { %v269_v30 = vsel %vm261_vm6, %v268_v28, %v1894_v29  ;;  %v2615_v32 = vld [vmem:[#allocation8 + $0x104] ss:$8 sps:$4 sm:$0xff] (%p96_p1)   ;;  %1064 = vmatpush1.bf16.msra.mxu1 (%p96_p1), %v2138_v33  ;;  %v2628_v42 = vld [vmem:[#allocation8 + $0x120] ss:$8 sps:$4 sm:$0xff] (%p96_p1)   ;;  %v2632_v44 = vld [vmem:[#allocation8 + $0x134] ss:$8 sps:$4 sm:$0xff] (%p96_p1)  }
  0x88   : > { %273 = vst [vmem:[%s2585_s14 + $0x8] sm:$0xff] %v269_v30  ;;  %1176 = vmatprep.subr.bf16.mxu0 (%p96_p1), %v2615_v32  ;;  %1065 = vmatprep.subr.bf16.mxu1 (%p96_p1), %v2140_v35  ;;  %v2146_v39 = vld [vmem:[#allocation8 + $0x24] ss:$8 sps:$4 sm:$0xff] (%p96_p1)   ;;  %v2156_v45 = vld [vmem:[#allocation8 + $0x30] ss:$8 sps:$4 sm:$0xff] (%p96_p1)   ;;  %vm1675_vm12 = vcmask (%p96_p1), 1044484  }
  0x89   :  { %1177 = vmatpush1.bf16.msra.mxu0 %v2617_v34  ;;  %v2626_v40 = vld [vmem:[#allocation8 + $0x124] ss:$8 sps:$4 sm:$0xff]   ;;  %v2635_v46 = vld [vmem:[#allocation8 + $0x130] ss:$8 sps:$4 sm:$0xff]   ;;  %v2162_v49 = vld [vmem:[#allocation8 + $0x40] ss:$8 sps:$4 sm:$0xff]  }
  0x8a   :  { %1178 = vmatprep.subr.bf16.mxu0 %v2621_v36  ;;  %v2158_v47 = vld [vmem:[#allocation8 + $0x44] ss:$8 sps:$4 sm:$0xff]   ;;  %v2640_v50 = vld [vmem:[#allocation8 + $0x140] ss:$8 sps:$4 sm:$0xff]   ;;  %v2164_v51 = vld [vmem:[#allocation8 + $0x54] ss:$8 sps:$4 sm:$0xff]  }
  0x8b   :  { %1066 = vmatpush1.bf16.msra.mxu1 %v2144_v37  ;;  %v2638_v48 = vld [vmem:[#allocation8 + $0x144] ss:$8 sps:$4 sm:$0xff]   ;;  %v2644_v52 = vld [vmem:[#allocation8 + $0x154] ss:$8 sps:$4 sm:$0xff]   ;;  %v2168_v53 = vld [vmem:[#allocation8 + $0x50] ss:$8 sps:$4 sm:$0xff]  }
  0x8c   :  { %1067 = vmatprep.subr.bf16.mxu1 %v2146_v39  ;;  %v2647_v54 = vld [vmem:[#allocation8 + $0x150] ss:$8 sps:$4 sm:$0xff]   ;;  %v2170_v55 = vld [vmem:[#allocation8 + $0x64] ss:$8 sps:$4 sm:$0xff]   ;;  %v2174_v57 = vld [vmem:[#allocation8 + $0x60] ss:$8 sps:$4 sm:$0xff]  }
  0x8d   :  { %1179 = vmatpush1.bf16.msra.mxu0 %v2623_v38  ;;  %v2650_v56 = vld [vmem:[#allocation8 + $0x164] ss:$8 sps:$4 sm:$0xff]   ;;  %v2652_v58 = vld [vmem:[#allocation8 + $0x160] ss:$8 sps:$4 sm:$0xff]   ;;  %v2176_v59 = vld [vmem:[#allocation8 + $0x74] ss:$8 sps:$4 sm:$0xff]  }
  0x8e   :  { %1180 = vmatprep.subr.bf16.mxu0 %v2626_v40  ;;  %v2656_v60 = vld [vmem:[#allocation8 + $0x174] ss:$8 sps:$4 sm:$0xff]   ;;  %v2180_v61 = vld [vmem:[#allocation8 + $0x70] ss:$8 sps:$4 sm:$0xff]   ;;  %v2182_v63 = vld [vmem:[#allocation8 + $0x84] ss:$8 sps:$4 sm:$0xff]  }
  0x8f   :  { %1068 = vmatpush1.bf16.msra.mxu1 %v2150_v41  ;;  %v2659_v62 = vld [vmem:[#allocation8 + $0x170] ss:$8 sps:$4 sm:$0xff]   ;;  %v2662_v0 = vld [vmem:[#allocation8 + $0x184] ss:$8 sps:$4 sm:$0xff]   ;;  %v2186_v1 = vld [vmem:[#allocation8 + $0x80] ss:$8 sps:$4 sm:$0xff]  }
  0x90   :  { %1069 = vmatprep.subr.bf16.mxu1 %v2152_v43  ;;  %v2664_v2 = vld [vmem:[#allocation8 + $0x180] ss:$8 sps:$4 sm:$0xff]   ;;  %v2188_v3 = vld [vmem:[#allocation8 + $0x94] ss:$8 sps:$4 sm:$0xff]   ;;  %v2192_v5 = vld [vmem:[#allocation8 + $0x90] ss:$8 sps:$4 sm:$0xff]  }
  0x91   :  { %1181 = vmatpush1.bf16.msra.mxu0 %v2628_v42  ;;  %v2668_v4 = vld [vmem:[#allocation8 + $0x194] ss:$8 sps:$4 sm:$0xff]   ;;  %v2671_v6 = vld [vmem:[#allocation8 + $0x190] ss:$8 sps:$4 sm:$0xff]   ;;  %v2194_v7 = vld [vmem:[#allocation8 + $0xa4] ss:$8 sps:$4 sm:$0xff]  }
  0x92   :  { %1182 = vmatprep.subr.bf16.mxu0 %v2632_v44  ;;  %v2674_v8 = vld [vmem:[#allocation8 + $0x1a4] ss:$8 sps:$4 sm:$0xff]   ;;  %v2198_v9 = vld [vmem:[#allocation8 + $0xa0] ss:$8 sps:$4 sm:$0xff]   ;;  %v2200_v11 = vld [vmem:[#allocation8 + $0xb4] ss:$8 sps:$4 sm:$0xff]  }
  0x93   :  { %1070 = vmatpush1.bf16.msra.mxu1 %v2156_v45  ;;  %v2676_v10 = vld [vmem:[#allocation8 + $0x1a0] ss:$8 sps:$4 sm:$0xff]   ;;  %v2680_v12 = vld [vmem:[#allocation8 + $0x1b4] ss:$8 sps:$4 sm:$0xff]   ;;  %v2204_v13 = vld [vmem:[#allocation8 + $0xb0] ss:$8 sps:$4 sm:$0xff]  }
  0x94   :  { %1071 = vmatprep.subr.bf16.mxu1 %v2158_v47  ;;  %v275_v14 = vld [vmem:[#allocation2] sm:$0xff]  ;;  %v276_v15 = vld [vmem:[#allocation2 + $0x8] sm:$0xff]  ;;  %v277_v16 = vld [vmem:[#allocation2 + $0x10] sm:$0xf]  ;;  %vm315_vm7 = vsmask.f32 7424 }
  0x95   :  { %1183 = vmatpush1.bf16.msra.mxu0 %v2635_v46  ;;  %v2683_v17 = vld [vmem:[#allocation8 + $0x1b0] ss:$8 sps:$4 sm:$0xff]   ;;  %v2206_v18 = vld [vmem:[#allocation8 + $0xc4] ss:$8 sps:$4 sm:$0xff]   ;;  %v2685_v19 = vpack.c.bf16 %v276_v15, %v275_v14  ;;  %v2687_v20 = vpack.c.bf16 %v277_v16, %v277_v16  ;;  %v2210_v22 = vld [vmem:[#allocation8 + $0xc0] ss:$8 sps:$4 sm:$0xff]  }
  0x96   :  { %1184 = vmatprep.subr.bf16.mxu0 %v2638_v48  ;;  %v2690_v21 = vld [vmem:[#allocation8 + $0x1c4] ss:$8 sps:$4 sm:$0xff]   ;;  %v2692_v23 = vld [vmem:[#allocation8 + $0x1c0] ss:$8 sps:$4 sm:$0xff]   ;;  %v280_v30 = vld [vmem:[#allocation2 + $0x28] sm:$0xf] }
  0x97   :  { %1072 = vmatpush1.bf16.msra.mxu1 %v2162_v49  ;;  %v317_v24 = vshrl.u32 %v2685_v19, 16  ;;  %v319_v25 = vshll.u32 %v2685_v19, 16  ;;  %v324_v26 = vshll.u32 %v2687_v20, 16  ;;  %v473_v27 = vshrl.u32 %v2687_v20, 16  ;;  %v278_v28 = vld [vmem:[#allocation2 + $0x18] sm:$0xff]  ;;  %v279_v29 = vld [vmem:[#allocation2 + $0x20] sm:$0xff] }
  0x98   :  { %1073 = vmatprep.subr.bf16.mxu1 %v2164_v51  ;;  %v2212_v39 = vld [vmem:[#allocation8 + $0xd4] ss:$8 sps:$4 sm:$0xff]   ;;  %vm469_vm8 = vsmask.f32 6400  ;;  %v2702_v51 = vpack.c.bf16 %v279_v29, %v278_v28  ;;  %v2228_v28 = vld [vmem:[#allocation8 + $0xf0] ss:$8 sps:$4 sm:$0xff]  }
  0x99   :  { %1185 = vmatpush1.bf16.msra.mxu0 %v2640_v50  ;;  %v321_v31 = vrot.slane %v319_v25, 1  ;;  %v326_v33 = vrot.slane %v324_v26, 1  ;;  %v470_v35 = vrot.slane %v317_v24, 1  ;;  %v471_v37 = vrot.slane %v319_v25, 2  ;;  %v2700_v41 = vld [vmem:[#allocation8 + $0x1d4] ss:$8 sps:$4 sm:$0xff]  }
  0x9a   :  { %1186 = vmatprep.subr.bf16.mxu0 %v2644_v52  ;;  %v475_v43 = vrot.slane %v473_v27, 1  ;;  %v476_v45 = vrot.slane %v324_v26, 2  ;;  %v329_v14 = vshrl.u32 %v2702_v51, 16  ;;  %vm1677_vm13 = vcmask 1045509   ;;  %s2449_s18 = smov [#allocation14]  }
  0x9b   :  { %1074 = vmatpush1.bf16.msra.mxu1 %v2168_v53  ;;  %v322_v47 = vor.u32 %v321_v31, %v317_v24  ;;  %v472_v49 = vor.u32 %v471_v37, %v470_v35  ;;  %v2216_v53 = vld [vmem:[#allocation8 + $0xd0] ss:$8 sps:$4 sm:$0xff]   ;;  %v2721_v24 = vld [vmem:[#allocation8 + $0x1f4] ss:$8 sps:$4 sm:$0xff]   ;;  %v437_v37 = vrot.slane %v2685_v19, 1  ;;  %vm1679_vm14 = vcmask 1046534  }
  0x9c   :  { %1075 = vmatprep.subr.bf16.mxu1 %v2170_v55  ;;  %v2704_v55 = vld [vmem:[#allocation8 + $0x1d0] ss:$8 sps:$4 sm:$0xff]   ;;  %3022 = vst [vmem:[#allocation21_spill] sm:$0xff] %v2721_v24  ;;  %v479_v29 = vrot.slane %v329_v14, 1  ;;  %vm1681_vm15 = vcmask 1047559   ;;  %s1846_s13 = sshll.u32 %s2449_s18, 4  ;;  %s1847_s13 = int_to_ptr.vmem [resolvable:$true] %s1846_s13 }
  0x9d   :  { %1187 = vmatpush1.bf16.msra.mxu0 %v2647_v54  ;;  %v2729_v35 = vld [vmem:[#allocation8 + $0x1f0] ss:$8 sps:$4 sm:$0xff]   ;;  %s2394_s14 = scalar_lea.vmem %s1847_s13, 128  ;;  %p2399_p3 = scmp.lt.s32.totalorder %s1847_s13, %s1847_s13 }
  0x9e   :  { %1188 = vmatprep.subr.bf16.mxu0 %v2650_v56  ;;  %p2395_p2 = scmp.ne.s32.totalorder %s1847_s13, %s2394_s14  ;;  %p2400_p4 = scmp.lt.s32.totalorder %s2394_s14, %s2394_s14 }
  0x9f   :  { %1076 = vmatpush1.bf16.msra.mxu1 %v2174_v57  ;;  %v2218_v57 = vld [vmem:[#allocation8 + $0xe4] ss:$8 sps:$4 sm:$0xff]  }
  0xa0   :  { %1077 = vmatprep.subr.bf16.mxu1 %v2176_v59  ;;  %v477_v59 = vor.u32 %v476_v45, %v475_v43  ;;  %v2232_v45 = vld [vmem:[#allocation8 + $0x204] ss:$8 sps:$4 sm:$0xff]   ;;  %p2401_p5 = por %p2400_p4, %p2399_p3 }
  0xa1   :  { %1189 = vmatpush1.bf16.msra.mxu0 %v2652_v58 }
  0xa2   :  { %1190 = vmatprep.subr.bf16.mxu0 %v2656_v60  ;;  %p2402_p6 = pnand %p2401_p5, %p2395_p2 }
  0xa3   :  { %1078 = vmatpush1.bf16.msra.mxu1 %v2180_v61  ;;  %v2706_v61 = vpack.c.bf16 %v280_v30, %v280_v30 }
  0xa4   :  { %1079 = vmatprep.subr.bf16.mxu1 %v2182_v63  ;;  %v2709_v63 = vld [vmem:[#allocation8 + $0x1e4] ss:$8 sps:$4 sm:$0xff]  }
  0xa5   :  { %1191 = vmatpush1.bf16.msra.mxu0 %v2659_v62  ;;  %v336_v15 = vshll.u32 %v2706_v61, 16  ;;  %v482_v16 = vshrl.u32 %v2706_v61, 16 }
  0xa6   :  { %1192 = vmatprep.subr.bf16.mxu0 %v2662_v0 }
  0xa7   :  { %1080 = vmatpush1.bf16.msra.mxu1 %v2186_v1  ;;  %v327_v1 = vsel %vm315_vm7, %v322_v47, %v326_v33  ;;  %v484_v31 = vrot.slane %v482_v16, 1  ;;  %v485_v33 = vrot.slane %v336_v15, 2  ;;  %v286_v16 = vld [vmem:[#allocation2 + $0x58] sm:$0xf] }
  0xa8   :  { %1081 = vmatprep.subr.bf16.mxu1 %v2188_v3  ;;  %v281_v3 = vld [vmem:[#allocation2 + $0x30] sm:$0xff]  ;;  %1095 = vmatprep.mubr.bf16.mxu1 %v327_v1 }
  0xa9   :  { %1193 = vmatpush1.bf16.msra.mxu0 %v2664_v2 }
  0xaa   :  { %1194 = vmatprep.subr.bf16.mxu0 %v2668_v4 }
  0xab   :  { %1082 = vmatpush1.bf16.msra.mxu1 %v2192_v5  ;;  %v282_v5 = vld [vmem:[#allocation2 + $0x38] sm:$0xff] }
  0xac   :  { %1083 = vmatprep.subr.bf16.mxu1 %v2194_v7  ;;  %v478_v7 = vsel %vm469_vm8, %v472_v49, %v477_v59  ;;  %v2723_v25 = vpack.c.bf16 %v282_v5, %v281_v3  ;;  %v338_v59 = vrot.slane %v336_v15, 1  ;;  %v486_v3 = vor.u32 %v485_v33, %v484_v31  ;;  %v284_v5 = vld [vmem:[#allocation2 + $0x48] sm:$0xff] }
  0xad   :  { %1195 = vmatpush1.bf16.msra.mxu0 %v2671_v6  ;;  %1208 = vmatprep.mubr.bf16.mxu0 %v478_v7  ;;  %v285_v7 = vld [vmem:[#allocation2 + $0x50] sm:$0xff]  ;;  %v2746_v31 = vpack.c.bf16 %v286_v16, %v286_v16  ;;  %v441_v33 = vrot.slane %v2706_v61, 1 }
  0xae   :  { %1196 = vmatprep.subr.bf16.mxu0 %v2674_v8  ;;  %v343_v43 = vshll.u32 %v2723_v25, 16  ;;  %v341_v47 = vshrl.u32 %v2723_v25, 16 }
  0xaf   :  { %1084 = vmatpush1.bf16.msra.mxu1 %v2198_v9  ;;  %v331_v9 = vshll.u32 %v2702_v51, 16 }
  0xb0   :  { %1085 = vmatprep.subr.bf16.mxu1 %v2200_v11  ;;  %v283_v11 = vld [vmem:[#allocation2 + $0x40] sm:$0xf] }
  0xb1   :  { %1197 = vmatpush1.bf16.msra.mxu0 %v2676_v10  ;;  %v2726_v26 = vpack.c.bf16 %v283_v11, %v283_v11  ;;  %v333_v27 = vrot.slane %v331_v9, 1  ;;  %v480_v30 = vrot.slane %v331_v9, 2  ;;  %v2230_v11 = vld [vmem:[#allocation8 + $0x200] ss:$8 sps:$4 sm:$0xff]  }
  0xb2   :  { %1198 = vmatprep.subr.bf16.mxu0 %v2680_v12 }
  0xb3   :  { %1086 = vmatpush1.bf16.msra.mxu1 %v2204_v13  ;;  %v2222_v13 = vld [vmem:[#allocation8 + $0xe0] ss:$8 sps:$4 sm:$0xff]   ;;  %v348_v49 = vshll.u32 %v2726_v26, 16  ;;  %v481_v1 = vor.u32 %v480_v30, %v479_v29 }
  0xb4   :  { %1087 = vmatprep.subr.bf16.mxu1 %v2206_v18  ;;  %v2719_v18 = vld [vmem:[#allocation8 + $0x1e0] ss:$8 sps:$4 sm:$0xff]  }
  0xb5   :  { %1199 = vmatpush1.bf16.msra.mxu0 %v2683_v17  ;;  %3021 = vst [vmem:[#allocation20_spill] sm:$0xff] %v2719_v18  ;;  %v494_v15 = vrot.slane %v348_v49, 2  ;;  %v487_v30 = vsel %vm469_vm8, %v481_v1, %v486_v3  ;;  %v360_v1 = vshll.u32 %v2746_v31, 16  ;;  %v500_v3 = vshrl.u32 %v2746_v31, 16 }
  0xb6   :  { %1200 = vmatprep.subr.bf16.mxu0 %v2690_v21 }
  0xb7   :  { %1088 = vmatpush1.bf16.msra.mxu1 %v2210_v22  ;;  %v2224_v22 = vld [vmem:[#allocation8 + $0xf4] ss:$8 sps:$4 sm:$0xff]   ;;  %v503_v16 = vrot.slane %v360_v1, 2 }
  0xb8   :  { %1089 = vmatprep.subr.bf16.mxu1 %v2212_v39  ;;  %v438_v39 = vrot.slane %v2687_v20, 1 }
  0xb9   :  { %1201 = vmatpush1.bf16.msra.mxu0 %v2692_v23 }
  0xba   :  { %1202 = vmatprep.subr.bf16.mxu0 %v2700_v41  ;;  %v439_v9 = vsel %vm261_vm6, %v437_v37, %v438_v39  ;;  %v2238_v37 = vld [vmem:[#allocation8 + $0x224] ss:$8 sps:$4 sm:$0xff]  }
  0xbb   :  { %1090 = vmatpush1.bf16.msra.mxu1 %v2216_v53  ;;  %v491_v53 = vshrl.u32 %v2726_v26, 16 }
  0xbc   :  { %1091 = vmatprep.subr.bf16.mxu1 %v2218_v57  ;;  %v334_v57 = vor.u32 %v333_v27, %v329_v14  ;;  %v2741_v27 = vpack.c.bf16 %v285_v7, %v284_v5  ;;  %v287_v5 = vld [vmem:[#allocation2 + $0x60] sm:$0xff] }
  0xbd   :  { %1203 = vmatpush1.bf16.msra.mxu0 %v2704_v55  ;;  %v493_v14 = vrot.slane %v491_v53, 1 }
  0xbe   :  { %1204 = vmatprep.subr.bf16.mxu0 %v2709_v63  ;;  %v339_v29 = vsel %vm315_vm7, %v334_v57, %v338_v59  ;;  %v353_v59 = vshrl.u32 %v2741_v27, 16 }
  0xbf   :  { %1092 = vmatpush1.bf16.msra.mxu1 %v2222_v13  ;;  %v345_v13 = vrot.slane %v343_v43, 1  ;;  %v495_v57 = vor.u32 %v494_v15, %v493_v14  ;;  %v444_v14 = vrot.slane %v2726_v26, 1  ;;  %v289_v15 = vld [vmem:[#allocation2 + $0x70] sm:$0xf] }
  0xc0   :  { %1093 = vmatprep.subr.bf16.mxu1 %v2224_v22  ;;  %v2235_v22 = vld [vmem:[#allocation8 + $0x214] ss:$8 sps:$4 sm:$0xff]  }
  0xc1   :  { %1205 = vmatpush1.bf16.msra.mxu0 %v2719_v18  ;;  %v489_v18 = vrot.slane %v343_v43, 2  ;;  %v346_v39 = vor.u32 %v345_v13, %v341_v47  ;;  %v350_v43 = vrot.slane %v348_v49, 1 }
  0xc2   :  { %1206 = vmatprep.subr.bf16.mxu0 %v2721_v24  ;;  %v488_v24 = vrot.slane %v341_v47, 1  ;;  %v288_v47 = vld [vmem:[#allocation2 + $0x68] sm:$0xff] }
  0xc3   :  { %1094 = vmatpush1.bf16.msra.mxu1 %v2228_v28  ;;  %v2233_v28 = vld [vmem:[#allocation8 + $0x210] ss:$8 sps:$4 sm:$0xff]   ;;  %v351_v49 = vsel %vm315_vm7, %v346_v39, %v350_v43  ;;  %v2768_v43 = vpack.c.bf16 %v289_v15, %v289_v15 }
  0xc4   :  { %2014 = vmatprep.subr.bf16.mxu1 %v2615_v32  ;;  %v440_v32 = vrot.slane %v2702_v51, 1  ;;  %v490_v53 = vor.u32 %v489_v18, %v488_v24  ;;  %v2241_v18 = vld [vmem:[#allocation8 + $0x234] ss:$8 sps:$4 sm:$0xff]   ;;  %v2239_v24 = vld [vmem:[#allocation8 + $0x230] ss:$8 sps:$4 sm:$0xff]  }
  0xc5   :  { %1207 = vmatpush1.bf16.msra.mxu0 %v2729_v35 }
  0xc6   :  { %1289 = vmatprep.subr.bf16.mxu0 %v2232_v45  ;;  %1096 = vmatmul.mubr.bf16.vlgmr.msra.gmra.mrb[0].mxu1 %v2685_v19  ;;  %v2236_v45 = vld [vmem:[#allocation8 + $0x220] ss:$8 sps:$4 sm:$0xff]   ;;  %v496_v7 = vsel %vm469_vm8, %v490_v53, %v495_v57  ;;  %v2247_v53 = vld [vmem:[#allocation8 + $0x254] ss:$8 sps:$4 sm:$0xff]  }
  0xc7   :  { %2030 = vmatpush1.bf16.msra.mxu1 %v2617_v34  ;;  %1105 = vmatprep.mubr.bf16.mxu1 %v339_v29  ;;  %v355_v34 = vshll.u32 %v2741_v27, 16  ;;  %v290_v29 = vld [vmem:[#allocation2 + $0x78] sm:$0xff] }
  0xc8   :  { %1209 = vmatmul.mubr.bf16.vlgmr.msra.gmra.mrb[0].mxu0 %v439_v9  ;;  %2015 = vmatprep.subr.bf16.mxu1 %v2621_v36  ;;  %v442_v36 = vsel %vm261_vm6, %v440_v32, %v441_v33  ;;  %v362_v32 = vrot.slane %v360_v1, 1  ;;  %v291_v33 = vld [vmem:[#allocation2 + $0x80] sm:$0xff] }
  0xc9   :  { %1290 = vmatpush1.bf16.msra.mxu0 %v2230_v11  ;;  %1218 = vmatprep.mubr.bf16.mxu0 %v487_v30  ;;  %v357_v9 = vrot.slane %v355_v34, 1  ;;  %v497_v11 = vrot.slane %v353_v59, 1  ;;  %v498_v13 = vrot.slane %v355_v34, 2  ;;  %v2774_v57 = vpack.c.bf16 %v291_v33, %v290_v29  ;;  %v292_v34 = vld [vmem:[#allocation2 + $0x88] sm:$0xf] }
  0xca   :  { %1291 = vmatprep.subr.bf16.mxu0 %v2235_v22  ;;  %v2762_v22 = vpack.c.bf16 %v288_v47, %v287_v5  ;;  %v372_v5 = vshll.u32 %v2768_v43, 16  ;;  %v447_v47 = vrot.slane %v2746_v31, 1  ;;  %v551_v29 = vrot.slane %v2685_v19, 2  ;;  %v296_v19 = vld [vmem:[#allocation2 + $0xa8] sm:$0xff] }
  0xcb   :  { %2031 = vmatpush1.bf16.msra.mxu1 %v2623_v38  ;;  %v502_v38 = vrot.slane %v500_v3, 1  ;;  %v358_v30 = vor.u32 %v357_v9, %v353_v59  ;;  %v294_v9 = vld [vmem:[#allocation2 + $0x98] sm:$0xff] }
  0xcc   :  { %2016 = vmatprep.subr.bf16.mxu1 %v2626_v40  ;;  %v443_v40 = vrot.slane %v2723_v25, 1 }
  0xcd   :  { %1292 = vmatpush1.bf16.msra.mxu0 %v2233_v28  ;;  %v2244_v28 = vld [vmem:[#allocation8 + $0x244] ss:$8 sps:$4 sm:$0xff]   ;;  %v504_v39 = vor.u32 %v503_v16, %v502_v38  ;;  %v363_v59 = vsel %vm315_vm7, %v358_v30, %v362_v32  ;;  %v2253_v38 = vld [vmem:[#allocation8 + $0x274] ss:$8 sps:$4 sm:$0xff]   ;;  %v377_v16 = vshrl.u32 %v2774_v57, 16  ;;  %v552_v30 = vrot.slane %v2687_v20, 2 }
  0xce   :  { %1293 = vmatprep.subr.bf16.mxu0 %v2238_v37  ;;  %1106 = vmatmul.mubr.bf16.gmra.mrb[4].mxu1 %v2702_v51  ;;  %v499_v37 = vor.u32 %v498_v13, %v497_v11  ;;  %v374_v11 = vrot.slane %v372_v5, 1  ;;  %v2248_v13 = vld [vmem:[#allocation8 + $0x260] ss:$8 sps:$4 sm:$0xff]  }
  0xcf   :  { %2032 = vmatpush1.bf16.msra.mxu1 %v2628_v42  ;;  %1115 = vmatprep.mubr.bf16.mxu1 %v351_v49  ;;  %v367_v42 = vshll.u32 %v2762_v22, 16  ;;  %v379_v49 = vshll.u32 %v2774_v57, 16 }
  0xd0   :  { %1219 = vmatmul.mubr.bf16.gmra.mrb[4].mxu0 %v442_v36  ;;  %2017 = vmatprep.subr.bf16.mxu1 %v2632_v44  ;;  %v2242_v44 = vld [vmem:[#allocation8 + $0x240] ss:$8 sps:$4 sm:$0xff]   ;;  %v505_v1 = vsel %vm469_vm8, %v499_v37, %v504_v39  ;;  %v446_v36 = vrot.slane %v2741_v27, 1 }
  0xd1   :  { %1294 = vmatpush1.bf16.msra.mxu0 %v2236_v45  ;;  %1228 = vmatprep.mubr.bf16.mxu0 %v496_v7  ;;  %v445_v45 = vsel %vm261_vm6, %v443_v40, %v444_v14  ;;  %v369_v3 = vrot.slane %v367_v42, 1  ;;  %v293_v7 = vld [vmem:[#allocation2 + $0x90] sm:$0xff]  ;;  %v381_v40 = vrot.slane %v379_v49, 1 }
  0xd2   :  { %1295 = vmatprep.subr.bf16.mxu0 %v2241_v18  ;;  %v2250_v18 = vld [vmem:[#allocation8 + $0x264] ss:$8 sps:$4 sm:$0xff]   ;;  %v2801_v15 = vpack.c.bf16 %v294_v9, %v293_v7  ;;  %v558_v7 = vrot.slane %v2726_v26, 2  ;;  %v507_v26 = vrot.slane %v367_v42, 2 }
  0xd3   :  { %2033 = vmatpush1.bf16.msra.mxu1 %v2635_v46  ;;  %v365_v46 = vshrl.u32 %v2762_v22, 16  ;;  %v382_v32 = vor.u32 %v381_v40, %v377_v16  ;;  %v449_v40 = vrot.slane %v2762_v22, 1 }
  0xd4   :  { %2018 = vmatprep.subr.bf16.mxu1 %v2638_v48  ;;  %v2245_v48 = vld [vmem:[#allocation8 + $0x250] ss:$8 sps:$4 sm:$0xff]   ;;  %v391_v39 = vshll.u32 %v2801_v15, 16  ;;  %v389_v20 = vshrl.u32 %v2801_v15, 16 }
  0xd5   :  { %1296 = vmatpush1.bf16.msra.mxu0 %v2239_v24  ;;  %v2787_v24 = vpack.c.bf16 %v292_v34, %v292_v34 }
  0xd6   :  { %1297 = vmatprep.subr.bf16.mxu0 %v2244_v28  ;;  %1116 = vmatmul.mubr.bf16.gmra.mrb[8].mxu1 %v2723_v25  ;;  %v295_v28 = vld [vmem:[#allocation2 + $0xa0] sm:$0xf] }
  0xd7   :  { %2034 = vmatpush1.bf16.msra.mxu1 %v2640_v50  ;;  %1125 = vmatprep.mubr.bf16.mxu1 %v363_v59  ;;  %v370_v50 = vor.u32 %v369_v3, %v365_v46  ;;  %v384_v14 = vshll.u32 %v2787_v24, 16  ;;  %v2813_v37 = vpack.c.bf16 %v295_v28, %v295_v28  ;;  %v564_v28 = vrot.slane %v2768_v43, 2 }
  0xd8   :  { %1229 = vmatmul.mubr.bf16.gmra.mrb[8].mxu0 %v445_v45  ;;  %2019 = vmatprep.subr.bf16.mxu1 %v2644_v52  ;;  %v448_v52 = vsel %vm261_vm6, %v446_v36, %v447_v47  ;;  %v297_v45 = vld [vmem:[#allocation2 + $0xb0] sm:$0xff] }
  0xd9   :  { %1298 = vmatpush1.bf16.msra.mxu0 %v2242_v44  ;;  %1238 = vmatprep.mubr.bf16.mxu0 %v505_v1  ;;  %v386_v33 = vrot.slane %v384_v14, 1  ;;  %v396_v59 = vshll.u32 %v2813_v37, 16  ;;  %v2825_v34 = vpack.c.bf16 %v297_v45, %v296_v19  ;;  %v298_v1 = vld [vmem:[#allocation2 + $0xb8] sm:$0xf]  ;;  %v453_v45 = vrot.slane %v2787_v24, 1 }
  0xda   :  { %1299 = vmatprep.subr.bf16.mxu0 %v2247_v53  ;;  %v393_v53 = vrot.slane %v391_v39, 1  ;;  %v2837_v36 = vpack.c.bf16 %v298_v1, %v298_v1 }
  0xdb   :  { %2035 = vmatpush1.bf16.msra.mxu1 %v2647_v54  ;;  %v375_v54 = vsel %vm315_vm7, %v370_v50, %v374_v11  ;;  %v387_v44 = vsel %vm315_vm7, %v382_v32, %v386_v33  ;;  %v403_v47 = vshll.u32 %v2825_v34, 16  ;;  %v509_v50 = vshrl.u32 %v2768_v43, 16 }
  0xdc   :  { %2020 = vmatprep.subr.bf16.mxu1 %v2650_v56  ;;  %v2251_v56 = vld [vmem:[#allocation8 + $0x270] ss:$8 sps:$4 sm:$0xff]   ;;  %v394_v3 = vor.u32 %v393_v53, %v389_v20  ;;  %v524_v32 = vrot.slane %v389_v20, 1  ;;  %v530_v19 = vrot.slane %v396_v59, 2  ;;  %v567_v20 = vrot.slane %v2787_v24, 2 }
  0xdd   :  { %1300 = vmatpush1.bf16.msra.mxu0 %v2245_v48  ;;  %v398_v48 = vrot.slane %v396_v59, 1  ;;  %v511_v11 = vrot.slane %v509_v50, 1 }
  0xde   :  { %1301 = vmatprep.subr.bf16.mxu0 %v2250_v18  ;;  %1126 = vmatmul.mubr.bf16.gmra.mrb[12].mxu1 %v2741_v27  ;;  %v408_v18 = vshll.u32 %v2837_v36, 16 }
  0xdf   :  { %2036 = vmatpush1.bf16.msra.mxu1 %v2652_v58  ;;  %1135 = vmatprep.mubr.bf16.mxu1 %v375_v54  ;;  %v2448_v58 = vmov 0   ;;  %v3024_v54 = vld [vmem:[#allocation21_spill] sm:$0xff] }
  0xe0   :  { %1239 = vmatmul.mubr.bf16.gmra.mrb[12].mxu0 %v448_v52  ;;  %2021 = vmatprep.subr.bf16.mxu1 %v2656_v60  ;;  %v553_v60 = vsel %vm259_vm5, %v551_v29, %v552_v30  ;;  %v410_v9 = vrot.slane %v408_v18, 1  ;;  %v512_v52 = vrot.slane %v372_v5, 2 }
  0xe1   :  { %1302 = vmatpush1.bf16.msra.mxu0 %v2248_v13  ;;  %1321 = vmatprep.mubr.bf16.mxu0 %v2448_v58  ;;  %v518_v13 = vshrl.u32 %v2787_v24, 16  ;;  %v455_v24 = vrot.slane %v2801_v15, 1 }
  0xe2   :  { %1303 = vmatprep.subr.bf16.mxu0 %v2253_v38  ;;  %v513_v42 = vor.u32 %v512_v52, %v511_v11  ;;  %v521_v38 = vrot.slane %v384_v14, 2  ;;  %v2258_v11 = vld [vmem:[#allocation11 + $0x50] sm:$0xff]  }
  0xe3   :  { %2037 = vmatpush1.bf16.msra.mxu1 %v2659_v62  ;;  %v554_v62 = vrot.slane %v2702_v51, 2  ;;  %v401_v51 = vshrl.u32 %v2825_v34, 16  ;;  %v2259_v52 = vld [vmem:[#allocation11 + $0x10] sm:$0xff]  }
  0xe4   :  { %2022 = vmatprep.subr.bf16.mxu1 %v2662_v0  ;;  %v555_v0 = vrot.slane %v2706_v61, 2  ;;  %v405_v61 = vrot.slane %v403_v47, 1 }
  0xe5   :  { %1304 = vmatpush1.bf16.msra.mxu0 %v2251_v56  ;;  %v527_v56 = vshrl.u32 %v2813_v37, 16 }
  0xe6   :  { %1136 = vmatmul.mubr.bf16.gmra.mrb[16].mxu1 %v2762_v22 }
  0xe7   :  { %2038 = vmatpush1.bf16.msra.mxu1 %v2664_v2  ;;  %1145 = vmatprep.mubr.bf16.mxu1 %v387_v44  ;;  %v556_v2 = vsel %vm259_vm5, %v554_v62, %v555_v0  ;;  %v529_v33 = vrot.slane %v527_v56, 1  ;;  %v533_v62 = vrot.slane %v401_v51, 1 }
  0xe8   :  { %1322 = vmatmul.mubr.bf16.vlgmr.msra.gmra.mrb[0].mxu0 %v553_v60  ;;  %2023 = vmatprep.subr.bf16.mxu1 %v2668_v4  ;;  %v399_v4 = vsel %vm315_vm7, %v394_v3, %v398_v48  ;;  %v566_v60 = vrot.slane %v2774_v57, 2  ;;  %v534_v3 = vrot.slane %v403_v47, 2 }
  0xe9   :  { %1331 = vmatprep.mubr.bf16.mxu0 %v2448_v58  ;;  %v531_v53 = vor.u32 %v530_v19, %v529_v33  ;;  %v2945_v33 = vld [vmem:[#allocation10] sm:$0xff] }
  0xea   :  { %v568_v59 = vsel %vm259_vm5, %v566_v60, %v567_v20 }
  0xeb   :  { %2039 = vmatpush1.bf16.msra.mxu1 %v2671_v6  ;;  %v557_v6 = vrot.slane %v2723_v25, 2  ;;  %v506_v25 = vrot.slane %v365_v46, 1  ;;  %v561_v46 = vrot.slane %v2746_v31, 2  ;;  %v520_v31 = vrot.slane %v518_v13, 1  ;;  %v2266_v13 = vld [vmem:[#allocation11 + $0x70] sm:$0xff]  }
  0xec   :  { %2024 = vmatprep.subr.bf16.mxu1 %v2674_v8  ;;  %v406_v8 = vor.u32 %v405_v61, %v401_v51  ;;  %v570_v51 = vrot.slane %v2813_v37, 2  ;;  %v535_v61 = vor.u32 %v534_v3, %v533_v62 }
  0xed   :  { %v522_v14 = vor.u32 %v521_v38, %v520_v31 }
  0xee   :  { %1146 = vmatmul.mubr.bf16.gmra.mrb[20].mxu1 %v2774_v57 }
  0xef   :  { %2040 = vmatpush1.bf16.msra.mxu1 %v2676_v10  ;;  %1155 = vmatprep.mubr.bf16.mxu1 %v399_v4  ;;  %v559_v10 = vsel %vm259_vm5, %v557_v6, %v558_v7  ;;  %v569_v4 = vrot.slane %v2801_v15, 2 }
  0xf0   :  { %1332 = vmatmul.mubr.bf16.gmra.mrb[4].mxu0 %v556_v2  ;;  %2025 = vmatprep.subr.bf16.mxu1 %v2680_v12  ;;  %v411_v12 = vsel %vm315_vm7, %v406_v8, %v410_v9  ;;  %v456_v2 = vrot.slane %v2813_v37, 1  ;;  %v458_v8 = vrot.slane %v2825_v34, 1  ;;  %v459_v9 = vrot.slane %v2837_v36, 1 }
  0xf1   :  { %1341 = vmatprep.mubr.bf16.mxu0 %v2448_v58  ;;  %v571_v7 = vsel %vm259_vm5, %v569_v4, %v570_v51  ;;  %v573_v37 = vrot.slane %v2837_v36, 2 }
  0xf2   :  { %v457_v47 = vsel %vm261_vm6, %v455_v24, %v456_v2  ;;  %v460_v50 = vsel %vm261_vm6, %v458_v8, %v459_v9 }
  0xf3   :  { %2041 = vmatpush1.bf16.msra.mxu1 %v2683_v17  ;;  %v560_v17 = vrot.slane %v2741_v27, 2 }
  0xf4   :  { %2026 = vmatprep.subr.bf16.mxu1 %v2690_v21  ;;  %v508_v21 = vor.u32 %v507_v26, %v506_v25  ;;  %v2254_v25 = vld [vmem:[#allocation11 + $0x40] sm:$0xff]   ;;  %v2256_v26 = vld [vmem:[#allocation11 + $0x48] sm:$0xff]  }
  0xf5   :  { %v562_v5 = vsel %vm259_vm5, %v560_v17, %v561_v46  ;;  %v2262_v17 = vld [vmem:[#allocation11 + $0x60] sm:$0xff]  }
  0xf6   :  { %1156 = vmatmul.mubr.bf16.gmra.mrb[24].mxu1 %v2801_v15  ;;  %v514_v27 = vsel %vm469_vm8, %v508_v21, %v513_v42  ;;  %v572_v15 = vrot.slane %v2825_v34, 2  ;;  %v2263_v46 = vld [vmem:[#allocation11 + $0x20] sm:$0xff]   ;;  %v2264_v21 = vld [vmem:[#allocation11 + $0x68] sm:$0xff]  }
  0xf7   :  { %2042 = vmatpush1.bf16.msra.mxu1 %v2692_v23  ;;  %1165 = vmatprep.mubr.bf16.mxu1 %v411_v12  ;;  %v515_v23 = vrot.slane %v377_v16, 1  ;;  %v450_v16 = vrot.slane %v2768_v43, 1  ;;  %v525_v43 = vrot.slane %v391_v39, 2  ;;  %v536_v39 = vshrl.u32 %v2837_v36, 16  ;;  %v2255_v12 = vld [vmem:[#allocation11] sm:$0xff]   ;;  %v2261_v36 = vld [vmem:[#allocation11 + $0x18] sm:$0xff]  }
  0xf8   :  { %1342 = vmatmul.mubr.bf16.gmra.mrb[8].mxu0 %v559_v10  ;;  %2027 = vmatprep.subr.bf16.mxu1 %v2700_v41  ;;  %v516_v41 = vrot.slane %v379_v49, 2  ;;  %v574_v10 = vsel %vm259_vm5, %v572_v15, %v573_v37  ;;  %v2265_v42 = vld [vmem:[#allocation11 + $0x28] sm:$0xff]  }
  0xf9   :  { %1351 = vmatprep.mubr.bf16.mxu0 %v2448_v58  ;;  %v451_v29 = vsel %vm261_vm6, %v449_v40, %v450_v16  ;;  %v526_v44 = vor.u32 %v525_v43, %v524_v32  ;;  %v538_v48 = vrot.slane %v536_v39, 1 }
  0xfa   :  { %v517_v49 = vor.u32 %v516_v41, %v515_v23  ;;  %v2268_v23 = vld [vmem:[#allocation11 + $0x78] sm:$0xff]  }
  0xfb   :  { %2043 = vmatpush1.bf16.msra.mxu1 %v2704_v55  ;;  %v3023_v55 = vld [vmem:[#allocation20_spill] sm:$0xff]  ;;  %v532_v0 = vsel %vm469_vm8, %v526_v44, %v531_v53 }
  0xfc   :  { %2028 = vmatprep.subr.bf16.mxu1 %v2709_v63  ;;  %v563_v63 = vrot.slane %v2762_v22, 2  ;;  %v523_v22 = vsel %vm469_vm8, %v517_v49, %v522_v14  ;;  %v2949_v44 = vld [vmem:[#allocation10 + $0x10] sm:$0xff] }
  0xfe   :  { %1166 = vmatmul.mubr.bf16.gmra.mrb[28].mxu1 %v2825_v34  ;;  %v565_v30 = vsel %vm259_vm5, %v563_v63, %v564_v28  ;;  %v2260_v34 = vld [vmem:[#allocation11 + $0x58] sm:$0xff]  }
  0xff   :  { %2044 = vmatpush1.bf16.msra.mxu1 %v3023_v55  ;;  %1248 = vmatprep.mubr.bf16.mxu1 %v514_v27  ;;  %v2269_v27 = vld [vmem:[#allocation11 + $0x38] sm:$0xff]  }
 0x100   :  { %1352 = vmatmul.mubr.bf16.gmra.mrb[12].mxu0 %v562_v5  ;;  %2029 = vmatprep.subr.bf16.mxu1 %v3024_v54  ;;  %v2267_v5 = vld [vmem:[#allocation11 + $0x30] sm:$0xff]  }
 0x101   :  { %1361 = vmatprep.mubr.bf16.mxu0 %v2448_v58 }
 0x103   :  { %2045 = vmatpush1.bf16.msra.mxu1 %v2729_v35  ;;  %v452_v35 = vrot.slane %v2774_v57, 1  ;;  %v539_v57 = vrot.slane %v408_v18, 2 }
 0x104   :  { %1992 = vmatprep.subr.bf16.mxu1 %v2254_v25 }
 0x105   :  { %v454_v1 = vsel %vm261_vm6, %v452_v35, %v453_v45  ;;  %v540_v6 = vor.u32 %v539_v57, %v538_v48  ;;  %v2947_v45 = vld [vmem:[#allocation10 + $0x8] sm:$0xff] }
 0x106   :  { %1249 = vmatmul.mubr.bf16.vlgmr.msra.gmra.mrb[16].mxu1 %v451_v29 }
 0x107   :  { %1258 = vmatprep.mubr.bf16.mxu1 %v523_v22  ;;  %v541_v18 = vsel %vm469_vm8, %v535_v61, %v540_v6  ;;  %1993 = vmatpush3.bf16.msra.mxu1 %v2255_v12 }
 0x108   :  { %1362 = vmatmul.mubr.bf16.gmra.mrb[16].mxu0 %v565_v30  ;;  %1994 = vmatprep.subr.bf16.mxu1 %v2256_v26 }
 0x109   :  { %1371 = vmatprep.mubr.bf16.mxu0 %v2448_v58 }
 0x10e   :  { %1259 = vmatmul.mubr.bf16.gmra.mrb[20].mxu1 %v454_v1 }
 0x10f   :  { %1268 = vmatprep.mubr.bf16.mxu1 %v532_v0 }
 0x110   :  { %1372 = vmatmul.mubr.bf16.gmra.mrb[20].mxu0 %v568_v59  ;;  %v2952_v59 = vld [vmem:[#allocation10 + $0x18] sm:$0xff] }
 0x111   :  { %1381 = vmatprep.mubr.bf16.mxu0 %v2448_v58 }
 0x116   :  { %1269 = vmatmul.mubr.bf16.gmra.mrb[24].mxu1 %v457_v47 }
 0x117   :  { %1278 = vmatprep.mubr.bf16.mxu1 %v541_v18 }
 0x118   :  { %1382 = vmatmul.mubr.bf16.gmra.mrb[24].mxu0 %v571_v7 }
 0x119   :  { %1391 = vmatprep.mubr.bf16.mxu0 %v2448_v58  ;;  %v2257_v58 = vld [vmem:[#allocation11 + $0x8] sm:$0xff]  }
 0x11a   :  { %1995 = vmatpush3.bf16.msra.mxu1 %v2257_v58 }
 0x11b   :  { %1996 = vmatprep.subr.bf16.mxu1 %v2258_v11 }
 0x11e   :  { %1279 = vmatmul.mubr.bf16.gmra.mrb[28].mxu1 %v460_v50 }
 0x11f   :  { %1997 = vmatpush3.bf16.msra.mxu1 %v2259_v52 }
 0x120   :  { %1392 = vmatmul.mubr.bf16.gmra.mrb[28].mxu0 %v574_v10  ;;  %1998 = vmatprep.subr.bf16.mxu1 %v2260_v34 }
 0x123   :  { %1999 = vmatpush3.bf16.msra.mxu1 %v2261_v36 }
 0x124   :  { %2000 = vmatprep.subr.bf16.mxu1 %v2262_v17 }
 0x127   :  { %2001 = vmatpush3.bf16.msra.mxu1 %v2263_v46 }
 0x128   :  { %2002 = vmatprep.subr.bf16.mxu1 %v2264_v21 }
 0x12b   :  { %2003 = vmatpush3.bf16.msra.mxu1 %v2265_v42 }
 0x12c   :  { %2004 = vmatprep.subr.bf16.mxu1 %v2266_v13 }
 0x12f   :  { %2005 = vmatpush3.bf16.msra.mxu1 %v2267_v5 }
 0x130   :  { %2006 = vmatprep.subr.bf16.mxu1 %v2268_v23 }
 0x133   :  { %2007 = vmatpush3.bf16.msra.mxu1 %v2269_v27 }
 0x199   :  { %v1097_v41 = vpop.f32.mrb[0].mxu1 }
 0x19a   :  { %v1099_v31 = vpop.f32.mrb[1].mxu1 }
 0x19b   :  { %v1101_v38 = vpop.f32.mrb[2].mxu1 }
 0x19c   :  { %v1103_v55 = vpop.f32.mrb[3].mxu1 }
 0x1a1   :  { %v1107_v40 = vpop.f32.mrb[4].mxu1 }
 0x1a2   :  { %v1109_v16 = vpop.f32.mrb[5].mxu1 }
 0x1a3   :  { %v1111_v63 = vpop.f32.mrb[6].mxu1 }
 0x1a4   :  { %v1113_v28 = vpop.f32.mrb[7].mxu1 }
 0x1a9   :  { %v1117_v54 = vpop.f32.mrb[8].mxu1 }
 0x1aa   :  { %v1119_v49 = vpop.f32.mrb[9].mxu1 }
 0x1ab   :  { %v1121_v14 = vpop.f32.mrb[10].mxu1 }
 0x1ac   :  { %v2935_v56 = vpop.f32.mrb[11].mxu1 }
 0x1b1   :  { %v2937_v29 = vpop.f32.mrb[12].mxu1 }
 0x1b2   :  { %v2939_v30 = vpop.f32.mrb[13].mxu1 }
 0x1b3   :  { %v2941_v32 = vpop.f32.mrb[14].mxu1 }
 0x1b4   :  { %v2943_v22 = vpop.f32.mrb[15].mxu1 }
 0x1bb   :  { %v1323_v43 = vpop.f32.mrb[0].mxu0 }
 0x1bc   :  { %v2046_v19 = vadd.f32 %v1323_v43, %v1097_v41  ;;  %v1325_v35 = vpop.f32.mrb[1].mxu0 }
 0x1bd   :  { %v2047_v60 = vadd.f32 %v1325_v35, %v1099_v31  ;;  %v1327_v20 = vpop.f32.mrb[2].mxu0 }
 0x1be   :  { %v1406_v53 = vadd.f32 %v2046_v19, %v2945_v33  ;;  %v2048_v39 = vadd.f32 %v1327_v20, %v1101_v38  ;;  %v1329_v1 = vpop.f32.mrb[3].mxu0 }
 0x1bf   :  { %v1407_v62 = vadd.f32 %v2047_v60, %v2947_v45  ;;  %v2049_v0 = vadd.f32 %v1329_v1, %v1103_v55 }
 0x1c0   :  { %v1408_v3 = vadd.f32 %v2048_v39, %v2949_v44  ;;  %v1438_v57 = vmax.f32 %v1406_v53, 0.0 }
 0x1c1   :  { %v1409_v48 = vadd.f32 %v2049_v0, %v2952_v59  ;;  %v1439_v2 = vmax.f32 %v1407_v62, 0.0 }
 0x1c2   :  { %v1440_v24 = vmax.f32 %v1408_v3, 0.0 }
 0x1c3   :  { %v1441_v4 = vmax.f32 %v1409_v48, 0.0  ;;  %v1333_v51 = vpop.f32.mrb[4].mxu0 }
 0x1c4   :  { %v1470_v61 = vmax.f32 %v1438_v57, %v1440_v24  ;;  %v2050_v6 = vadd.f32 %v1333_v51, %v1107_v40  ;;  %v1335_v47 = vpop.f32.mrb[5].mxu0 }
 0x1c5   :  { %v1477_v7 = vmax.f32 %v1439_v2, %v1441_v4  ;;  %v2051_v18 = vadd.f32 %v1335_v47, %v1109_v16  ;;  %v1337_v8 = vpop.f32.mrb[6].mxu0 }
 0x1c6   :  { %v1471_v9 = vrot.slane %v1470_v61, 4  ;;  %v1410_v15 = vadd.f32 %v2050_v6, %v2945_v33  ;;  %v2052_v37 = vadd.f32 %v1337_v8, %v1111_v63  ;;  %v1339_v50 = vpop.f32.mrb[7].mxu0 }
 0x1c7   :  { %v1478_v10 = vrot.slane %v1477_v7, 4  ;;  %v1411_v25 = vadd.f32 %v2051_v18, %v2947_v45  ;;  %v2053_v12 = vadd.f32 %v1339_v50, %v1113_v28 }
 0x1c8   :  { %v1472_v26 = vmax.f32 %v1470_v61, %v1471_v9  ;;  %v1412_v58 = vadd.f32 %v2052_v37, %v2949_v44  ;;  %v1442_v36 = vmax.f32 %v1410_v15, 0.0 }
 0x1c9   :  { %v1479_v11 = vmax.f32 %v1477_v7, %v1478_v10  ;;  %v1413_v52 = vadd.f32 %v2053_v12, %v2952_v59  ;;  %v1443_v21 = vmax.f32 %v1411_v25, 0.0 }
 0x1ca   :  { %v1473_v34 = vrot.slane %v1472_v26, 2  ;;  %v1444_v17 = vmax.f32 %v1412_v58, 0.0 }
 0x1cb   :  { %v1480_v46 = vrot.slane %v1479_v11, 2  ;;  %v1445_v42 = vmax.f32 %v1413_v52, 0.0  ;;  %v1343_v13 = vpop.f32.mrb[8].mxu0 }
 0x1cc   :  { %v1474_v5 = vmax.f32 %v1472_v26, %v1473_v34  ;;  %v1484_v23 = vmax.f32 %v1442_v36, %v1444_v17  ;;  %v2054_v27 = vadd.f32 %v1343_v13, %v1117_v54  ;;  %v1345_v41 = vpop.f32.mrb[9].mxu0 }
 0x1cd   :  { %v1481_v31 = vmax.f32 %v1479_v11, %v1480_v46  ;;  %v1491_v38 = vmax.f32 %v1443_v21, %v1445_v42  ;;  %v2055_v55 = vadd.f32 %v1345_v41, %v1119_v49  ;;  %v1347_v40 = vpop.f32.mrb[10].mxu0 }
 0x1ce   :  { %v1475_v16 = vrot.slane %v1474_v5, 1  ;;  %v1485_v63 = vrot.slane %v1484_v23, 4  ;;  %v1414_v28 = vadd.f32 %v2054_v27, %v2945_v33  ;;  %v2056_v43 = vadd.f32 %v1347_v40, %v1121_v14  ;;  %v1349_v19 = vpop.f32.mrb[11].mxu0 }
 0x1cf   :  { %v1482_v35 = vrot.slane %v1481_v31, 1  ;;  %v1492_v60 = vrot.slane %v1491_v38, 4  ;;  %v1415_v20 = vadd.f32 %v2055_v55, %v2947_v45  ;;  %v2057_v53 = vadd.f32 %v1349_v19, %v2935_v56 }
 0x1d0   :  { %v1476_v39 = vmax.f32 %v1474_v5, %v1475_v16  ;;  %v1486_v1 = vmax.f32 %v1484_v23, %v1485_v63  ;;  %v1416_v54 = vadd.f32 %v2056_v43, %v2949_v44  ;;  %v1446_v48 = vmax.f32 %v1414_v28, 0.0 }
 0x1d1   :  { %v1483_v62 = vmax.f32 %v1481_v31, %v1482_v35  ;;  %v1493_v0 = vmax.f32 %v1491_v38, %v1492_v60  ;;  %v1417_v49 = vadd.f32 %v2057_v53, %v2952_v59  ;;  %v1447_v24 = vmax.f32 %v1415_v20, 0.0 }
 0x1d2   :  { %v1487_v3 = vrot.slane %v1486_v1, 2  ;;  %v1448_v57 = vmax.f32 %v1416_v54, 0.0  ;;  %v1582_v51 = vpack.c.bf16 %v1476_v39, %v1476_v39 }
 0x1d3   :  { %v1494_v14 = vrot.slane %v1493_v0, 2  ;;  %v1449_v2 = vmax.f32 %v1417_v49, 0.0  ;;  %v1353_v4 = vpop.f32.mrb[12].mxu0  ;;  %v1583_v7 = vpack.c.bf16 %v1483_v62, %v1483_v62 }
 0x1d4   :  { %v1488_v61 = vmax.f32 %v1486_v1, %v1487_v3  ;;  %v1498_v6 = vmax.f32 %v1446_v48, %v1448_v57  ;;  %v2058_v56 = vadd.f32 %v1353_v4, %v2937_v29  ;;  %v1355_v47 = vpop.f32.mrb[13].mxu0  ;;  %v1653_v52 = vunpack.c.l.b16 %v1582_v51 }
 0x1d5   :  { %v1495_v18 = vmax.f32 %v1493_v0, %v1494_v14  ;;  %v1505_v8 = vmax.f32 %v1447_v24, %v1449_v2  ;;  %v2059_v9 = vadd.f32 %v1355_v47, %v2939_v30  ;;  %v1357_v15 = vpop.f32.mrb[14].mxu0  ;;  %v1654_v30 = vunpack.c.l.b16 %v1583_v7 }
 0x1d6   :  { %v1489_v37 = vrot.slane %v1488_v61, 1  ;;  %v1499_v50 = vrot.slane %v1498_v6, 4  ;;  %v1418_v10 = vadd.f32 %v2058_v56, %v2945_v33  ;;  %v2060_v25 = vadd.f32 %v1357_v15, %v2941_v32  ;;  %v1359_v12 = vpop.f32.mrb[15].mxu0 }
 0x1d7   :  { %v1496_v26 = vrot.slane %v1495_v18, 1  ;;  %v1506_v58 = vrot.slane %v1505_v8, 4  ;;  %v1419_v11 = vadd.f32 %v2059_v9, %v2947_v45  ;;  %v2061_v29 = vadd.f32 %v1359_v12, %v2943_v22 }
 0x1d8   :  { %v1490_v34 = vmax.f32 %v1488_v61, %v1489_v37  ;;  %v1500_v36 = vmax.f32 %v1498_v6, %v1499_v50  ;;  %v1420_v17 = vadd.f32 %v2060_v25, %v2949_v44  ;;  %v1450_v32 = vmax.f32 %v1418_v10, 0.0 }
 0x1d9   :  { %v1497_v46 = vmax.f32 %v1495_v18, %v1496_v26  ;;  %v1507_v21 = vmax.f32 %v1505_v8, %v1506_v58  ;;  %v1421_v42 = vadd.f32 %v2061_v29, %v2952_v59  ;;  %v1451_v31 = vmax.f32 %v1419_v11, 0.0  ;;  %v1250_v55 = vpop.f32.mrb[16].mxu1 }
 0x1da   :  { %v1584_v13 = vpack.c.bf16 %v1490_v34, %v1490_v34  ;;  %v1501_v5 = vrot.slane %v1500_v36, 2  ;;  %v1452_v23 = vmax.f32 %v1420_v17, 0.0  ;;  %v1252_v43 = vpop.f32.mrb[17].mxu1 }
 0x1db   :  { %v1585_v27 = vpack.c.bf16 %v1497_v46, %v1497_v46  ;;  %v1508_v41 = vrot.slane %v1507_v21, 2  ;;  %v1453_v38 = vmax.f32 %v1421_v42, 0.0  ;;  %v1363_v22 = vpop.f32.mrb[16].mxu0  ;;  %v1254_v39 = vpop.f32.mrb[18].mxu1 }
 0x1dc   :  { %v1655_v40 = vunpack.c.l.b16 %v1584_v13  ;;  %v1502_v16 = vmax.f32 %v1500_v36, %v1501_v5  ;;  %v1512_v63 = vmax.f32 %v1450_v32, %v1452_v23  ;;  %v2062_v28 = vadd.f32 %v1363_v22, %v1250_v55  ;;  %v1365_v19 = vpop.f32.mrb[17].mxu0  ;;  %v1256_v3 = vpop.f32.mrb[19].mxu1 }
 0x1dd   :  { %v1656_v35 = vunpack.c.l.b16 %v1585_v27  ;;  %v1509_v60 = vmax.f32 %v1507_v21, %v1508_v41  ;;  %v1519_v20 = vmax.f32 %v1451_v31, %v1453_v38  ;;  %v2063_v53 = vadd.f32 %v1365_v19, %v1252_v43  ;;  %v1367_v1 = vpop.f32.mrb[18].mxu0 }
 0x1de   :  { %v1670_v54 = vsel %vm1669_vm9, %v1655_v40, %v1653_v52  ;;  %v1503_v62 = vrot.slane %v1502_v16, 1  ;;  %v1513_v0 = vrot.slane %v1512_v63, 4  ;;  %v1422_v49 = vadd.f32 %v2062_v28, %v2945_v33  ;;  %v1369_v48 = vpop.f32.mrb[19].mxu0 }
 0x1df   :  { %v1683_v57 = vsel %vm1669_vm9, %v1656_v35, %v1654_v30  ;;  %v1510_v14 = vrot.slane %v1509_v60, 1  ;;  %v1520_v24 = vrot.slane %v1519_v20, 4  ;;  %v1423_v2 = vadd.f32 %v2063_v53, %v2947_v45 }
 0x1e0   :  { %v1504_v4 = vmax.f32 %v1502_v16, %v1503_v62  ;;  %v1514_v51 = vmax.f32 %v1512_v63, %v1513_v0  ;;  %v2064_v61 = vadd.f32 %v1367_v1, %v1254_v39  ;;  %v2065_v47 = vadd.f32 %v1369_v48, %v1256_v3 }
 0x1e1   :  { %v1511_v6 = vmax.f32 %v1509_v60, %v1510_v14  ;;  %v1521_v56 = vmax.f32 %v1519_v20, %v1520_v24  ;;  %v1454_v8 = vmax.f32 %v1422_v49, 0.0  ;;  %v1455_v50 = vmax.f32 %v1423_v2, 0.0  ;;  %v1260_v25 = vpop.f32.mrb[20].mxu1 }
 0x1e2   :  { %v1586_v7 = vpack.c.bf16 %v1504_v4, %v1504_v4  ;;  %v1515_v18 = vrot.slane %v1514_v51, 2  ;;  %v1424_v9 = vadd.f32 %v2064_v61, %v2949_v44  ;;  %v1425_v10 = vadd.f32 %v2065_v47, %v2952_v59  ;;  %v1262_v52 = vpop.f32.mrb[21].mxu1 }
 0x1e3   :  { %v1587_v15 = vpack.c.bf16 %v1511_v6, %v1511_v6  ;;  %v1522_v37 = vrot.slane %v1521_v56, 2  ;;  %v1373_v12 = vpop.f32.mrb[20].mxu0  ;;  %v1264_v21 = vpop.f32.mrb[22].mxu1 }
 0x1e4   :  { %v1657_v26 = vunpack.c.l.b16 %v1586_v7  ;;  %v1516_v58 = vmax.f32 %v1514_v51, %v1515_v18  ;;  %v1456_v11 = vmax.f32 %v1424_v9, 0.0  ;;  %v2066_v29 = vadd.f32 %v1373_v12, %v1260_v25  ;;  %v1375_v34 = vpop.f32.mrb[21].mxu0  ;;  %v1266_v27 = vpop.f32.mrb[23].mxu1 }
 0x1e5   :  { %v1658_v36 = vunpack.c.l.b16 %v1587_v15  ;;  %v1523_v17 = vmax.f32 %v1521_v56, %v1522_v37  ;;  %v1457_v30 = vmax.f32 %v1425_v10, 0.0  ;;  %v2067_v46 = vadd.f32 %v1375_v34, %v1262_v52  ;;  %v1377_v42 = vpop.f32.mrb[22].mxu0 }
 0x1e6   :  { %v1672_v13 = vsel %vm1671_vm10, %v1657_v26, %v1670_v54  ;;  %v1517_v5 = vrot.slane %v1516_v58, 1  ;;  %v1526_v32 = vmax.f32 %v1454_v8, %v1456_v11  ;;  %v1426_v23 = vadd.f32 %v2066_v29, %v2945_v33  ;;  %v1379_v41 = vpop.f32.mrb[23].mxu0 }
 0x1e7   :  { %v1524_v31 = vrot.slane %v1523_v17, 1  ;;  %v1533_v38 = vmax.f32 %v1455_v50, %v1457_v30  ;;  %v1427_v55 = vadd.f32 %v2067_v46, %v2947_v45  ;;  %v2068_v22 = vadd.f32 %v1377_v42, %v1264_v21 }
 0x1e8   :  { %v1518_v40 = vmax.f32 %v1516_v58, %v1517_v5  ;;  %v1527_v16 = vrot.slane %v1526_v32, 4  ;;  %v2069_v63 = vadd.f32 %v1379_v41, %v1266_v27  ;;  %v1458_v19 = vmax.f32 %v1426_v23, 0.0 }
 0x1e9   :  { %v1525_v28 = vmax.f32 %v1523_v17, %v1524_v31  ;;  %v1534_v43 = vrot.slane %v1533_v38, 4  ;;  %v1428_v35 = vadd.f32 %v2068_v22, %v2949_v44  ;;  %v1684_v39 = vsel %vm1671_vm10, %v1658_v36, %v1683_v57  ;;  %v1270_v49 = vpop.f32.mrb[24].mxu1 }
 0x1ea   :  { %v1588_v60 = vpack.c.bf16 %v1518_v40, %v1518_v40  ;;  %v1528_v20 = vmax.f32 %v1526_v32, %v1527_v16  ;;  %v1429_v53 = vadd.f32 %v2069_v63, %v2952_v59  ;;  %v1459_v62 = vmax.f32 %v1427_v55, 0.0  ;;  %v1272_v4 = vpop.f32.mrb[25].mxu1 }
 0x1eb   :  { %v1589_v1 = vpack.c.bf16 %v1525_v28, %v1525_v28  ;;  %v1535_v54 = vmax.f32 %v1533_v38, %v1534_v43  ;;  %v1460_v0 = vmax.f32 %v1428_v35, 0.0  ;;  %v1383_v3 = vpop.f32.mrb[24].mxu0  ;;  %v1274_v7 = vpop.f32.mrb[26].mxu1 }
 0x1ec   :  { %v1659_v48 = vunpack.c.l.b16 %v1588_v60  ;;  %v1529_v14 = vrot.slane %v1528_v20, 2  ;;  %v1461_v24 = vmax.f32 %v1429_v53, 0.0  ;;  %v2070_v2 = vadd.f32 %v1383_v3, %v1270_v49  ;;  %v1385_v51 = vpop.f32.mrb[25].mxu0  ;;  %v1276_v37 = vpop.f32.mrb[27].mxu1 }
 0x1ed   :  { %v1660_v61 = vunpack.c.l.b16 %v1589_v1  ;;  %v1536_v6 = vrot.slane %v1535_v54, 2  ;;  %v1540_v56 = vmax.f32 %v1458_v19, %v1460_v0  ;;  %v2071_v47 = vadd.f32 %v1385_v51, %v1272_v4  ;;  %v1387_v18 = vpop.f32.mrb[26].mxu0 }
 0x1ee   :  { %v1530_v8 = vmax.f32 %v1528_v20, %v1529_v14  ;;  %v1547_v57 = vmax.f32 %v1459_v62, %v1461_v24  ;;  %v1430_v9 = vadd.f32 %v2070_v2, %v2945_v33  ;;  %v2072_v15 = vadd.f32 %v1387_v18, %v1274_v7  ;;  %v1389_v50 = vpop.f32.mrb[27].mxu0 }
 0x1ef   :  { %v1537_v10 = vmax.f32 %v1535_v54, %v1536_v6  ;;  %v1541_v25 = vrot.slane %v1540_v56, 4  ;;  %v1431_v12 = vadd.f32 %v2071_v47, %v2947_v45  ;;  %v2073_v26 = vadd.f32 %v1389_v50, %v1276_v37 }
 0x1f0   :  { %v1531_v58 = vrot.slane %v1530_v8, 1  ;;  %v1548_v11 = vrot.slane %v1547_v57, 4  ;;  %v1462_v29 = vmax.f32 %v1430_v9, 0.0  ;;  %v1432_v52 = vadd.f32 %v2072_v15, %v2949_v44 }
 0x1f1   :  { %v1538_v34 = vrot.slane %v1537_v10, 1  ;;  %v1542_v36 = vmax.f32 %v1540_v56, %v1541_v25  ;;  %v1463_v17 = vmax.f32 %v1431_v12, 0.0  ;;  %v1433_v30 = vadd.f32 %v2073_v26, %v2952_v59  ;;  %v1280_v41 = vpop.f32.mrb[28].mxu1 }
 0x1f2   :  { %v1532_v46 = vmax.f32 %v1530_v8, %v1531_v58  ;;  %v1549_v21 = vmax.f32 %v1547_v57, %v1548_v11  ;;  %v1464_v42 = vmax.f32 %v1432_v52, 0.0  ;;  %v1674_v5 = vsel %vm1673_vm11, %v1659_v48, %v1672_v13  ;;  %v1282_v63 = vpop.f32.mrb[29].mxu1 }
 0x1f3   :  { %v1539_v32 = vmax.f32 %v1537_v10, %v1538_v34  ;;  %v1543_v23 = vrot.slane %v1542_v36, 2  ;;  %v1465_v27 = vmax.f32 %v1433_v30, 0.0  ;;  %v1393_v31 = vpop.f32.mrb[28].mxu0  ;;  %v1685_v38 = vsel %vm1673_vm11, %v1660_v61, %v1684_v39  ;;  %v1284_v20 = vpop.f32.mrb[30].mxu1 }
 0x1f4   :  { %v1590_v55 = vpack.c.bf16 %v1532_v46, %v1532_v46  ;;  %v1550_v22 = vrot.slane %v1549_v21, 2  ;;  %v1554_v40 = vmax.f32 %v1462_v29, %v1464_v42  ;;  %v2074_v16 = vadd.f32 %v1393_v31, %v1280_v41  ;;  %v1395_v28 = vpop.f32.mrb[29].mxu0  ;;  %v1286_v62 = vpop.f32.mrb[31].mxu1 }
 0x1f5   :  { %v1591_v43 = vpack.c.bf16 %v1539_v32, %v1539_v32  ;;  %v1544_v19 = vmax.f32 %v1542_v36, %v1543_v23  ;;  %v1561_v35 = vmax.f32 %v1463_v17, %v1465_v27  ;;  %v2075_v60 = vadd.f32 %v1395_v28, %v1282_v63  ;;  %v1397_v53 = vpop.f32.mrb[30].mxu0 }
 0x1f6   :  { %v1661_v13 = vunpack.c.l.b16 %v1590_v55  ;;  %v1551_v1 = vmax.f32 %v1549_v21, %v1550_v22  ;;  %v1555_v54 = vrot.slane %v1554_v40, 4  ;;  %v1399_v0 = vpop.f32.mrb[31].mxu0  ;;  %v1434_v24 = vadd.f32 %v2074_v16, %v2945_v33 }
 0x1f7   :  { %v1662_v49 = vunpack.c.l.b16 %v1591_v43  ;;  %v1545_v39 = vrot.slane %v1544_v19, 1  ;;  %v1562_v3 = vrot.slane %v1561_v35, 4  ;;  %v2076_v2 = vadd.f32 %v1397_v53, %v1284_v20 }
 0x1f8   :  { %v1552_v48 = vrot.slane %v1551_v1, 1  ;;  %v1556_v14 = vmax.f32 %v1554_v40, %v1555_v54  ;;  %v1435_v61 = vadd.f32 %v2075_v60, %v2947_v45  ;;  %v2077_v6 = vadd.f32 %v1399_v0, %v1286_v62 }
 0x1f9   :  { %v1546_v4 = vmax.f32 %v1544_v19, %v1545_v39  ;;  %v1563_v51 = vmax.f32 %v1561_v35, %v1562_v3  ;;  %v1436_v7 = vadd.f32 %v2076_v2, %v2949_v44  ;;  %v1676_v18 = vsel %vm1675_vm12, %v1661_v13, %v1674_v5 }
 0x1fa   :  { %v1553_v56 = vmax.f32 %v1551_v1, %v1552_v48  ;;  %v1557_v47 = vrot.slane %v1556_v14, 2  ;;  %v1437_v9 = vadd.f32 %v2077_v6, %v2952_v59  ;;  %v1686_v15 = vsel %vm1675_vm12, %v1662_v49, %v1685_v38  ;;  %v1975_v49 = vld [vmem:[#allocation13] ss:$0 sm:$0xff] }
 0x1fb   :  { %v1592_v8 = vpack.c.bf16 %v1546_v4, %v1546_v4  ;;  %v1564_v57 = vrot.slane %v1563_v51, 2  ;;  %v1466_v50 = vmax.f32 %v1434_v24, 0.0  ;;  %v1468_v10 = vmax.f32 %v1436_v7, 0.0 }
 0x1fc   :  { %v1593_v37 = vpack.c.bf16 %v1553_v56, %v1553_v56  ;;  %v1558_v33 = vmax.f32 %v1556_v14, %v1557_v47  ;;  %v1467_v45 = vmax.f32 %v1435_v61, 0.0  ;;  %v1469_v26 = vmax.f32 %v1437_v9, 0.0 }
 0x1fd   :  { %v1663_v25 = vunpack.c.l.b16 %v1592_v8  ;;  %v1565_v12 = vmax.f32 %v1563_v51, %v1564_v57  ;;  %v1568_v29 = vmax.f32 %v1466_v50, %v1468_v10 }
 0x1fe   :  { %v1664_v58 = vunpack.c.l.b16 %v1593_v37  ;;  %v1559_v11 = vrot.slane %v1558_v33, 1  ;;  %v1575_v52 = vmax.f32 %v1467_v45, %v1469_v26 }
 0x1ff   :  { %v1566_v44 = vrot.slane %v1565_v12, 1  ;;  %v1678_v34 = vsel %vm1677_vm13, %v1663_v25, %v1676_v18  ;;  %v1569_v17 = vrot.slane %v1568_v29, 4 }
 0x200   :  { %v1560_v36 = vmax.f32 %v1558_v33, %v1559_v11  ;;  %v1687_v59 = vsel %vm1677_vm13, %v1664_v58, %v1686_v15  ;;  %v1576_v46 = vrot.slane %v1575_v52, 4 }
 0x201   :  { %v1567_v30 = vmax.f32 %v1565_v12, %v1566_v44  ;;  %v1570_v42 = vmax.f32 %v1568_v29, %v1569_v17 }
 0x202   :  { %v1594_v21 = vpack.c.bf16 %v1560_v36, %v1560_v36  ;;  %v1577_v5 = vmax.f32 %v1575_v52, %v1576_v46 }
 0x203   :  { %v1595_v32 = vpack.c.bf16 %v1567_v30, %v1567_v30  ;;  %v1571_v27 = vrot.slane %v1570_v42, 2 }
 0x204   :  { %v1665_v23 = vunpack.c.l.b16 %v1594_v21  ;;  %v1578_v41 = vrot.slane %v1577_v5, 2 }
 0x205   :  { %v1666_v31 = vunpack.c.l.b16 %v1595_v32  ;;  %v1572_v38 = vmax.f32 %v1570_v42, %v1571_v27 }
 0x206   :  { %v1680_v55 = vsel %vm1679_vm14, %v1665_v23, %v1678_v34  ;;  %v1579_v22 = vmax.f32 %v1577_v5, %v1578_v41 }
 0x207   :  { %v1688_v40 = vsel %vm1679_vm14, %v1666_v31, %v1687_v59  ;;  %v1573_v16 = vrot.slane %v1572_v38, 1 }
 0x208   :  { %v1580_v63 = vrot.slane %v1579_v22, 1 }
 0x209   :  { %v1574_v28 = vmax.f32 %v1572_v38, %v1573_v16 }
 0x20a   :  { %v1581_v43 = vmax.f32 %v1579_v22, %v1580_v63 }
 0x20b   :  { %v1596_v19 = vpack.c.bf16 %v1574_v28, %v1574_v28 }
 0x20c   :  { %v1597_v35 = vpack.c.bf16 %v1581_v43, %v1581_v43 }
 0x20d   :  { %v1667_v60 = vunpack.c.l.b16 %v1596_v19 }
 0x20e   :  { %v1668_v20 = vunpack.c.l.b16 %v1597_v35 }
 0x20f   :  { %v1682_v53 = vsel %vm1681_vm15, %v1667_v60, %v1680_v55 }
 0x210   :  { %v1689_v13 = vsel %vm1681_vm15, %v1668_v20, %v1688_v40  ;;  %v1690_v54 = vpack.c.b16 %v1682_v53, %v1682_v53 }
 0x211   :  { %v1691_v1 = vpack.c.b16 %v1689_v13, %v1689_v13 }
 0x213   :  { %1822 = vmatprep.mubr.bf16.mxu1 %v1691_v1 }
 0x214   :  { %1823 = vmatmul.mubr.bf16.vlgmr.msra.gmra.mrb[32].mxu1 %v1690_v54 }
 0x2e7   :  { %v2008_v62 = vpop.f32.mrb[32].mxu1 }
 0x2e8   :  { %v2009_v0 = vpop.f32.mrb[33].mxu1 }
 0x2e9   :  { %v2010_v39 = vadd.f32 %v2009_v0, %v2008_v62  ;;  %v2011_v3 = vpop.f32.mrb[34].mxu1 }
 0x2ea   :  { %v2012_v48 = vpop.f32.mrb[35].mxu1 }
 0x2eb   :  { %v1825_v14 = vadd.f32 %v2010_v39, %v1975_v49 }
 0x2ed   :  { %1830 = vmax.xlane.f32.xlu0 %v1825_v14 }
 0x37a   :  { %v1831_v24 = vpop.xlane.xlu0 %1830 }
 0x37b   :  { %v1832_v2 = vsub.f32 %v1825_v14, %v1831_v24 }
 0x37d   :  { %v1833_v4 = vmul.f32 1.442695, %v1832_v2 }
 0x37f   :  { %2270 = vpow2.f32 %v1833_v4 }
 0x389   :  { %v2271_v51 = vpop.eup %2270 }
 0x38a   :  { %1835 = vadd.xlane.f32.xlu0 %v2271_v51 }
 0x417   :  { %v1836_v61 = vpop.xlane.xlu0 %1835 }
 0x418   :  { %2272 = vrcp.f32 %v1836_v61 }
 0x422   :  { %v2273_v6 = vpop.eup %2272 }
 0x423   :  { %v1838_v56 = vmul.f32 %v2273_v6, %v2271_v51 }
 0x425   :  { %1839 = vst [vmem:[#allocation14] sm:$0xff] %v1838_v56 }
 0x426   :  { %2405 = shalt.err (!%p2402_p6)
}
 0x427   :  { %s2406_s16 = scalar_lea.hbm %s3018_s6, 128 }
 0x428   :  { %p2407_p7 = scmp.ne.s32.totalorder %s3018_s6, %s2406_s16  ;;  %p2410_p8 = scmp.lt.u32.totalorder %s2406_s16, %s3018_s6 }
 0x42a   :  { %p2412_p9 = pnand %p2410_p8, %p2407_p7 }
 0x42c   :  { %2415 = shalt.err (!%p2412_p9)
}
 0x42d   :  { %1849 = dma.vmem_to_hbm [thread:$0]  %s1847_s13, 128, %s3018_s6, [#allocation7]  }
 0x42e   :  { %2428 = dma.done.wait [#allocation7], 128  }
 0x42f   :  { %2429 = vsyncadd [#allocation7], 4294967168 }
 0x430   :  { %1853 = vsyncpa [#allocation6], 1 }
 0x431   :  { %1854 = vsyncpa [#allocation9], 1 }
 0x432   :  { %1855 = vsyncpa [#allocation12], 1 }
 0x433   :  { %1856 = vsyncpa [#allocation7], 1 }

// kernel: tpu_custom_call.1
= control target key start
LH: loop header
LB: loop body
LE: loop exit
PB: predicated region body
PF: predicated region fallthrough
CT: control target
= control target key end

     0   :  { %s3012_s0 = inlined_call_operand.hbm [shape: s32[128], index: 0, kind: input, shape index: {}]   ;;  %s3013_s1 = inlined_call_operand.hbm [shape: f32[50,1,128], index: 1, kind: input, shape index: {}]   ;;  %s3014_s2 = inlined_call_operand.hbm [shape: bf16[640,256], index: 2, kind: input, shape index: {}]   ;;  %s3015_s3 = inlined_call_operand.hbm [shape: f32[16,256], index: 3, kind: input, shape index: {}]   ;;  %s3016_s4 = inlined_call_operand.hbm [shape: bf16[256,128], index: 4, kind: input, shape index: {}]   ;;  %s3017_s5 = inlined_call_operand.hbm [shape: f32[1,128], index: 5, kind: input, shape index: {}]   ;;  %s3018_s6 = inlined_call_operand.hbm [shape: f32[8,128], index: 6, kind: output, shape index: {}]  }
   0x1   :  { %s2274_s23 = scalar_lea.hbm %s3012_s0, 16 }
   0x2   :  { %p2275_p0 = scmp.ne.s32.totalorder %s3012_s0, %s2274_s23  ;;  %p2278_p1 = scmp.lt.u32.totalorder %s2274_s23, %s3012_s0 }
   0x4   :  { %p2280_p2 = pnand %p2278_p1, %p2275_p0 }
   0x6   :  { %2283 = shalt.err (!%p2280_p2)  }
   0x7   :  { %s2434_s28 = smov [#allocation4]  }
   0x8   :  { %12 = dma.hbm_to_smem %s3012_s0, 16, %s2434_s28, [#allocation3] }
   0x9   :  { %2420 = dma.done.wait [#allocation3], 16 }
   0xa   :  { %2421 = vsyncadd [#allocation3], 4294967280 }
   0xb   :  { %14 = sfence }
   0xc   :  { %15 = vsyncpa [#allocation6], 0 }
   0xd   :  { %16 = vsyncpa [#allocation9], 0 }
   0xe   :  { %17 = vsyncpa [#allocation12], 0 }
   0xf   :  { %18 = vsyncpa [#allocation7], 0  ;;  %s2435_s7 = smov [#allocation8]   ;;  %s2284_s11 = scalar_lea.hbm %s3014_s2, 10240 }
  0x10   :  { %s36_s8 = sshll.u32 %s2435_s7, 4  ;;  %p2285_p3 = scmp.ne.s32.totalorder %s3014_s2, %s2284_s11  ;;  %s37_s8 = int_to_ptr.vmem [resolvable:$true] %s36_s8 }
  0x11   :  { %p2288_p4 = scmp.lt.u32.totalorder %s2284_s11, %s3014_s2 }
  0x13   :  { %p2290_p5 = pnand %p2288_p4, %p2285_p3 }
  0x15   :  { %2293 = shalt.err (!%p2290_p5)
}
  0x16   :  { %s2294_s15 = scalar_lea.vmem %s37_s8, 10240  ;;  %p2299_p7 = scmp.lt.s32.totalorder %s37_s8, %s37_s8 }
  0x17   :  { %p2295_p6 = scmp.ne.s32.totalorder %s37_s8, %s2294_s15  ;;  %p2300_p8 = scmp.lt.s32.totalorder %s2294_s15, %s2294_s15 }
  0x19   :  { %p2301_p9 = por %p2300_p8, %p2299_p7 }
  0x1b   :  { %p2302_p10 = pnand %p2301_p9, %p2295_p6 }
  0x1d   :  { %2305 = shalt.err (!%p2302_p10)
}
  0x1e   :  { %s2436_s16 = smov 128   ;;  %s2437_s17 = smov 8  }
  0x1f   :  { %42 = dma.hbm_to_vmem [thread:$0]  %s3014_s2, 10240, %s37_s8, [#allocation9], %s2436_s16, %s2436_s16, %s2437_s17  }
  0x20   :  { %s2438_s20 = smov [#allocation11]   ;;  %s2306_s24 = scalar_lea.hbm %s3016_s4, 2048 }
  0x21   :  { %s60_s21 = sshll.u32 %s2438_s20, 4  ;;  %p2307_p11 = scmp.ne.s32.totalorder %s3016_s4, %s2306_s24  ;;  %s61_s21 = int_to_ptr.vmem [resolvable:$true] %s60_s21 }
  0x22   :  { %p2310_p12 = scmp.lt.u32.totalorder %s2306_s24, %s3016_s4 }
  0x24   :  { %p2312_p13 = pnand %p2310_p12, %p2307_p11 }
  0x26   :  { %2315 = shalt.err (!%p2312_p13)
}
  0x27   :  { %s2316_s29 = scalar_lea.vmem %s61_s21, 2048  ;;  %p2321_p1 = scmp.lt.s32.totalorder %s61_s21, %s61_s21 }
  0x28   :  { %p2317_p0 = scmp.ne.s32.totalorder %s61_s21, %s2316_s29  ;;  %p2322_p2 = scmp.lt.s32.totalorder %s2316_s29, %s2316_s29 }
  0x2a   :  { %p2323_p3 = por %p2322_p2, %p2321_p1 }
  0x2c   :  { %p2324_p4 = pnand %p2323_p3, %p2317_p0 }
  0x2e   :  { %2327 = shalt.err (!%p2324_p4)
}
  0x2f   :  { %s2439_s2 = smov 64   ;;  %s2440_s30 = smov 4  }
  0x30   :  { %66 = dma.hbm_to_vmem [thread:$0]  %s3016_s4, 2048, %s61_s21, [#allocation12], %s2439_s2, %s2439_s2, %s2440_s30  }
  0x31   :  { %s2441_s9 = smov [#allocation5]   ;;  %s2328_s13 = scalar_lea.hbm %s3013_s1, 800 }
  0x32   :  { %s24_s10 = sshll.u32 %s2441_s9, 4  ;;  %p2329_p5 = scmp.ne.s32.totalorder %s3013_s1, %s2328_s13  ;;  %s25_s10 = int_to_ptr.vmem [resolvable:$true] %s24_s10 }
  0x33   :  { %p2332_p6 = scmp.lt.u32.totalorder %s2328_s13, %s3013_s1 }
  0x35   :  { %p2334_p7 = pnand %p2332_p6, %p2329_p5 }
  0x37   :  { %2337 = shalt.err (!%p2334_p7)
}
  0x38   :  { %s2338_s17 = scalar_lea.vmem %s25_s10, 800  ;;  %p2343_p9 = scmp.lt.s32.totalorder %s25_s10, %s25_s10 }
  0x39   :  { %p2339_p8 = scmp.ne.s32.totalorder %s25_s10, %s2338_s17  ;;  %p2344_p10 = scmp.lt.s32.totalorder %s2338_s17, %s2338_s17 }
  0x3b   :  { %p2345_p11 = por %p2344_p10, %p2343_p9 }
  0x3d   :  { %p2346_p12 = pnand %p2345_p11, %p2339_p8 }
  0x3f   :  { %2349 = shalt.err (!%p2346_p12)
}
  0x40   :  { %s2442_s4 = smov 16   ;;  %s2443_s18 = smov 1  }
  0x41   :  { %30 = dma.hbm_to_vmem [thread:$0]  %s3013_s1, 800, %s25_s10, [#allocation6], %s2442_s4, %s2442_s4, %s2443_s18  }
  0x42   :  { %s2444_s21 = smov [#allocation10]   ;;  %s2350_s25 = scalar_lea.hbm %s3015_s3, 512 }
  0x43   :  { %s48_s22 = sshll.u32 %s2444_s21, 4  ;;  %p2351_p13 = scmp.ne.s32.totalorder %s3015_s3, %s2350_s25  ;;  %s49_s22 = int_to_ptr.vmem [resolvable:$true] %s48_s22 }
  0x44   :  { %p2354_p0 = scmp.lt.u32.totalorder %s2350_s25, %s3015_s3 }
  0x46   :  { %p2356_p1 = pnand %p2354_p0, %p2351_p13 }
  0x48   :  { %2359 = shalt.err (!%p2356_p1)
}
  0x49   :  { %s2360_s2 = scalar_lea.vmem %s49_s22, 512  ;;  %p2365_p3 = scmp.lt.s32.totalorder %s49_s22, %s49_s22 }
  0x4a   :  { %p2361_p2 = scmp.ne.s32.totalorder %s49_s22, %s2360_s2  ;;  %p2366_p4 = scmp.lt.s32.totalorder %s2360_s2, %s2360_s2 }
  0x4c   :  { %p2367_p5 = por %p2366_p4, %p2365_p3 }
  0x4e   :  { %p2368_p6 = pnand %p2367_p5, %p2361_p2 }
  0x50   :  { %2371 = shalt.err (!%p2368_p6)
}
  0x51   :  { %s2445_s1 = smov 256   ;;  %s2446_s8 = smov [#allocation13]  }
  0x52   :  { %54 = dma.hbm_to_vmem [thread:$0]  %s3015_s3, 512, %s49_s22, [#allocation9], %s2445_s1, %s2445_s1, %s2442_s4  }
  0x53   :  { %s73_s9 = sshll.u32 %s2446_s8, 4  ;;  %s2372_s12 = scalar_lea.hbm %s3017_s5, 16  ;;  %s74_s9 = int_to_ptr.vmem [resolvable:$true] %s73_s9 }
  0x54   :  { %p2373_p7 = scmp.ne.s32.totalorder %s3017_s5, %s2372_s12  ;;  %p2376_p8 = scmp.lt.u32.totalorder %s2372_s12, %s3017_s5 }
  0x56   :  { %p2378_p9 = pnand %p2376_p8, %p2373_p7 }
  0x58   :  { %2381 = shalt.err (!%p2378_p9)
}
  0x59   :  { %s2382_s16 = scalar_lea.vmem %s74_s9, 16  ;;  %s2386_s3 = scalar_lea.vmem %s74_s9, 32 }
  0x5a   :  { %p2383_p10 = scmp.ne.s32.totalorder %s74_s9, %s2382_s16  ;;  %p2387_p11 = scmp.lt.s32.totalorder %s74_s9, %s74_s9 }
  0x5b   :  { %p2388_p12 = scmp.lt.s32.totalorder %s2386_s3, %s2382_s16 }
  0x5d   :  { %p2389_p13 = por %p2388_p12, %p2387_p11 }
  0x5f   :  { %p2390_p0 = pnand %p2389_p13, %p2383_p10 }
  0x61   :  { %2393 = shalt.err (!%p2390_p0)
}
  0x62   :  { %76 = dma.hbm_to_vmem [thread:$0]  %s3017_s5, 16, %s74_s9, [#allocation12]  }
  0x63   :  { %2422 = dma.done.wait [#allocation6], 800  }
  0x64   :  { %2423 = vsyncadd [#allocation6], 4294966496 }
  0x65   :  { %2424 = dma.done.wait [#allocation9], 10752  }
  0x66   :  { %2425 = vsyncadd [#allocation9], 4294956544 }
  0x67   :  { %2426 = dma.done.wait [#allocation12], 2064  }
  0x68   :  { %2427 = vsyncadd [#allocation12], 4294965232  ;;  %s2557_s18 = smov 0  }
  0x69 LB: > { %s2563_s19 = sshll.u32 %s2432_s18, 4  ;;  %s270_s5 = smul.u32 24, %s2432_s18  ;;  %vm249_vm0 = vcmask 1040384   ;;  %vm251_vm1 = vcmask 1041408   ;;  %vm253_vm2 = vcmask 1042432   ;;  %vm255_vm3 = vcmask 1043456   ;;  %s2432_s18 = sphi %s2557_s18, %s99_s18  }
  0x6a   : > { %s102_s20 = sld [smem:[#allocation4 + %s2563_s19]]  ;;  %s105_s21 = sadd.s32 1, %s2563_s19  ;;  %vm257_vm4 = vcmask 1044480   ;;  %v2447_v6 = vmov 0.0   ;;  %vm259_vm5 = vcmask 1045504   ;;  %vm261_vm6 = vcmask 1046528  }
  0x6b   : > { %s106_s22 = sld [smem:[#allocation4 + %s105_s21]]  ;;  %s109_s23 = sadd.s32 2, %s2563_s19 }
  0x6c   : > { %s110_s24 = sld [smem:[#allocation4 + %s109_s23]]  ;;  %s113_s25 = sadd.s32 3, %s2563_s19 }
  0x6d   : > { %s114_s26 = sld [smem:[#allocation4 + %s113_s25]]  ;;  %s117_s27 = sadd.s32 4, %s2563_s19 }
  0x6e   : > { %s118_s28 = sld [smem:[#allocation4 + %s117_s27]]  ;;  %s121_s29 = sadd.s32 5, %s2563_s19 }
  0x6f   : > { %s2572_s2 = sld [smem:[#allocation4 + %s121_s29]]  ;;  %s125_s1 = sadd.s32 6, %s2563_s19 }
  0x70   : > { %s2575_s30 = sld [smem:[#allocation4 + %s125_s1]]  ;;  %s103_s7 = scalar_lea.vmem [#allocation5], %s102_s20 }
  0x71   : > { %v104_v0 = vld [vmem:[%s103_s7] sm:$0x1]  ;;  %s129_s8 = sadd.s32 7, %s2563_s19  ;;  %s107_s9 = scalar_lea.vmem [#allocation5], %s106_s22 }
  0x72   : > { %v1881_v1 = vld [vmem:[%s107_s9] ss:$0 sm:$0xff]  ;;  %s2578_s10 = sld [smem:[#allocation4 + %s129_s8]]  ;;  %s111_s11 = scalar_lea.vmem [#allocation5], %s110_s24 }
  0x73   : > { %v1882_v2 = vld [vmem:[%s111_s11] ss:$0 sm:$0xff]  ;;  %v250_v3 = vsel %vm249_vm0, %v104_v0, %v1881_v1  ;;  %s115_s12 = scalar_lea.vmem [#allocation5], %s114_s26  ;;  %s133_s13 = sadd.s32 8, %s2563_s19 }
  0x74   : > { %v1883_v4 = vld [vmem:[%s115_s12] ss:$0 sm:$0xff]  ;;  %v252_v5 = vsel %vm251_vm1, %v250_v3, %v1882_v2  ;;  %s2585_s14 = scalar_lea.vmem [#allocation2], %s270_s5  ;;  %s119_s0 = scalar_lea.vmem [#allocation5], %s118_s28 }
  0x75   : > { %274 = vst [vmem:[%s2585_s14 + $0x10] sm:$0xf] %v2447_v6  ;;  %v1884_v7 = vld [vmem:[%s119_s0] ss:$0 sm:$0xff]  ;;  %v254_v8 = vsel %vm253_vm2, %v252_v5, %v1883_v4  ;;  %s134_s15 = sld [smem:[#allocation4 + %s133_s13]]  ;;  %s123_s16 = scalar_lea.vmem [#allocation5], %s2572_s2 }
  0x76   : > { %v1885_v9 = vld [vmem:[%s123_s16] ss:$0 sm:$0xff]  ;;  %v256_v10 = vsel %vm255_vm3, %v254_v8, %v1884_v7  ;;  %s137_s3 = sadd.s32 9, %s2563_s19  ;;  %s127_s17 = scalar_lea.vmem [#allocation5], %s2575_s30 }
  0x77   : > { %v1886_v11 = vld [vmem:[%s127_s17] ss:$0 sm:$0xff]  ;;  %v258_v12 = vsel %vm257_vm4, %v256_v10, %v1885_v9  ;;  %s138_s4 = sld [smem:[#allocation4 + %s137_s3]]  ;;  %s141_s5 = sadd.s32 10, %s2563_s19 }
  0x78   : > { %v260_v13 = vsel %vm259_vm5, %v258_v12, %v1886_v11  ;;  %s142_s20 = sld [smem:[#allocation4 + %s141_s5]]  ;;  %s131_s21 = scalar_lea.vmem [#allocation5], %s2578_s10 }
  0x79   : > { %v1887_v14 = vld [vmem:[%s131_s21] ss:$0 sm:$0xff]  ;;  %s145_s22 = sadd.s32 11, %s2563_s19  ;;  %s149_s23 = sadd.s32 12, %s2563_s19 }
  0x7a   : > { %v262_v15 = vsel %vm261_vm6, %v260_v13, %v1887_v14  ;;  %s146_s24 = sld [smem:[#allocation4 + %s145_s22]]  ;;  %s153_s26 = sadd.s32 13, %s2563_s19 }
  0x7b   : > { %s150_s25 = sld [smem:[#allocation4 + %s149_s23]]  ;;  %272 = vst [vmem:[%s2585_s14] sm:$0xff] %v262_v15  ;;  %s135_s27 = scalar_lea.vmem [#allocation5], %s134_s15 }
  0x7c   : > { %v136_v16 = vld [vmem:[%s135_s27] sm:$0x1]  ;;  %s154_s28 = sld [smem:[#allocation4 + %s153_s26]]  ;;  %s157_s29 = sadd.s32 14, %s2563_s19 }
  0x7d   : > { %s158_s2 = sld [smem:[#allocation4 + %s157_s29]]  ;;  %s139_s1 = scalar_lea.vmem [#allocation5], %s138_s4 }
  0x7e   : > { %v1888_v17 = vld [vmem:[%s139_s1] ss:$0 sm:$0xff]  ;;  %s161_s30 = sadd.s32 15, %s2563_s19  ;;  %s143_s7 = scalar_lea.vmem [#allocation5], %s142_s20 }
  0x7f   : > { %v1889_v18 = vld [vmem:[%s143_s7] ss:$0 sm:$0xff]  ;;  %s162_s8 = sld [smem:[#allocation4 + %s161_s30]]  ;;  %v263_v19 = vsel %vm249_vm0, %v136_v16, %v1888_v17  ;;  %s99_s18 = sadd.s32 1, %s2432_s18  }
  0x80   : > { %v264_v20 = vsel %vm251_vm1, %v263_v19, %v1889_v18  ;;  %s147_s9 = scalar_lea.vmem [#allocation5], %s146_s24  ;;  %p96_p1 = scmp.ge.s32.totalorder %s99_s18, 8  }
  0x81   : > { %v1890_v21 = vld [vmem:[%s147_s9] ss:$0 sm:$0xff]  ;;  %s151_s10 = scalar_lea.vmem [#allocation5], %s150_s25  ;;  %v2138_v33 = vld [vmem:[#allocation8] ss:$8 sps:$4 sm:$0xff] (%p96_p1)   ;;  %vm1669_vm9 = vcmask (%p96_p1), 1041409  }
  0x82   : > { %v1891_v22 = vld [vmem:[%s151_s10] ss:$0 sm:$0xff]  ;;  %v265_v23 = vsel %vm253_vm2, %v264_v20, %v1890_v21  ;;  %s155_s11 = scalar_lea.vmem [#allocation5], %s154_s28  ;;  %98 = sbr.rel (!%p96_p1) target bundleno = 105 (0x69), region = 84  ;;  %v2617_v34 = vld [vmem:[#allocation8 + $0x100] ss:$8 sps:$4 sm:$0xff] (%p96_p1)  }
  0x83   : > { %v1892_v24 = vld [vmem:[%s155_s11] ss:$0 sm:$0xff]  ;;  %v266_v25 = vsel %vm255_vm3, %v265_v23, %v1891_v22  ;;  %s159_s12 = scalar_lea.vmem [#allocation5], %s158_s2  ;;  %v2140_v35 = vld [vmem:[#allocation8 + $0x14] ss:$8 sps:$4 sm:$0xff] (%p96_p1)   ;;  %vm1671_vm10 = vcmask (%p96_p1), 1042434  }
  0x84   : > { %v1893_v26 = vld [vmem:[%s159_s12] ss:$0 sm:$0xff]  ;;  %v267_v27 = vsel %vm257_vm4, %v266_v25, %v1892_v24  ;;  %v2621_v36 = vld [vmem:[#allocation8 + $0x114] ss:$8 sps:$4 sm:$0xff] (%p96_p1)   ;;  %v2144_v37 = vld [vmem:[#allocation8 + $0x10] ss:$8 sps:$4 sm:$0xff] (%p96_p1)  }
  0x85   : > { %v268_v28 = vsel %vm259_vm5, %v267_v27, %v1893_v26  ;;  %s163_s19 = scalar_lea.vmem [#allocation5], %s162_s8  ;;  %v2134_v31 = vld [vmem:[#allocation8 + $0x4] ss:$8 sps:$4 sm:$0xff] (%p96_p1)   ;;  %v2623_v38 = vld [vmem:[#allocation8 + $0x110] ss:$8 sps:$4 sm:$0xff] (%p96_p1)   ;;  %vm1673_vm11 = vcmask (%p96_p1), 1043459  }
  0x86   : > { %v1894_v29 = vld [vmem:[%s163_s19] ss:$0 sm:$0xff]  ;;  %1063 = vmatprep.subr.bf16.mxu1 (%p96_p1), %v2134_v31  ;;  %v2150_v41 = vld [vmem:[#allocation8 + $0x20] ss:$8 sps:$4 sm:$0xff] (%p96_p1)   ;;  %v2152_v43 = vld [vmem:[#allocation8 + $0x34] ss:$8 sps:$4 sm:$0xff] (%p96_p1)  }
  0x87   : > { %v269_v30 = vsel %vm261_vm6, %v268_v28, %v1894_v29  ;;  %v2615_v32 = vld [vmem:[#allocation8 + $0x104] ss:$8 sps:$4 sm:$0xff] (%p96_p1)   ;;  %1064 = vmatpush1.bf16.msra.mxu1 (%p96_p1), %v2138_v33  ;;  %v2628_v42 = vld [vmem:[#allocation8 + $0x120] ss:$8 sps:$4 sm:$0xff] (%p96_p1)   ;;  %v2632_v44 = vld [vmem:[#allocation8 + $0x134] ss:$8 sps:$4 sm:$0xff] (%p96_p1)  }
  0x88   : > { %273 = vst [vmem:[%s2585_s14 + $0x8] sm:$0xff] %v269_v30  ;;  %1176 = vmatprep.subr.bf16.mxu0 (%p96_p1), %v2615_v32  ;;  %1065 = vmatprep.subr.bf16.mxu1 (%p96_p1), %v2140_v35  ;;  %v2146_v39 = vld [vmem:[#allocation8 + $0x24] ss:$8 sps:$4 sm:$0xff] (%p96_p1)   ;;  %v2156_v45 = vld [vmem:[#allocation8 + $0x30] ss:$8 sps:$4 sm:$0xff] (%p96_p1)   ;;  %vm1675_vm12 = vcmask (%p96_p1), 1044484  }
  0x89   :  { %1177 = vmatpush1.bf16.msra.mxu0 %v2617_v34  ;;  %v2626_v40 = vld [vmem:[#allocation8 + $0x124] ss:$8 sps:$4 sm:$0xff]   ;;  %v2635_v46 = vld [vmem:[#allocation8 + $0x130] ss:$8 sps:$4 sm:$0xff]   ;;  %v2162_v49 = vld [vmem:[#allocation8 + $0x40] ss:$8 sps:$4 sm:$0xff]  }
  0x8a   :  { %1178 = vmatprep.subr.bf16.mxu0 %v2621_v36  ;;  %v2158_v47 = vld [vmem:[#allocation8 + $0x44] ss:$8 sps:$4 sm:$0xff]   ;;  %v2640_v50 = vld [vmem:[#allocation8 + $0x140] ss:$8 sps:$4 sm:$0xff]   ;;  %v2164_v51 = vld [vmem:[#allocation8 + $0x54] ss:$8 sps:$4 sm:$0xff]  }
  0x8b   :  { %1066 = vmatpush1.bf16.msra.mxu1 %v2144_v37  ;;  %v2638_v48 = vld [vmem:[#allocation8 + $0x144] ss:$8 sps:$4 sm:$0xff]   ;;  %v2644_v52 = vld [vmem:[#allocation8 + $0x154] ss:$8 sps:$4 sm:$0xff]   ;;  %v2168_v53 = vld [vmem:[#allocation8 + $0x50] ss:$8 sps:$4 sm:$0xff]  }
  0x8c   :  { %1067 = vmatprep.subr.bf16.mxu1 %v2146_v39  ;;  %v2647_v54 = vld [vmem:[#allocation8 + $0x150] ss:$8 sps:$4 sm:$0xff]   ;;  %v2170_v55 = vld [vmem:[#allocation8 + $0x64] ss:$8 sps:$4 sm:$0xff]   ;;  %v2174_v57 = vld [vmem:[#allocation8 + $0x60] ss:$8 sps:$4 sm:$0xff]  }
  0x8d   :  { %1179 = vmatpush1.bf16.msra.mxu0 %v2623_v38  ;;  %v2650_v56 = vld [vmem:[#allocation8 + $0x164] ss:$8 sps:$4 sm:$0xff]   ;;  %v2652_v58 = vld [vmem:[#allocation8 + $0x160] ss:$8 sps:$4 sm:$0xff]   ;;  %v2176_v59 = vld [vmem:[#allocation8 + $0x74] ss:$8 sps:$4 sm:$0xff]  }
  0x8e   :  { %1180 = vmatprep.subr.bf16.mxu0 %v2626_v40  ;;  %v2656_v60 = vld [vmem:[#allocation8 + $0x174] ss:$8 sps:$4 sm:$0xff]   ;;  %v2180_v61 = vld [vmem:[#allocation8 + $0x70] ss:$8 sps:$4 sm:$0xff]   ;;  %v2182_v63 = vld [vmem:[#allocation8 + $0x84] ss:$8 sps:$4 sm:$0xff]  }
  0x8f   :  { %1068 = vmatpush1.bf16.msra.mxu1 %v2150_v41  ;;  %v2659_v62 = vld [vmem:[#allocation8 + $0x170] ss:$8 sps:$4 sm:$0xff]   ;;  %v2662_v0 = vld [vmem:[#allocation8 + $0x184] ss:$8 sps:$4 sm:$0xff]   ;;  %v2186_v1 = vld [vmem:[#allocation8 + $0x80] ss:$8 sps:$4 sm:$0xff]  }
  0x90   :  { %1069 = vmatprep.subr.bf16.mxu1 %v2152_v43  ;;  %v2664_v2 = vld [vmem:[#allocation8 + $0x180] ss:$8 sps:$4 sm:$0xff]   ;;  %v2188_v3 = vld [vmem:[#allocation8 + $0x94] ss:$8 sps:$4 sm:$0xff]   ;;  %v2192_v5 = vld [vmem:[#allocation8 + $0x90] ss:$8 sps:$4 sm:$0xff]  }
  0x91   :  { %1181 = vmatpush1.bf16.msra.mxu0 %v2628_v42  ;;  %v2668_v4 = vld [vmem:[#allocation8 + $0x194] ss:$8 sps:$4 sm:$0xff]   ;;  %v2671_v6 = vld [vmem:[#allocation8 + $0x190] ss:$8 sps:$4 sm:$0xff]   ;;  %v2194_v7 = vld [vmem:[#allocation8 + $0xa4] ss:$8 sps:$4 sm:$0xff]  }
  0x92   :  { %1182 = vmatprep.subr.bf16.mxu0 %v2632_v44  ;;  %v2674_v8 = vld [vmem:[#allocation8 + $0x1a4] ss:$8 sps:$4 sm:$0xff]   ;;  %v2198_v9 = vld [vmem:[#allocation8 + $0xa0] ss:$8 sps:$4 sm:$0xff]   ;;  %v2200_v11 = vld [vmem:[#allocation8 + $0xb4] ss:$8 sps:$4 sm:$0xff]  }
  0x93   :  { %1070 = vmatpush1.bf16.msra.mxu1 %v2156_v45  ;;  %v2676_v10 = vld [vmem:[#allocation8 + $0x1a0] ss:$8 sps:$4 sm:$0xff]   ;;  %v2680_v12 = vld [vmem:[#allocation8 + $0x1b4] ss:$8 sps:$4 sm:$0xff]   ;;  %v2204_v13 = vld [vmem:[#allocation8 + $0xb0] ss:$8 sps:$4 sm:$0xff]  }
  0x94   :  { %1071 = vmatprep.subr.bf16.mxu1 %v2158_v47  ;;  %v275_v14 = vld [vmem:[#allocation2] sm:$0xff]  ;;  %v276_v15 = vld [vmem:[#allocation2 + $0x8] sm:$0xff]  ;;  %v277_v16 = vld [vmem:[#allocation2 + $0x10] sm:$0xf]  ;;  %vm315_vm7 = vsmask.f32 7424 }
  0x95   :  { %1183 = vmatpush1.bf16.msra.mxu0 %v2635_v46  ;;  %v2683_v17 = vld [vmem:[#allocation8 + $0x1b0] ss:$8 sps:$4 sm:$0xff]   ;;  %v2206_v18 = vld [vmem:[#allocation8 + $0xc4] ss:$8 sps:$4 sm:$0xff]   ;;  %v2685_v19 = vpack.c.bf16 %v276_v15, %v275_v14  ;;  %v2687_v20 = vpack.c.bf16 %v277_v16, %v277_v16  ;;  %v2210_v22 = vld [vmem:[#allocation8 + $0xc0] ss:$8 sps:$4 sm:$0xff]  }
  0x96   :  { %1184 = vmatprep.subr.bf16.mxu0 %v2638_v48  ;;  %v2690_v21 = vld [vmem:[#allocation8 + $0x1c4] ss:$8 sps:$4 sm:$0xff]   ;;  %v2692_v23 = vld [vmem:[#allocation8 + $0x1c0] ss:$8 sps:$4 sm:$0xff]   ;;  %v280_v30 = vld [vmem:[#allocation2 + $0x28] sm:$0xf] }
  0x97   :  { %1072 = vmatpush1.bf16.msra.mxu1 %v2162_v49  ;;  %v317_v24 = vshrl.u32 %v2685_v19, 16  ;;  %v319_v25 = vshll.u32 %v2685_v19, 16  ;;  %v324_v26 = vshll.u32 %v2687_v20, 16  ;;  %v473_v27 = vshrl.u32 %v2687_v20, 16  ;;  %v278_v28 = vld [vmem:[#allocation2 + $0x18] sm:$0xff]  ;;  %v279_v29 = vld [vmem:[#allocation2 + $0x20] sm:$0xff] }
  0x98   :  { %1073 = vmatprep.subr.bf16.mxu1 %v2164_v51  ;;  %v2212_v39 = vld [vmem:[#allocation8 + $0xd4] ss:$8 sps:$4 sm:$0xff]   ;;  %vm469_vm8 = vsmask.f32 6400  ;;  %v2702_v51 = vpack.c.bf16 %v279_v29, %v278_v28  ;;  %v2228_v28 = vld [vmem:[#allocation8 + $0xf0] ss:$8 sps:$4 sm:$0xff]  }
  0x99   :  { %1185 = vmatpush1.bf16.msra.mxu0 %v2640_v50  ;;  %v321_v31 = vrot.slane %v319_v25, 1  ;;  %v326_v33 = vrot.slane %v324_v26, 1  ;;  %v470_v35 = vrot.slane %v317_v24, 1  ;;  %v471_v37 = vrot.slane %v319_v25, 2  ;;  %v2700_v41 = vld [vmem:[#allocation8 + $0x1d4] ss:$8 sps:$4 sm:$0xff]  }
  0x9a   :  { %1186 = vmatprep.subr.bf16.mxu0 %v2644_v52  ;;  %v475_v43 = vrot.slane %v473_v27, 1  ;;  %v476_v45 = vrot.slane %v324_v26, 2  ;;  %v329_v14 = vshrl.u32 %v2702_v51, 16  ;;  %vm1677_vm13 = vcmask 1045509   ;;  %s2449_s18 = smov [#allocation14]  }
  0x9b   :  { %1074 = vmatpush1.bf16.msra.mxu1 %v2168_v53  ;;  %v322_v47 = vor.u32 %v321_v31, %v317_v24  ;;  %v472_v49 = vor.u32 %v471_v37, %v470_v35  ;;  %v2216_v53 = vld [vmem:[#allocation8 + $0xd0] ss:$8 sps:$4 sm:$0xff]   ;;  %v2721_v24 = vld [vmem:[#allocation8 + $0x1f4] ss:$8 sps:$4 sm:$0xff]   ;;  %v437_v37 = vrot.slane %v2685_v19, 1  ;;  %vm1679_vm14 = vcmask 1046534  }
  0x9c   :  { %1075 = vmatprep.subr.bf16.mxu1 %v2170_v55  ;;  %v2704_v55 = vld [vmem:[#allocation8 + $0x1d0] ss:$8 sps:$4 sm:$0xff]   ;;  %3022 = vst [vmem:[#allocation21_spill] sm:$0xff] %v2721_v24  ;;  %v479_v29 = vrot.slane %v329_v14, 1  ;;  %vm1681_vm15 = vcmask 1047559   ;;  %s1846_s13 = sshll.u32 %s2449_s18, 4  ;;  %s1847_s13 = int_to_ptr.vmem [resolvable:$true] %s1846_s13 }
  0x9d   :  { %1187 = vmatpush1.bf16.msra.mxu0 %v2647_v54  ;;  %v2729_v35 = vld [vmem:[#allocation8 + $0x1f0] ss:$8 sps:$4 sm:$0xff]   ;;  %s2394_s14 = scalar_lea.vmem %s1847_s13, 128  ;;  %p2399_p3 = scmp.lt.s32.totalorder %s1847_s13, %s1847_s13 }
  0x9e   :  { %1188 = vmatprep.subr.bf16.mxu0 %v2650_v56  ;;  %p2395_p2 = scmp.ne.s32.totalorder %s1847_s13, %s2394_s14  ;;  %p2400_p4 = scmp.lt.s32.totalorder %s2394_s14, %s2394_s14 }
  0x9f   :  { %1076 = vmatpush1.bf16.msra.mxu1 %v2174_v57  ;;  %v2218_v57 = vld [vmem:[#allocation8 + $0xe4] ss:$8 sps:$4 sm:$0xff]  }
  0xa0   :  { %1077 = vmatprep.subr.bf16.mxu1 %v2176_v59  ;;  %v477_v59 = vor.u32 %v476_v45, %v475_v43  ;;  %v2232_v45 = vld [vmem:[#allocation8 + $0x204] ss:$8 sps:$4 sm:$0xff]   ;;  %p2401_p5 = por %p2400_p4, %p2399_p3 }
  0xa1   :  { %1189 = vmatpush1.bf16.msra.mxu0 %v2652_v58 }
  0xa2   :  { %1190 = vmatprep.subr.bf16.mxu0 %v2656_v60  ;;  %p2402_p6 = pnand %p2401_p5, %p2395_p2 }
  0xa3   :  { %1078 = vmatpush1.bf16.msra.mxu1 %v2180_v61  ;;  %v2706_v61 = vpack.c.bf16 %v280_v30, %v280_v30 }
  0xa4   :  { %1079 = vmatprep.subr.bf16.mxu1 %v2182_v63  ;;  %v2709_v63 = vld [vmem:[#allocation8 + $0x1e4] ss:$8 sps:$4 sm:$0xff]  }
  0xa5   :  { %1191 = vmatpush1.bf16.msra.mxu0 %v2659_v62  ;;  %v336_v15 = vshll.u32 %v2706_v61, 16  ;;  %v482_v16 = vshrl.u32 %v2706_v61, 16 }
  0xa6   :  { %1192 = vmatprep.subr.bf16.mxu0 %v2662_v0 }
  0xa7   :  { %1080 = vmatpush1.bf16.msra.mxu1 %v2186_v1  ;;  %v327_v1 = vsel %vm315_vm7, %v322_v47, %v326_v33  ;;  %v484_v31 = vrot.slane %v482_v16, 1  ;;  %v485_v33 = vrot.slane %v336_v15, 2  ;;  %v286_v16 = vld [vmem:[#allocation2 + $0x58] sm:$0xf] }
  0xa8   :  { %1081 = vmatprep.subr.bf16.mxu1 %v2188_v3  ;;  %v281_v3 = vld [vmem:[#allocation2 + $0x30] sm:$0xff]  ;;  %1095 = vmatprep.mubr.bf16.mxu1 %v327_v1 }
  0xa9   :  { %1193 = vmatpush1.bf16.msra.mxu0 %v2664_v2 }
  0xaa   :  { %1194 = vmatprep.subr.bf16.mxu0 %v2668_v4 }
  0xab   :  { %1082 = vmatpush1.bf16.msra.mxu1 %v2192_v5  ;;  %v282_v5 = vld [vmem:[#allocation2 + $0x38] sm:$0xff] }
  0xac   :  { %1083 = vmatprep.subr.bf16.mxu1 %v2194_v7  ;;  %v478_v7 = vsel %vm469_vm8, %v472_v49, %v477_v59  ;;  %v2723_v25 = vpack.c.bf16 %v282_v5, %v281_v3  ;;  %v338_v59 = vrot.slane %v336_v15, 1  ;;  %v486_v3 = vor.u32 %v485_v33, %v484_v31  ;;  %v284_v5 = vld [vmem:[#allocation2 + $0x48] sm:$0xff] }
  0xad   :  { %1195 = vmatpush1.bf16.msra.mxu0 %v2671_v6  ;;  %1208 = vmatprep.mubr.bf16.mxu0 %v478_v7  ;;  %v285_v7 = vld [vmem:[#allocation2 + $0x50] sm:$0xff]  ;;  %v2746_v31 = vpack.c.bf16 %v286_v16, %v286_v16  ;;  %v441_v33 = vrot.slane %v2706_v61, 1 }
  0xae   :  { %1196 = vmatprep.subr.bf16.mxu0 %v2674_v8  ;;  %v343_v43 = vshll.u32 %v2723_v25, 16  ;;  %v341_v47 = vshrl.u32 %v2723_v25, 16 }
  0xaf   :  { %1084 = vmatpush1.bf16.msra.mxu1 %v2198_v9  ;;  %v331_v9 = vshll.u32 %v2702_v51, 16 }
  0xb0   :  { %1085 = vmatprep.subr.bf16.mxu1 %v2200_v11  ;;  %v283_v11 = vld [vmem:[#allocation2 + $0x40] sm:$0xf] }
  0xb1   :  { %1197 = vmatpush1.bf16.msra.mxu0 %v2676_v10  ;;  %v2726_v26 = vpack.c.bf16 %v283_v11, %v283_v11  ;;  %v333_v27 = vrot.slane %v331_v9, 1  ;;  %v480_v30 = vrot.slane %v331_v9, 2  ;;  %v2230_v11 = vld [vmem:[#allocation8 + $0x200] ss:$8 sps:$4 sm:$0xff]  }
  0xb2   :  { %1198 = vmatprep.subr.bf16.mxu0 %v2680_v12 }
  0xb3   :  { %1086 = vmatpush1.bf16.msra.mxu1 %v2204_v13  ;;  %v2222_v13 = vld [vmem:[#allocation8 + $0xe0] ss:$8 sps:$4 sm:$0xff]   ;;  %v348_v49 = vshll.u32 %v2726_v26, 16  ;;  %v481_v1 = vor.u32 %v480_v30, %v479_v29 }
  0xb4   :  { %1087 = vmatprep.subr.bf16.mxu1 %v2206_v18  ;;  %v2719_v18 = vld [vmem:[#allocation8 + $0x1e0] ss:$8 sps:$4 sm:$0xff]  }
  0xb5   :  { %1199 = vmatpush1.bf16.msra.mxu0 %v2683_v17  ;;  %3021 = vst [vmem:[#allocation20_spill] sm:$0xff] %v2719_v18  ;;  %v494_v15 = vrot.slane %v348_v49, 2  ;;  %v487_v30 = vsel %vm469_vm8, %v481_v1, %v486_v3  ;;  %v360_v1 = vshll.u32 %v2746_v31, 16  ;;  %v500_v3 = vshrl.u32 %v2746_v31, 16 }
  0xb6   :  { %1200 = vmatprep.subr.bf16.mxu0 %v2690_v21 }
  0xb7   :  { %1088 = vmatpush1.bf16.msra.mxu1 %v2210_v22  ;;  %v2224_v22 = vld [vmem:[#allocation8 + $0xf4] ss:$8 sps:$4 sm:$0xff]   ;;  %v503_v16 = vrot.slane %v360_v1, 2 }
  0xb8   :  { %1089 = vmatprep.subr.bf16.mxu1 %v2212_v39  ;;  %v438_v39 = vrot.slane %v2687_v20, 1 }
  0xb9   :  { %1201 = vmatpush1.bf16.msra.mxu0 %v2692_v23 }
  0xba   :  { %1202 = vmatprep.subr.bf16.mxu0 %v2700_v41  ;;  %v439_v9 = vsel %vm261_vm6, %v437_v37, %v438_v39  ;;  %v2238_v37 = vld [vmem:[#allocation8 + $0x224] ss:$8 sps:$4 sm:$0xff]  }
  0xbb   :  { %1090 = vmatpush1.bf16.msra.mxu1 %v2216_v53  ;;  %v491_v53 = vshrl.u32 %v2726_v26, 16 }
  0xbc   :  { %1091 = vmatprep.subr.bf16.mxu1 %v2218_v57  ;;  %v334_v57 = vor.u32 %v333_v27, %v329_v14  ;;  %v2741_v27 = vpack.c.bf16 %v285_v7, %v284_v5  ;;  %v287_v5 = vld [vmem:[#allocation2 + $0x60] sm:$0xff] }
  0xbd   :  { %1203 = vmatpush1.bf16.msra.mxu0 %v2704_v55  ;;  %v493_v14 = vrot.slane %v491_v53, 1 }
  0xbe   :  { %1204 = vmatprep.subr.bf16.mxu0 %v2709_v63  ;;  %v339_v29 = vsel %vm315_vm7, %v334_v57, %v338_v59  ;;  %v353_v59 = vshrl.u32 %v2741_v27, 16 }
  0xbf   :  { %1092 = vmatpush1.bf16.msra.mxu1 %v2222_v13  ;;  %v345_v13 = vrot.slane %v343_v43, 1  ;;  %v495_v57 = vor.u32 %v494_v15, %v493_v14  ;;  %v444_v14 = vrot.slane %v2726_v26, 1  ;;  %v289_v15 = vld [vmem:[#allocation2 + $0x70] sm:$0xf] }
  0xc0   :  { %1093 = vmatprep.subr.bf16.mxu1 %v2224_v22  ;;  %v2235_v22 = vld [vmem:[#allocation8 + $0x214] ss:$8 sps:$4 sm:$0xff]  }
  0xc1   :  { %1205 = vmatpush1.bf16.msra.mxu0 %v2719_v18  ;;  %v489_v18 = vrot.slane %v343_v43, 2  ;;  %v346_v39 = vor.u32 %v345_v13, %v341_v47  ;;  %v350_v43 = vrot.slane %v348_v49, 1 }
  0xc2   :  { %1206 = vmatprep.subr.bf16.mxu0 %v2721_v24  ;;  %v488_v24 = vrot.slane %v341_v47, 1  ;;  %v288_v47 = vld [vmem:[#allocation2 + $0x68] sm:$0xff] }
  0xc3   :  { %1094 = vmatpush1.bf16.msra.mxu1 %v2228_v28  ;;  %v2233_v28 = vld [vmem:[#allocation8 + $0x210] ss:$8 sps:$4 sm:$0xff]   ;;  %v351_v49 = vsel %vm315_vm7, %v346_v39, %v350_v43  ;;  %v2768_v43 = vpack.c.bf16 %v289_v15, %v289_v15 }
  0xc4   :  { %2014 = vmatprep.subr.bf16.mxu1 %v2615_v32  ;;  %v440_v32 = vrot.slane %v2702_v51, 1  ;;  %v490_v53 = vor.u32 %v489_v18, %v488_v24  ;;  %v2241_v18 = vld [vmem:[#allocation8 + $0x234] ss:$8 sps:$4 sm:$0xff]   ;;  %v2239_v24 = vld [vmem:[#allocation8 + $0x230] ss:$8 sps:$4 sm:$0xff]  }
  0xc5   :  { %1207 = vmatpush1.bf16.msra.mxu0 %v2729_v35 }
  0xc6   :  { %1289 = vmatprep.subr.bf16.mxu0 %v2232_v45  ;;  %1096 = vmatmul.mubr.bf16.vlgmr.msra.gmra.mrb[0].mxu1 %v2685_v19  ;;  %v2236_v45 = vld [vmem:[#allocation8 + $0x220] ss:$8 sps:$4 sm:$0xff]   ;;  %v496_v7 = vsel %vm469_vm8, %v490_v53, %v495_v57  ;;  %v2247_v53 = vld [vmem:[#allocation8 + $0x254] ss:$8 sps:$4 sm:$0xff]  }
  0xc7   :  { %2030 = vmatpush1.bf16.msra.mxu1 %v2617_v34  ;;  %1105 = vmatprep.mubr.bf16.mxu1 %v339_v29  ;;  %v355_v34 = vshll.u32 %v2741_v27, 16  ;;  %v290_v29 = vld [vmem:[#allocation2 + $0x78] sm:$0xff] }
  0xc8   :  { %1209 = vmatmul.mubr.bf16.vlgmr.msra.gmra.mrb[0].mxu0 %v439_v9  ;;  %2015 = vmatprep.subr.bf16.mxu1 %v2621_v36  ;;  %v442_v36 = vsel %vm261_vm6, %v440_v32, %v441_v33  ;;  %v362_v32 = vrot.slane %v360_v1, 1  ;;  %v291_v33 = vld [vmem:[#allocation2 + $0x80] sm:$0xff] }
  0xc9   :  { %1290 = vmatpush1.bf16.msra.mxu0 %v2230_v11  ;;  %1218 = vmatprep.mubr.bf16.mxu0 %v487_v30  ;;  %v357_v9 = vrot.slane %v355_v34, 1  ;;  %v497_v11 = vrot.slane %v353_v59, 1  ;;  %v498_v13 = vrot.slane %v355_v34, 2  ;;  %v2774_v57 = vpack.c.bf16 %v291_v33, %v290_v29  ;;  %v292_v34 = vld [vmem:[#allocation2 + $0x88] sm:$0xf] }
  0xca   :  { %1291 = vmatprep.subr.bf16.mxu0 %v2235_v22  ;;  %v2762_v22 = vpack.c.bf16 %v288_v47, %v287_v5  ;;  %v372_v5 = vshll.u32 %v2768_v43, 16  ;;  %v447_v47 = vrot.slane %v2746_v31, 1  ;;  %v551_v29 = vrot.slane %v2685_v19, 2  ;;  %v296_v19 = vld [vmem:[#allocation2 + $0xa8] sm:$0xff] }
  0xcb   :  { %2031 = vmatpush1.bf16.msra.mxu1 %v2623_v38  ;;  %v502_v38 = vrot.slane %v500_v3, 1  ;;  %v358_v30 = vor.u32 %v357_v9, %v353_v59  ;;  %v294_v9 = vld [vmem:[#allocation2 + $0x98] sm:$0xff] }
  0xcc   :  { %2016 = vmatprep.subr.bf16.mxu1 %v2626_v40  ;;  %v443_v40 = vrot.slane %v2723_v25, 1 }
  0xcd   :  { %1292 = vmatpush1.bf16.msra.mxu0 %v2233_v28  ;;  %v2244_v28 = vld [vmem:[#allocation8 + $0x244] ss:$8 sps:$4 sm:$0xff]   ;;  %v504_v39 = vor.u32 %v503_v16, %v502_v38  ;;  %v363_v59 = vsel %vm315_vm7, %v358_v30, %v362_v32  ;;  %v2253_v38 = vld [vmem:[#allocation8 + $0x274] ss:$8 sps:$4 sm:$0xff]   ;;  %v377_v16 = vshrl.u32 %v2774_v57, 16  ;;  %v552_v30 = vrot.slane %v2687_v20, 2 }
  0xce   :  { %1293 = vmatprep.subr.bf16.mxu0 %v2238_v37  ;;  %1106 = vmatmul.mubr.bf16.gmra.mrb[4].mxu1 %v2702_v51  ;;  %v499_v37 = vor.u32 %v498_v13, %v497_v11  ;;  %v374_v11 = vrot.slane %v372_v5, 1  ;;  %v2248_v13 = vld [vmem:[#allocation8 + $0x260] ss:$8 sps:$4 sm:$0xff]  }
  0xcf   :  { %2032 = vmatpush1.bf16.msra.mxu1 %v2628_v42  ;;  %1115 = vmatprep.mubr.bf16.mxu1 %v351_v49  ;;  %v367_v42 = vshll.u32 %v2762_v22, 16  ;;  %v379_v49 = vshll.u32 %v2774_v57, 16 }
  0xd0   :  { %1219 = vmatmul.mubr.bf16.gmra.mrb[4].mxu0 %v442_v36  ;;  %2017 = vmatprep.subr.bf16.mxu1 %v2632_v44  ;;  %v2242_v44 = vld [vmem:[#allocation8 + $0x240] ss:$8 sps:$4 sm:$0xff]   ;;  %v505_v1 = vsel %vm469_vm8, %v499_v37, %v504_v39  ;;  %v446_v36 = vrot.slane %v2741_v27, 1 }
  0xd1   :  { %1294 = vmatpush1.bf16.msra.mxu0 %v2236_v45  ;;  %1228 = vmatprep.mubr.bf16.mxu0 %v496_v7  ;;  %v445_v45 = vsel %vm261_vm6, %v443_v40, %v444_v14  ;;  %v369_v3 = vrot.slane %v367_v42, 1  ;;  %v293_v7 = vld [vmem:[#allocation2 + $0x90] sm:$0xff]  ;;  %v381_v40 = vrot.slane %v379_v49, 1 }
  0xd2   :  { %1295 = vmatprep.subr.bf16.mxu0 %v2241_v18  ;;  %v2250_v18 = vld [vmem:[#allocation8 + $0x264] ss:$8 sps:$4 sm:$0xff]   ;;  %v2801_v15 = vpack.c.bf16 %v294_v9, %v293_v7  ;;  %v558_v7 = vrot.slane %v2726_v26, 2  ;;  %v507_v26 = vrot.slane %v367_v42, 2 }
  0xd3   :  { %2033 = vmatpush1.bf16.msra.mxu1 %v2635_v46  ;;  %v365_v46 = vshrl.u32 %v2762_v22, 16  ;;  %v382_v32 = vor.u32 %v381_v40, %v377_v16  ;;  %v449_v40 = vrot.slane %v2762_v22, 1 }
  0xd4   :  { %2018 = vmatprep.subr.bf16.mxu1 %v2638_v48  ;;  %v2245_v48 = vld [vmem:[#allocation8 + $0x250] ss:$8 sps:$4 sm:$0xff]   ;;  %v391_v39 = vshll.u32 %v2801_v15, 16  ;;  %v389_v20 = vshrl.u32 %v2801_v15, 16 }
  0xd5   :  { %1296 = vmatpush1.bf16.msra.mxu0 %v2239_v24  ;;  %v2787_v24 = vpack.c.bf16 %v292_v34, %v292_v34 }
  0xd6   :  { %1297 = vmatprep.subr.bf16.mxu0 %v2244_v28  ;;  %1116 = vmatmul.mubr.bf16.gmra.mrb[8].mxu1 %v2723_v25  ;;  %v295_v28 = vld [vmem:[#allocation2 + $0xa0] sm:$0xf] }
  0xd7   :  { %2034 = vmatpush1.bf16.msra.mxu1 %v2640_v50  ;;  %1125 = vmatprep.mubr.bf16.mxu1 %v363_v59  ;;  %v370_v50 = vor.u32 %v369_v3, %v365_v46  ;;  %v384_v14 = vshll.u32 %v2787_v24, 16  ;;  %v2813_v37 = vpack.c.bf16 %v295_v28, %v295_v28  ;;  %v564_v28 = vrot.slane %v2768_v43, 2 }
  0xd8   :  { %1229 = vmatmul.mubr.bf16.gmra.mrb[8].mxu0 %v445_v45  ;;  %2019 = vmatprep.subr.bf16.mxu1 %v2644_v52  ;;  %v448_v52 = vsel %vm261_vm6, %v446_v36, %v447_v47  ;;  %v297_v45 = vld [vmem:[#allocation2 + $0xb0] sm:$0xff] }
  0xd9   :  { %1298 = vmatpush1.bf16.msra.mxu0 %v2242_v44  ;;  %1238 = vmatprep.mubr.bf16.mxu0 %v505_v1  ;;  %v386_v33 = vrot.slane %v384_v14, 1  ;;  %v396_v59 = vshll.u32 %v2813_v37, 16  ;;  %v2825_v34 = vpack.c.bf16 %v297_v45, %v296_v19  ;;  %v298_v1 = vld [vmem:[#allocation2 + $0xb8] sm:$0xf]  ;;  %v453_v45 = vrot.slane %v2787_v24, 1 }
  0xda   :  { %1299 = vmatprep.subr.bf16.mxu0 %v2247_v53  ;;  %v393_v53 = vrot.slane %v391_v39, 1  ;;  %v2837_v36 = vpack.c.bf16 %v298_v1, %v298_v1 }
  0xdb   :  { %2035 = vmatpush1.bf16.msra.mxu1 %v2647_v54  ;;  %v375_v54 = vsel %vm315_vm7, %v370_v50, %v374_v11  ;;  %v387_v44 = vsel %vm315_vm7, %v382_v32, %v386_v33  ;;  %v403_v47 = vshll.u32 %v2825_v34, 16  ;;  %v509_v50 = vshrl.u32 %v2768_v43, 16 }
  0xdc   :  { %2020 = vmatprep.subr.bf16.mxu1 %v2650_v56  ;;  %v2251_v56 = vld [vmem:[#allocation8 + $0x270] ss:$8 sps:$4 sm:$0xff]   ;;  %v394_v3 = vor.u32 %v393_v53, %v389_v20  ;;  %v524_v32 = vrot.slane %v389_v20, 1  ;;  %v530_v19 = vrot.slane %v396_v59, 2  ;;  %v567_v20 = vrot.slane %v2787_v24, 2 }
  0xdd   :  { %1300 = vmatpush1.bf16.msra.mxu0 %v2245_v48  ;;  %v398_v48 = vrot.slane %v396_v59, 1  ;;  %v511_v11 = vrot.slane %v509_v50, 1 }
  0xde   :  { %1301 = vmatprep.subr.bf16.mxu0 %v2250_v18  ;;  %1126 = vmatmul.mubr.bf16.gmra.mrb[12].mxu1 %v2741_v27  ;;  %v408_v18 = vshll.u32 %v2837_v36, 16 }
  0xdf   :  { %2036 = vmatpush1.bf16.msra.mxu1 %v2652_v58  ;;  %1135 = vmatprep.mubr.bf16.mxu1 %v375_v54  ;;  %v2448_v58 = vmov 0   ;;  %v3024_v54 = vld [vmem:[#allocation21_spill] sm:$0xff] }
  0xe0   :  { %1239 = vmatmul.mubr.bf16.gmra.mrb[12].mxu0 %v448_v52  ;;  %2021 = vmatprep.subr.bf16.mxu1 %v2656_v60  ;;  %v553_v60 = vsel %vm259_vm5, %v551_v29, %v552_v30  ;;  %v410_v9 = vrot.slane %v408_v18, 1  ;;  %v512_v52 = vrot.slane %v372_v5, 2 }
  0xe1   :  { %1302 = vmatpush1.bf16.msra.mxu0 %v2248_v13  ;;  %1321 = vmatprep.mubr.bf16.mxu0 %v2448_v58  ;;  %v518_v13 = vshrl.u32 %v2787_v24, 16  ;;  %v455_v24 = vrot.slane %v2801_v15, 1 }
  0xe2   :  { %1303 = vmatprep.subr.bf16.mxu0 %v2253_v38  ;;  %v513_v42 = vor.u32 %v512_v52, %v511_v11  ;;  %v521_v38 = vrot.slane %v384_v14, 2  ;;  %v2258_v11 = vld [vmem:[#allocation11 + $0x50] sm:$0xff]  }
  0xe3   :  { %2037 = vmatpush1.bf16.msra.mxu1 %v2659_v62  ;;  %v554_v62 = vrot.slane %v2702_v51, 2  ;;  %v401_v51 = vshrl.u32 %v2825_v34, 16  ;;  %v2259_v52 = vld [vmem:[#allocation11 + $0x10] sm:$0xff]  }
  0xe4   :  { %2022 = vmatprep.subr.bf16.mxu1 %v2662_v0  ;;  %v555_v0 = vrot.slane %v2706_v61, 2  ;;  %v405_v61 = vrot.slane %v403_v47, 1 }
  0xe5   :  { %1304 = vmatpush1.bf16.msra.mxu0 %v2251_v56  ;;  %v527_v56 = vshrl.u32 %v2813_v37, 16 }
  0xe6   :  { %1136 = vmatmul.mubr.bf16.gmra.mrb[16].mxu1 %v2762_v22 }
  0xe7   :  { %2038 = vmatpush1.bf16.msra.mxu1 %v2664_v2  ;;  %1145 = vmatprep.mubr.bf16.mxu1 %v387_v44  ;;  %v556_v2 = vsel %vm259_vm5, %v554_v62, %v555_v0  ;;  %v529_v33 = vrot.slane %v527_v56, 1  ;;  %v533_v62 = vrot.slane %v401_v51, 1 }
  0xe8   :  { %1322 = vmatmul.mubr.bf16.vlgmr.msra.gmra.mrb[0].mxu0 %v553_v60  ;;  %2023 = vmatprep.subr.bf16.mxu1 %v2668_v4  ;;  %v399_v4 = vsel %vm315_vm7, %v394_v3, %v398_v48  ;;  %v566_v60 = vrot.slane %v2774_v57, 2  ;;  %v534_v3 = vrot.slane %v403_v47, 2 }
  0xe9   :  { %1331 = vmatprep.mubr.bf16.mxu0 %v2448_v58  ;;  %v531_v53 = vor.u32 %v530_v19, %v529_v33  ;;  %v2945_v33 = vld [vmem:[#allocation10] sm:$0xff] }
  0xea   :  { %v568_v59 = vsel %vm259_vm5, %v566_v60, %v567_v20 }
  0xeb   :  { %2039 = vmatpush1.bf16.msra.mxu1 %v2671_v6  ;;  %v557_v6 = vrot.slane %v2723_v25, 2  ;;  %v506_v25 = vrot.slane %v365_v46, 1  ;;  %v561_v46 = vrot.slane %v2746_v31, 2  ;;  %v520_v31 = vrot.slane %v518_v13, 1  ;;  %v2266_v13 = vld [vmem:[#allocation11 + $0x70] sm:$0xff]  }
  0xec   :  { %2024 = vmatprep.subr.bf16.mxu1 %v2674_v8  ;;  %v406_v8 = vor.u32 %v405_v61, %v401_v51  ;;  %v570_v51 = vrot.slane %v2813_v37, 2  ;;  %v535_v61 = vor.u32 %v534_v3, %v533_v62 }
  0xed   :  { %v522_v14 = vor.u32 %v521_v38, %v520_v31 }
  0xee   :  { %1146 = vmatmul.mubr.bf16.gmra.mrb[20].mxu1 %v2774_v57 }
  0xef   :  { %2040 = vmatpush1.bf16.msra.mxu1 %v2676_v10  ;;  %1155 = vmatprep.mubr.bf16.mxu1 %v399_v4  ;;  %v559_v10 = vsel %vm259_vm5, %v557_v6, %v558_v7  ;;  %v569_v4 = vrot.slane %v2801_v15, 2 }
  0xf0   :  { %1332 = vmatmul.mubr.bf16.gmra.mrb[4].mxu0 %v556_v2  ;;  %2025 = vmatprep.subr.bf16.mxu1 %v2680_v12  ;;  %v411_v12 = vsel %vm315_vm7, %v406_v8, %v410_v9  ;;  %v456_v2 = vrot.slane %v2813_v37, 1  ;;  %v458_v8 = vrot.slane %v2825_v34, 1  ;;  %v459_v9 = vrot.slane %v2837_v36, 1 }
  0xf1   :  { %1341 = vmatprep.mubr.bf16.mxu0 %v2448_v58  ;;  %v571_v7 = vsel %vm259_vm5, %v569_v4, %v570_v51  ;;  %v573_v37 = vrot.slane %v2837_v36, 2 }
  0xf2   :  { %v457_v47 = vsel %vm261_vm6, %v455_v24, %v456_v2  ;;  %v460_v50 = vsel %vm261_vm6, %v458_v8, %v459_v9 }
  0xf3   :  { %2041 = vmatpush1.bf16.msra.mxu1 %v2683_v17  ;;  %v560_v17 = vrot.slane %v2741_v27, 2 }
  0xf4   :  { %2026 = vmatprep.subr.bf16.mxu1 %v2690_v21  ;;  %v508_v21 = vor.u32 %v507_v26, %v506_v25  ;;  %v2254_v25 = vld [vmem:[#allocation11 + $0x40] sm:$0xff]   ;;  %v2256_v26 = vld [vmem:[#allocation11 + $0x48] sm:$0xff]  }
  0xf5   :  { %v562_v5 = vsel %vm259_vm5, %v560_v17, %v561_v46  ;;  %v2262_v17 = vld [vmem:[#allocation11 + $0x60] sm:$0xff]  }
  0xf6   :  { %1156 = vmatmul.mubr.bf16.gmra.mrb[24].mxu1 %v2801_v15  ;;  %v514_v27 = vsel %vm469_vm8, %v508_v21, %v513_v42  ;;  %v572_v15 = vrot.slane %v2825_v34, 2  ;;  %v2263_v46 = vld [vmem:[#allocation11 + $0x20] sm:$0xff]   ;;  %v2264_v21 = vld [vmem:[#allocation11 + $0x68] sm:$0xff]  }
  0xf7   :  { %2042 = vmatpush1.bf16.msra.mxu1 %v2692_v23  ;;  %1165 = vmatprep.mubr.bf16.mxu1 %v411_v12  ;;  %v515_v23 = vrot.slane %v377_v16, 1  ;;  %v450_v16 = vrot.slane %v2768_v43, 1  ;;  %v525_v43 = vrot.slane %v391_v39, 2  ;;  %v536_v39 = vshrl.u32 %v2837_v36, 16  ;;  %v2255_v12 = vld [vmem:[#allocation11] sm:$0xff]   ;;  %v2261_v36 = vld [vmem:[#allocation11 + $0x18] sm:$0xff]  }
  0xf8   :  { %1342 = vmatmul.mubr.bf16.gmra.mrb[8].mxu0 %v559_v10  ;;  %2027 = vmatprep.subr.bf16.mxu1 %v2700_v41  ;;  %v516_v41 = vrot.slane %v379_v49, 2  ;;  %v574_v10 = vsel %vm259_vm5, %v572_v15, %v573_v37  ;;  %v2265_v42 = vld [vmem:[#allocation11 + $0x28] sm:$0xff]  }
  0xf9   :  { %1351 = vmatprep.mubr.bf16.mxu0 %v2448_v58  ;;  %v451_v29 = vsel %vm261_vm6, %v449_v40, %v450_v16  ;;  %v526_v44 = vor.u32 %v525_v43, %v524_v32  ;;  %v538_v48 = vrot.slane %v536_v39, 1 }
  0xfa   :  { %v517_v49 = vor.u32 %v516_v41, %v515_v23  ;;  %v2268_v23 = vld [vmem:[#allocation11 + $0x78] sm:$0xff]  }
  0xfb   :  { %2043 = vmatpush1.bf16.msra.mxu1 %v2704_v55  ;;  %v3023_v55 = vld [vmem:[#allocation20_spill] sm:$0xff]  ;;  %v532_v0 = vsel %vm469_vm8, %v526_v44, %v531_v53 }
  0xfc   :  { %2028 = vmatprep.subr.bf16.mxu1 %v2709_v63  ;;  %v563_v63 = vrot.slane %v2762_v22, 2  ;;  %v523_v22 = vsel %vm469_vm8, %v517_v49, %v522_v14  ;;  %v2949_v44 = vld [vmem:[#allocation10 + $0x10] sm:$0xff] }
  0xfe   :  { %1166 = vmatmul.mubr.bf16.gmra.mrb[28].mxu1 %v2825_v34  ;;  %v565_v30 = vsel %vm259_vm5, %v563_v63, %v564_v28  ;;  %v2260_v34 = vld [vmem:[#allocation11 + $0x58] sm:$0xff]  }
  0xff   :  { %2044 = vmatpush1.bf16.msra.mxu1 %v3023_v55  ;;  %1248 = vmatprep.mubr.bf16.mxu1 %v514_v27  ;;  %v2269_v27 = vld [vmem:[#allocation11 + $0x38] sm:$0xff]  }
 0x100   :  { %1352 = vmatmul.mubr.bf16.gmra.mrb[12].mxu0 %v562_v5  ;;  %2029 = vmatprep.subr.bf16.mxu1 %v3024_v54  ;;  %v2267_v5 = vld [vmem:[#allocation11 + $0x30] sm:$0xff]  }
 0x101   :  { %1361 = vmatprep.mubr.bf16.mxu0 %v2448_v58 }
 0x103   :  { %2045 = vmatpush1.bf16.msra.mxu1 %v2729_v35  ;;  %v452_v35 = vrot.slane %v2774_v57, 1  ;;  %v539_v57 = vrot.slane %v408_v18, 2 }
 0x104   :  { %1992 = vmatprep.subr.bf16.mxu1 %v2254_v25 }
 0x105   :  { %v454_v1 = vsel %vm261_vm6, %v452_v35, %v453_v45  ;;  %v540_v6 = vor.u32 %v539_v57, %v538_v48  ;;  %v2947_v45 = vld [vmem:[#allocation10 + $0x8] sm:$0xff] }
 0x106   :  { %1249 = vmatmul.mubr.bf16.vlgmr.msra.gmra.mrb[16].mxu1 %v451_v29 }
 0x107   :  { %1258 = vmatprep.mubr.bf16.mxu1 %v523_v22  ;;  %v541_v18 = vsel %vm469_vm8, %v535_v61, %v540_v6  ;;  %1993 = vmatpush3.bf16.msra.mxu1 %v2255_v12 }
 0x108   :  { %1362 = vmatmul.mubr.bf16.gmra.mrb[16].mxu0 %v565_v30  ;;  %1994 = vmatprep.subr.bf16.mxu1 %v2256_v26 }
 0x109   :  { %1371 = vmatprep.mubr.bf16.mxu0 %v2448_v58 }
 0x10e   :  { %1259 = vmatmul.mubr.bf16.gmra.mrb[20].mxu1 %v454_v1 }
 0x10f   :  { %1268 = vmatprep.mubr.bf16.mxu1 %v532_v0 }
 0x110   :  { %1372 = vmatmul.mubr.bf16.gmra.mrb[20].mxu0 %v568_v59  ;;  %v2952_v59 = vld [vmem:[#allocation10 + $0x18] sm:$0xff] }
 0x111   :  { %1381 = vmatprep.mubr.bf16.mxu0 %v2448_v58 }
 0x116   :  { %1269 = vmatmul.mubr.bf16.gmra.mrb[24].mxu1 %v457_v47 }
 0x117   :  { %1278 = vmatprep.mubr.bf16.mxu1 %v541_v18 }
 0x118   :  { %1382 = vmatmul.mubr.bf16.gmra.mrb[24].mxu0 %v571_v7 }
 0x119   :  { %1391 = vmatprep.mubr.bf16.mxu0 %v2448_v58  ;;  %v2257_v58 = vld [vmem:[#allocation11 + $0x8] sm:$0xff]  }
 0x11a   :  { %1995 = vmatpush3.bf16.msra.mxu1 %v2257_v58 }
 0x11b   :  { %1996 = vmatprep.subr.bf16.mxu1 %v2258_v11 }
 0x11e   :  { %1279 = vmatmul.mubr.bf16.gmra.mrb[28].mxu1 %v460_v50 }
 0x11f   :  { %1997 = vmatpush3.bf16.msra.mxu1 %v2259_v52 }
 0x120   :  { %1392 = vmatmul.mubr.bf16.gmra.mrb[28].mxu0 %v574_v10  ;;  %1998 = vmatprep.subr.bf16.mxu1 %v2260_v34 }
 0x123   :  { %1999 = vmatpush3.bf16.msra.mxu1 %v2261_v36 }
 0x124   :  { %2000 = vmatprep.subr.bf16.mxu1 %v2262_v17 }
 0x127   :  { %2001 = vmatpush3.bf16.msra.mxu1 %v2263_v46 }
 0x128   :  { %2002 = vmatprep.subr.bf16.mxu1 %v2264_v21 }
 0x12b   :  { %2003 = vmatpush3.bf16.msra.mxu1 %v2265_v42 }
 0x12c   :  { %2004 = vmatprep.subr.bf16.mxu1 %v2266_v13 }
 0x12f   :  { %2005 = vmatpush3.bf16.msra.mxu1 %v2267_v5 }
 0x130   :  { %2006 = vmatprep.subr.bf16.mxu1 %v2268_v23 }
 0x133   :  { %2007 = vmatpush3.bf16.msra.mxu1 %v2269_v27 }
 0x199   :  { %v1097_v41 = vpop.f32.mrb[0].mxu1 }
 0x19a   :  { %v1099_v31 = vpop.f32.mrb[1].mxu1 }
 0x19b   :  { %v1101_v38 = vpop.f32.mrb[2].mxu1 }
 0x19c   :  { %v1103_v55 = vpop.f32.mrb[3].mxu1 }
 0x1a1   :  { %v1107_v40 = vpop.f32.mrb[4].mxu1 }
 0x1a2   :  { %v1109_v16 = vpop.f32.mrb[5].mxu1 }
 0x1a3   :  { %v1111_v63 = vpop.f32.mrb[6].mxu1 }
 0x1a4   :  { %v1113_v28 = vpop.f32.mrb[7].mxu1 }
 0x1a9   :  { %v1117_v54 = vpop.f32.mrb[8].mxu1 }
 0x1aa   :  { %v1119_v49 = vpop.f32.mrb[9].mxu1 }
 0x1ab   :  { %v1121_v14 = vpop.f32.mrb[10].mxu1 }
 0x1ac   :  { %v2935_v56 = vpop.f32.mrb[11].mxu1 }
 0x1b1   :  { %v2937_v29 = vpop.f32.mrb[12].mxu1 }
 0x1b2   :  { %v2939_v30 = vpop.f32.mrb[13].mxu1 }
 0x1b3   :  { %v2941_v32 = vpop.f32.mrb[14].mxu1 }
 0x1b4   :  { %v2943_v22 = vpop.f32.mrb[15].mxu1 }
 0x1bb   :  { %v1323_v43 = vpop.f32.mrb[0].mxu0 }
 0x1bc   :  { %v2046_v19 = vadd.f32 %v1323_v43, %v1097_v41  ;;  %v1325_v35 = vpop.f32.mrb[1].mxu0 }
 0x1bd   :  { %v2047_v60 = vadd.f32 %v1325_v35, %v1099_v31  ;;  %v1327_v20 = vpop.f32.mrb[2].mxu0 }
 0x1be   :  { %v1406_v53 = vadd.f32 %v2046_v19, %v2945_v33  ;;  %v2048_v39 = vadd.f32 %v1327_v20, %v1101_v38  ;;  %v1329_v1 = vpop.f32.mrb[3].mxu0 }
 0x1bf   :  { %v1407_v62 = vadd.f32 %v2047_v60, %v2947_v45  ;;  %v2049_v0 = vadd.f32 %v1329_v1, %v1103_v55 }
 0x1c0   :  { %v1408_v3 = vadd.f32 %v2048_v39, %v2949_v44  ;;  %v1438_v57 = vmax.f32 %v1406_v53, 0.0 }
 0x1c1   :  { %v1409_v48 = vadd.f32 %v2049_v0, %v2952_v59  ;;  %v1439_v2 = vmax.f32 %v1407_v62, 0.0 }
 0x1c2   :  { %v1440_v24 = vmax.f32 %v1408_v3, 0.0 }
 0x1c3   :  { %v1441_v4 = vmax.f32 %v1409_v48, 0.0  ;;  %v1333_v51 = vpop.f32.mrb[4].mxu0 }
 0x1c4   :  { %v1470_v61 = vmax.f32 %v1438_v57, %v1440_v24  ;;  %v2050_v6 = vadd.f32 %v1333_v51, %v1107_v40  ;;  %v1335_v47 = vpop.f32.mrb[5].mxu0 }
 0x1c5   :  { %v1477_v7 = vmax.f32 %v1439_v2, %v1441_v4  ;;  %v2051_v18 = vadd.f32 %v1335_v47, %v1109_v16  ;;  %v1337_v8 = vpop.f32.mrb[6].mxu0 }
 0x1c6   :  { %v1471_v9 = vrot.slane %v1470_v61, 4  ;;  %v1410_v15 = vadd.f32 %v2050_v6, %v2945_v33  ;;  %v2052_v37 = vadd.f32 %v1337_v8, %v1111_v63  ;;  %v1339_v50 = vpop.f32.mrb[7].mxu0 }
 0x1c7   :  { %v1478_v10 = vrot.slane %v1477_v7, 4  ;;  %v1411_v25 = vadd.f32 %v2051_v18, %v2947_v45  ;;  %v2053_v12 = vadd.f32 %v1339_v50, %v1113_v28 }
 0x1c8   :  { %v1472_v26 = vmax.f32 %v1470_v61, %v1471_v9  ;;  %v1412_v58 = vadd.f32 %v2052_v37, %v2949_v44  ;;  %v1442_v36 = vmax.f32 %v1410_v15, 0.0 }
 0x1c9   :  { %v1479_v11 = vmax.f32 %v1477_v7, %v1478_v10  ;;  %v1413_v52 = vadd.f32 %v2053_v12, %v2952_v59  ;;  %v1443_v21 = vmax.f32 %v1411_v25, 0.0 }
 0x1ca   :  { %v1473_v34 = vrot.slane %v1472_v26, 2  ;;  %v1444_v17 = vmax.f32 %v1412_v58, 0.0 }
 0x1cb   :  { %v1480_v46 = vrot.slane %v1479_v11, 2  ;;  %v1445_v42 = vmax.f32 %v1413_v52, 0.0  ;;  %v1343_v13 = vpop.f32.mrb[8].mxu0 }
 0x1cc   :  { %v1474_v5 = vmax.f32 %v1472_v26, %v1473_v34  ;;  %v1484_v23 = vmax.f32 %v1442_v36, %v1444_v17  ;;  %v2054_v27 = vadd.f32 %v1343_v13, %v1117_v54  ;;  %v1345_v41 = vpop.f32.mrb[9].mxu0 }
 0x1cd   :  { %v1481_v31 = vmax.f32 %v1479_v11, %v1480_v46  ;;  %v1491_v38 = vmax.f32 %v1443_v21, %v1445_v42  ;;  %v2055_v55 = vadd.f32 %v1345_v41, %v1119_v49  ;;  %v1347_v40 = vpop.f32.mrb[10].mxu0 }
 0x1ce   :  { %v1475_v16 = vrot.slane %v1474_v5, 1  ;;  %v1485_v63 = vrot.slane %v1484_v23, 4  ;;  %v1414_v28 = vadd.f32 %v2054_v27, %v2945_v33  ;;  %v2056_v43 = vadd.f32 %v1347_v40, %v1121_v14  ;;  %v1349_v19 = vpop.f32.mrb[11].mxu0 }
 0x1cf   :  { %v1482_v35 = vrot.slane %v1481_v31, 1  ;;  %v1492_v60 = vrot.slane %v1491_v38, 4  ;;  %v1415_v20 = vadd.f32 %v2055_v55, %v2947_v45  ;;  %v2057_v53 = vadd.f32 %v1349_v19, %v2935_v56 }
 0x1d0   :  { %v1476_v39 = vmax.f32 %v1474_v5, %v1475_v16  ;;  %v1486_v1 = vmax.f32 %v1484_v23, %v1485_v63  ;;  %v1416_v54 = vadd.f32 %v2056_v43, %v2949_v44  ;;  %v1446_v48 = vmax.f32 %v1414_v28, 0.0 }
 0x1d1   :  { %v1483_v62 = vmax.f32 %v1481_v31, %v1482_v35  ;;  %v1493_v0 = vmax.f32 %v1491_v38, %v1492_v60  ;;  %v1417_v49 = vadd.f32 %v2057_v53, %v2952_v59  ;;  %v1447_v24 = vmax.f32 %v1415_v20, 0.0 }
 0x1d2   :  { %v1487_v3 = vrot.slane %v1486_v1, 2  ;;  %v1448_v57 = vmax.f32 %v1416_v54, 0.0  ;;  %v1582_v51 = vpack.c.bf16 %v1476_v39, %v1476_v39 }
 0x1d3   :  { %v1494_v14 = vrot.slane %v1493_v0, 2  ;;  %v1449_v2 = vmax.f32 %v1417_v49, 0.0  ;;  %v1353_v4 = vpop.f32.mrb[12].mxu0  ;;  %v1583_v7 = vpack.c.bf16 %v1483_v62, %v1483_v62 }
 0x1d4   :  { %v1488_v61 = vmax.f32 %v1486_v1, %v1487_v3  ;;  %v1498_v6 = vmax.f32 %v1446_v48, %v1448_v57  ;;  %v2058_v56 = vadd.f32 %v1353_v4, %v2937_v29  ;;  %v1355_v47 = vpop.f32.mrb[13].mxu0  ;;  %v1653_v52 = vunpack.c.l.b16 %v1582_v51 }
 0x1d5   :  { %v1495_v18 = vmax.f32 %v1493_v0, %v1494_v14  ;;  %v1505_v8 = vmax.f32 %v1447_v24, %v1449_v2  ;;  %v2059_v9 = vadd.f32 %v1355_v47, %v2939_v30  ;;  %v1357_v15 = vpop.f32.mrb[14].mxu0  ;;  %v1654_v30 = vunpack.c.l.b16 %v1583_v7 }
 0x1d6   :  { %v1489_v37 = vrot.slane %v1488_v61, 1  ;;  %v1499_v50 = vrot.slane %v1498_v6, 4  ;;  %v1418_v10 = vadd.f32 %v2058_v56, %v2945_v33  ;;  %v2060_v25 = vadd.f32 %v1357_v15, %v2941_v32  ;;  %v1359_v12 = vpop.f32.mrb[15].mxu0 }
 0x1d7   :  { %v1496_v26 = vrot.slane %v1495_v18, 1  ;;  %v1506_v58 = vrot.slane %v1505_v8, 4  ;;  %v1419_v11 = vadd.f32 %v2059_v9, %v2947_v45  ;;  %v2061_v29 = vadd.f32 %v1359_v12, %v2943_v22 }
 0x1d8   :  { %v1490_v34 = vmax.f32 %v1488_v61, %v1489_v37  ;;  %v1500_v36 = vmax.f32 %v1498_v6, %v1499_v50  ;;  %v1420_v17 = vadd.f32 %v2060_v25, %v2949_v44  ;;  %v1450_v32 = vmax.f32 %v1418_v10, 0.0 }
 0x1d9   :  { %v1497_v46 = vmax.f32 %v1495_v18, %v1496_v26  ;;  %v1507_v21 = vmax.f32 %v1505_v8, %v1506_v58  ;;  %v1421_v42 = vadd.f32 %v2061_v29, %v2952_v59  ;;  %v1451_v31 = vmax.f32 %v1419_v11, 0.0  ;;  %v1250_v55 = vpop.f32.mrb[16].mxu1 }
 0x1da   :  { %v1584_v13 = vpack.c.bf16 %v1490_v34, %v1490_v34  ;;  %v1501_v5 = vrot.slane %v1500_v36, 2  ;;  %v1452_v23 = vmax.f32 %v1420_v17, 0.0  ;;  %v1252_v43 = vpop.f32.mrb[17].mxu1 }
 0x1db   :  { %v1585_v27 = vpack.c.bf16 %v1497_v46, %v1497_v46  ;;  %v1508_v41 = vrot.slane %v1507_v21, 2  ;;  %v1453_v38 = vmax.f32 %v1421_v42, 0.0  ;;  %v1363_v22 = vpop.f32.mrb[16].mxu0  ;;  %v1254_v39 = vpop.f32.mrb[18].mxu1 }
 0x1dc   :  { %v1655_v40 = vunpack.c.l.b16 %v1584_v13  ;;  %v1502_v16 = vmax.f32 %v1500_v36, %v1501_v5  ;;  %v1512_v63 = vmax.f32 %v1450_v32, %v1452_v23  ;;  %v2062_v28 = vadd.f32 %v1363_v22, %v1250_v55  ;;  %v1365_v19 = vpop.f32.mrb[17].mxu0  ;;  %v1256_v3 = vpop.f32.mrb[19].mxu1 }
 0x1dd   :  { %v1656_v35 = vunpack.c.l.b16 %v1585_v27  ;;  %v1509_v60 = vmax.f32 %v1507_v21, %v1508_v41  ;;  %v1519_v20 = vmax.f32 %v1451_v31, %v1453_v38  ;;  %v2063_v53 = vadd.f32 %v1365_v19, %v1252_v43  ;;  %v1367_v1 = vpop.f32.mrb[18].mxu0 }
 0x1de   :  { %v1670_v54 = vsel %vm1669_vm9, %v1655_v40, %v1653_v52  ;;  %v1503_v62 = vrot.slane %v1502_v16, 1  ;;  %v1513_v0 = vrot.slane %v1512_v63, 4  ;;  %v1422_v49 = vadd.f32 %v2062_v28, %v2945_v33  ;;  %v1369_v48 = vpop.f32.mrb[19].mxu0 }
 0x1df   :  { %v1683_v57 = vsel %vm1669_vm9, %v1656_v35, %v1654_v30  ;;  %v1510_v14 = vrot.slane %v1509_v60, 1  ;;  %v1520_v24 = vrot.slane %v1519_v20, 4  ;;  %v1423_v2 = vadd.f32 %v2063_v53, %v2947_v45 }
 0x1e0   :  { %v1504_v4 = vmax.f32 %v1502_v16, %v1503_v62  ;;  %v1514_v51 = vmax.f32 %v1512_v63, %v1513_v0  ;;  %v2064_v61 = vadd.f32 %v1367_v1, %v1254_v39  ;;  %v2065_v47 = vadd.f32 %v1369_v48, %v1256_v3 }
 0x1e1   :  { %v1511_v6 = vmax.f32 %v1509_v60, %v1510_v14  ;;  %v1521_v56 = vmax.f32 %v1519_v20, %v1520_v24  ;;  %v1454_v8 = vmax.f32 %v1422_v49, 0.0  ;;  %v1455_v50 = vmax.f32 %v1423_v2, 0.0  ;;  %v1260_v25 = vpop.f32.mrb[20].mxu1 }
 0x1e2   :  { %v1586_v7 = vpack.c.bf16 %v1504_v4, %v1504_v4  ;;  %v1515_v18 = vrot.slane %v1514_v51, 2  ;;  %v1424_v9 = vadd.f32 %v2064_v61, %v2949_v44  ;;  %v1425_v10 = vadd.f32 %v2065_v47, %v2952_v59  ;;  %v1262_v52 = vpop.f32.mrb[21].mxu1 }
 0x1e3   :  { %v1587_v15 = vpack.c.bf16 %v1511_v6, %v1511_v6  ;;  %v1522_v37 = vrot.slane %v1521_v56, 2  ;;  %v1373_v12 = vpop.f32.mrb[20].mxu0  ;;  %v1264_v21 = vpop.f32.mrb[22].mxu1 }
 0x1e4   :  { %v1657_v26 = vunpack.c.l.b16 %v1586_v7  ;;  %v1516_v58 = vmax.f32 %v1514_v51, %v1515_v18  ;;  %v1456_v11 = vmax.f32 %v1424_v9, 0.0  ;;  %v2066_v29 = vadd.f32 %v1373_v12, %v1260_v25  ;;  %v1375_v34 = vpop.f32.mrb[21].mxu0  ;;  %v1266_v27 = vpop.f32.mrb[23].mxu1 }
 0x1e5   :  { %v1658_v36 = vunpack.c.l.b16 %v1587_v15  ;;  %v1523_v17 = vmax.f32 %v1521_v56, %v1522_v37  ;;  %v1457_v30 = vmax.f32 %v1425_v10, 0.0  ;;  %v2067_v46 = vadd.f32 %v1375_v34, %v1262_v52  ;;  %v1377_v42 = vpop.f32.mrb[22].mxu0 }
 0x1e6   :  { %v1672_v13 = vsel %vm1671_vm10, %v1657_v26, %v1670_v54  ;;  %v1517_v5 = vrot.slane %v1516_v58, 1  ;;  %v1526_v32 = vmax.f32 %v1454_v8, %v1456_v11  ;;  %v1426_v23 = vadd.f32 %v2066_v29, %v2945_v33  ;;  %v1379_v41 = vpop.f32.mrb[23].mxu0 }
 0x1e7   :  { %v1524_v31 = vrot.slane %v1523_v17, 1  ;;  %v1533_v38 = vmax.f32 %v1455_v50, %v1457_v30  ;;  %v1427_v55 = vadd.f32 %v2067_v46, %v2947_v45  ;;  %v2068_v22 = vadd.f32 %v1377_v42, %v1264_v21 }
 0x1e8   :  { %v1518_v40 = vmax.f32 %v1516_v58, %v1517_v5  ;;  %v1527_v16 = vrot.slane %v1526_v32, 4  ;;  %v2069_v63 = vadd.f32 %v1379_v41, %v1266_v27  ;;  %v1458_v19 = vmax.f32 %v1426_v23, 0.0 }
 0x1e9   :  { %v1525_v28 = vmax.f32 %v1523_v17, %v1524_v31  ;;  %v1534_v43 = vrot.slane %v1533_v38, 4  ;;  %v1428_v35 = vadd.f32 %v2068_v22, %v2949_v44  ;;  %v1684_v39 = vsel %vm1671_vm10, %v1658_v36, %v1683_v57  ;;  %v1270_v49 = vpop.f32.mrb[24].mxu1 }
 0x1ea   :  { %v1588_v60 = vpack.c.bf16 %v1518_v40, %v1518_v40  ;;  %v1528_v20 = vmax.f32 %v1526_v32, %v1527_v16  ;;  %v1429_v53 = vadd.f32 %v2069_v63, %v2952_v59  ;;  %v1459_v62 = vmax.f32 %v1427_v55, 0.0  ;;  %v1272_v4 = vpop.f32.mrb[25].mxu1 }
 0x1eb   :  { %v1589_v1 = vpack.c.bf16 %v1525_v28, %v1525_v28  ;;  %v1535_v54 = vmax.f32 %v1533_v38, %v1534_v43  ;;  %v1460_v0 = vmax.f32 %v1428_v35, 0.0  ;;  %v1383_v3 = vpop.f32.mrb[24].mxu0  ;;  %v1274_v7 = vpop.f32.mrb[26].mxu1 }
 0x1ec   :  { %v1659_v48 = vunpack.c.l.b16 %v1588_v60  ;;  %v1529_v14 = vrot.slane %v1528_v20, 2  ;;  %v1461_v24 = vmax.f32 %v1429_v53, 0.0  ;;  %v2070_v2 = vadd.f32 %v1383_v3, %v1270_v49  ;;  %v1385_v51 = vpop.f32.mrb[25].mxu0  ;;  %v1276_v37 = vpop.f32.mrb[27].mxu1 }
 0x1ed   :  { %v1660_v61 = vunpack.c.l.b16 %v1589_v1  ;;  %v1536_v6 = vrot.slane %v1535_v54, 2  ;;  %v1540_v56 = vmax.f32 %v1458_v19, %v1460_v0  ;;  %v2071_v47 = vadd.f32 %v1385_v51, %v1272_v4  ;;  %v1387_v18 = vpop.f32.mrb[26].mxu0 }
 0x1ee   :  { %v1530_v8 = vmax.f32 %v1528_v20, %v1529_v14  ;;  %v1547_v57 = vmax.f32 %v1459_v62, %v1461_v24  ;;  %v1430_v9 = vadd.f32 %v2070_v2, %v2945_v33  ;;  %v2072_v15 = vadd.f32 %v1387_v18, %v1274_v7  ;;  %v1389_v50 = vpop.f32.mrb[27].mxu0 }
 0x1ef   :  { %v1537_v10 = vmax.f32 %v1535_v54, %v1536_v6  ;;  %v1541_v25 = vrot.slane %v1540_v56, 4  ;;  %v1431_v12 = vadd.f32 %v2071_v47, %v2947_v45  ;;  %v2073_v26 = vadd.f32 %v1389_v50, %v1276_v37 }
 0x1f0   :  { %v1531_v58 = vrot.slane %v1530_v8, 1  ;;  %v1548_v11 = vrot.slane %v1547_v57, 4  ;;  %v1462_v29 = vmax.f32 %v1430_v9, 0.0  ;;  %v1432_v52 = vadd.f32 %v2072_v15, %v2949_v44 }
 0x1f1   :  { %v1538_v34 = vrot.slane %v1537_v10, 1  ;;  %v1542_v36 = vmax.f32 %v1540_v56, %v1541_v25  ;;  %v1463_v17 = vmax.f32 %v1431_v12, 0.0  ;;  %v1433_v30 = vadd.f32 %v2073_v26, %v2952_v59  ;;  %v1280_v41 = vpop.f32.mrb[28].mxu1 }
 0x1f2   :  { %v1532_v46 = vmax.f32 %v1530_v8, %v1531_v58  ;;  %v1549_v21 = vmax.f32 %v1547_v57, %v1548_v11  ;;  %v1464_v42 = vmax.f32 %v1432_v52, 0.0  ;;  %v1674_v5 = vsel %vm1673_vm11, %v1659_v48, %v1672_v13  ;;  %v1282_v63 = vpop.f32.mrb[29].mxu1 }
 0x1f3   :  { %v1539_v32 = vmax.f32 %v1537_v10, %v1538_v34  ;;  %v1543_v23 = vrot.slane %v1542_v36, 2  ;;  %v1465_v27 = vmax.f32 %v1433_v30, 0.0  ;;  %v1393_v31 = vpop.f32.mrb[28].mxu0  ;;  %v1685_v38 = vsel %vm1673_vm11, %v1660_v61, %v1684_v39  ;;  %v1284_v20 = vpop.f32.mrb[30].mxu1 }
 0x1f4   :  { %v1590_v55 = vpack.c.bf16 %v1532_v46, %v1532_v46  ;;  %v1550_v22 = vrot.slane %v1549_v21, 2  ;;  %v1554_v40 = vmax.f32 %v1462_v29, %v1464_v42  ;;  %v2074_v16 = vadd.f32 %v1393_v31, %v1280_v41  ;;  %v1395_v28 = vpop.f32.mrb[29].mxu0  ;;  %v1286_v62 = vpop.f32.mrb[31].mxu1 }
 0x1f5   :  { %v1591_v43 = vpack.c.bf16 %v1539_v32, %v1539_v32  ;;  %v1544_v19 = vmax.f32 %v1542_v36, %v1543_v23  ;;  %v1561_v35 = vmax.f32 %v1463_v17, %v1465_v27  ;;  %v2075_v60 = vadd.f32 %v1395_v28, %v1282_v63  ;;  %v1397_v53 = vpop.f32.mrb[30].mxu0 }
 0x1f6   :  { %v1661_v13 = vunpack.c.l.b16 %v1590_v55  ;;  %v1551_v1 = vmax.f32 %v1549_v21, %v1550_v22  ;;  %v1555_v54 = vrot.slane %v1554_v40, 4  ;;  %v1399_v0 = vpop.f32.mrb[31].mxu0  ;;  %v1434_v24 = vadd.f32 %v2074_v16, %v2945_v33 }
 0x1f7   :  { %v1662_v49 = vunpack.c.l.b16 %v1591_v43  ;;  %v1545_v39 = vrot.slane %v1544_v19, 1  ;;  %v1562_v3 = vrot.slane %v1561_v35, 4  ;;  %v2076_v2 = vadd.f32 %v1397_v53, %v1284_v20 }
 0x1f8   :  { %v1552_v48 = vrot.slane %v1551_v1, 1  ;;  %v1556_v14 = vmax.f32 %v1554_v40, %v1555_v54  ;;  %v1435_v61 = vadd.f32 %v2075_v60, %v2947_v45  ;;  %v2077_v6 = vadd.f32 %v1399_v0, %v1286_v62 }
 0x1f9   :  { %v1546_v4 = vmax.f32 %v1544_v19, %v1545_v39  ;;  %v1563_v51 = vmax.f32 %v1561_v35, %v1562_v3  ;;  %v1436_v7 = vadd.f32 %v2076_v2, %v2949_v44  ;;  %v1676_v18 = vsel %vm1675_vm12, %v1661_v13, %v1674_v5 }
 0x1fa   :  { %v1553_v56 = vmax.f32 %v1551_v1, %v1552_v48  ;;  %v1557_v47 = vrot.slane %v1556_v14, 2  ;;  %v1437_v9 = vadd.f32 %v2077_v6, %v2952_v59  ;;  %v1686_v15 = vsel %vm1675_vm12, %v1662_v49, %v1685_v38  ;;  %v1975_v49 = vld [vmem:[#allocation13] ss:$0 sm:$0xff] }
 0x1fb   :  { %v1592_v8 = vpack.c.bf16 %v1546_v4, %v1546_v4  ;;  %v1564_v57 = vrot.slane %v1563_v51, 2  ;;  %v1466_v50 = vmax.f32 %v1434_v24, 0.0  ;;  %v1468_v10 = vmax.f32 %v1436_v7, 0.0 }
 0x1fc   :  { %v1593_v37 = vpack.c.bf16 %v1553_v56, %v1553_v56  ;;  %v1558_v33 = vmax.f32 %v1556_v14, %v1557_v47  ;;  %v1467_v45 = vmax.f32 %v1435_v61, 0.0  ;;  %v1469_v26 = vmax.f32 %v1437_v9, 0.0 }
 0x1fd   :  { %v1663_v25 = vunpack.c.l.b16 %v1592_v8  ;;  %v1565_v12 = vmax.f32 %v1563_v51, %v1564_v57  ;;  %v1568_v29 = vmax.f32 %v1466_v50, %v1468_v10 }
 0x1fe   :  { %v1664_v58 = vunpack.c.l.b16 %v1593_v37  ;;  %v1559_v11 = vrot.slane %v1558_v33, 1  ;;  %v1575_v52 = vmax.f32 %v1467_v45, %v1469_v26 }
 0x1ff   :  { %v1566_v44 = vrot.slane %v1565_v12, 1  ;;  %v1678_v34 = vsel %vm1677_vm13, %v1663_v25, %v1676_v18  ;;  %v1569_v17 = vrot.slane %v1568_v29, 4 }
 0x200   :  { %v1560_v36 = vmax.f32 %v1558_v33, %v1559_v11  ;;  %v1687_v59 = vsel %vm1677_vm13, %v1664_v58, %v1686_v15  ;;  %v1576_v46 = vrot.slane %v1575_v52, 4 }
 0x201   :  { %v1567_v30 = vmax.f32 %v1565_v12, %v1566_v44  ;;  %v1570_v42 = vmax.f32 %v1568_v29, %v1569_v17 }
 0x202   :  { %v1594_v21 = vpack.c.bf16 %v1560_v36, %v1560_v36  ;;  %v1577_v5 = vmax.f32 %v1575_v52, %v1576_v46 }
 0x203   :  { %v1595_v32 = vpack.c.bf16 %v1567_v30, %v1567_v30  ;;  %v1571_v27 = vrot.slane %v1570_v42, 2 }
 0x204   :  { %v1665_v23 = vunpack.c.l.b16 %v1594_v21  ;;  %v1578_v41 = vrot.slane %v1577_v5, 2 }
 0x205   :  { %v1666_v31 = vunpack.c.l.b16 %v1595_v32  ;;  %v1572_v38 = vmax.f32 %v1570_v42, %v1571_v27 }
 0x206   :  { %v1680_v55 = vsel %vm1679_vm14, %v1665_v23, %v1678_v34  ;;  %v1579_v22 = vmax.f32 %v1577_v5, %v1578_v41 }
 0x207   :  { %v1688_v40 = vsel %vm1679_vm14, %v1666_v31, %v1687_v59  ;;  %v1573_v16 = vrot.slane %v1572_v38, 1 }
 0x208   :  { %v1580_v63 = vrot.slane %v1579_v22, 1 }
 0x209   :  { %v1574_v28 = vmax.f32 %v1572_v38, %v1573_v16 }
 0x20a   :  { %v1581_v43 = vmax.f32 %v1579_v22, %v1580_v63 }
 0x20b   :  { %v1596_v19 = vpack.c.bf16 %v1574_v28, %v1574_v28 }
 0x20c   :  { %v1597_v35 = vpack.c.bf16 %v1581_v43, %v1581_v43 }
 0x20d   :  { %v1667_v60 = vunpack.c.l.b16 %v1596_v19 }
 0x20e   :  { %v1668_v20 = vunpack.c.l.b16 %v1597_v35 }
 0x20f   :  { %v1682_v53 = vsel %vm1681_vm15, %v1667_v60, %v1680_v55 }
 0x210   :  { %v1689_v13 = vsel %vm1681_vm15, %v1668_v20, %v1688_v40  ;;  %v1690_v54 = vpack.c.b16 %v1682_v53, %v1682_v53 }
 0x211   :  { %v1691_v1 = vpack.c.b16 %v1689_v13, %v1689_v13 }
 0x213   :  { %1822 = vmatprep.mubr.bf16.mxu1 %v1691_v1 }
 0x214   :  { %1823 = vmatmul.mubr.bf16.vlgmr.msra.gmra.mrb[32].mxu1 %v1690_v54 }
 0x2e7   :  { %v2008_v62 = vpop.f32.mrb[32].mxu1 }
 0x2e8   :  { %v2009_v0 = vpop.f32.mrb[33].mxu1 }
 0x2e9   :  { %v2010_v39 = vadd.f32 %v2009_v0, %v2008_v62  ;;  %v2011_v3 = vpop.f32.mrb[34].mxu1 }
 0x2ea   :  { %v2012_v48 = vpop.f32.mrb[35].mxu1 }
 0x2eb   :  { %v1825_v14 = vadd.f32 %v2010_v39, %v1975_v49 }
 0x2ed   :  { %1830 = vmax.xlane.f32.xlu0 %v1825_v14 }
 0x37a   :  { %v1831_v24 = vpop.xlane.xlu0 %1830 }
 0x37b   :  { %v1832_v2 = vsub.f32 %v1825_v14, %v1831_v24 }
 0x37d   :  { %v1833_v4 = vmul.f32 1.442695, %v1832_v2 }
 0x37f   :  { %2270 = vpow2.f32 %v1833_v4 }
 0x389   :  { %v2271_v51 = vpop.eup %2270 }
 0x38a   :  { %1835 = vadd.xlane.f32.xlu0 %v2271_v51 }
 0x417   :  { %v1836_v61 = vpop.xlane.xlu0 %1835 }
 0x418   :  { %2272 = vrcp.f32 %v1836_v61 }
 0x422   :  { %v2273_v6 = vpop.eup %2272 }
 0x423   :  { %v1838_v56 = vmul.f32 %v2273_v6, %v2271_v51 }
 0x425   :  { %1839 = vst [vmem:[#allocation14] sm:$0xff] %v1838_v56 }
 0x426   :  { %2405 = shalt.err (!%p2402_p6)
}
 0x427   :  { %s2406_s16 = scalar_lea.hbm %s3018_s6, 128 }
 0x428   :  { %p2407_p7 = scmp.ne.s32.totalorder %s3018_s6, %s2406_s16  ;;  %p2410_p8 = scmp.lt.u32.totalorder %s2406_s16, %s3018_s6 }
 0x42a   :  { %p2412_p9 = pnand %p2410_p8, %p2407_p7 }
 0x42c   :  { %2415 = shalt.err (!%p2412_p9)
}
 0x42d   :  { %1849 = dma.vmem_to_hbm [thread:$0]  %s1847_s13, 128, %s3018_s6, [#allocation7]  }
 0x42e   :  { %2428 = dma.done.wait [#allocation7], 128  }
 0x42f   :  { %2429 = vsyncadd [#allocation7], 4294967168 }
 0x430   :  { %1853 = vsyncpa [#allocation6], 1 }
 0x431   :  { %1854 = vsyncpa [#allocation9], 1 }
 0x432   :  { %1855 = vsyncpa [#allocation12], 1 }
 0x433   :  { %1856 = vsyncpa [#allocation7], 1 }

</bundles_post_ra>
